<compile_context>
chip_gen: v7x
topology: tpu7x:2x2x1
jax: 0.10.0
libtpu: 0.0.40
codegen_flags: <defaults>
</compile_context>

<pallas_src>
import functools

import jax
import jax.numpy as jnp
from jax import lax
from jax.experimental import pallas as pl
from jax.experimental.pallas import tpu as pltpu

EMB_DIM = 128
HIDDEN = 64            # per-GRU hidden size
HM = 2 * HIDDEN        # merged (comment|parent) hidden lanes = 128
GATES = 3 * HIDDEN     # per-GRU fused gate width (r,z,n) = 192
GM = 3 * HM            # merged gate width = 384
HALF = 64              # stacked one-hot half width (must be > vocab_size)
BP = 8                 # sublane-padded batch


def _vmem():
    return pl.BlockSpec(memory_space=pltpu.MemorySpace.VMEM)


# ----------------------------------------------------------------------------
# Fused kernel
# ----------------------------------------------------------------------------
def fused_net_kernel(ids_ref, lens_ref, wslab_ref, bslab_ref, out_ref, *, T, half):
    Bp = lens_ref.shape[0]
    TB = T * Bp
    H, Hm, G = HIDDEN, HM, GM

    # ---- layer-0 input pre-activations for ALL steps in ONE matmul ----------
    # Stacked one-hot over [comment vocab | parent vocab]; column half-1 is an
    # always-on bias column so b_ih0 (+b_hh0 for r,z) accumulates in f32.
    ids = ids_ref[...]                                               # [TB, 2] i32
    col = lax.broadcasted_iota(jnp.int32, (TB, 2 * half), 1)
    onehot = ((col == ids[:, 0:1]) | (col == ids[:, 1:2])
              | (col == half - 1)).astype(jnp.bfloat16)              # [TB, 2*half]
    table0 = wslab_ref[0:2 * half, :]                                # [2*half, G] bf16
    gi0_all = jnp.dot(onehot, table0,
                      preferred_element_type=jnp.float32)            # [TB, G] f32

    o = 2 * half
    whh0 = wslab_ref[o:o + Hm, :]                                    # [128, 384] bf16
    wih1 = wslab_ref[o + Hm:o + 2 * Hm, :]
    whh1 = wslab_ref[o + 2 * Hm:o + 3 * Hm, :]
    w1 = wslab_ref[o + 3 * Hm:o + 4 * Hm, 0:Hm]                      # [128, 128] bf16

    # loop-invariant bias broadcasts, hoisted (JAX does not CSE broadcast_in_dim)
    bh0 = jnp.broadcast_to(bslab_ref[0:1, :], (Bp, G))   # layer-0 b_hn (n lanes only)
    bi1 = jnp.broadcast_to(bslab_ref[1:2, :], (Bp, G))   # layer-1 b_ih (+b_hh for r,z)
    bh1 = jnp.broadcast_to(bslab_ref[2:3, :], (Bp, G))   # layer-1 b_hn (n lanes only)

    # per-lane sequence length: comment length in lanes 0:H, parent in H:2H
    lens = lens_ref[...]                                             # [Bp, 2] i32
    lane = lax.broadcasted_iota(jnp.int32, (Bp, Hm), 1)
    len_lane = jnp.where(lane < H, lens[:, 0:1], lens[:, 1:2])       # [Bp, 128]

    def gru_gate(gi, gh, h_prev):
        # torch GRU cell; merged gate layout (r_c|r_p | z_c|z_p | n_c|n_p)
        rz = jax.nn.sigmoid(gi[:, :2 * Hm] + gh[:, :2 * Hm])         # one pass, 256 lanes
        r, z = rz[:, :Hm], rz[:, Hm:]
        n = jnp.tanh(gi[:, 2 * Hm:] + r * gh[:, 2 * Hm:])
        return (1.0 - z) * n + z * h_prev

    h0 = jnp.zeros((Bp, Hm), jnp.float32)
    h1 = jnp.zeros((Bp, Hm), jnp.float32)
    for t in range(T):                     # T static & small; state stays in vregs
        keep = t < len_lane                # pack_padded_sequence freeze mask
        gh0 = jnp.dot(h0.astype(jnp.bfloat16), whh0,
                      preferred_element_type=jnp.float32) + bh0
        h0 = jnp.where(keep, gru_gate(gi0_all[t * Bp:(t + 1) * Bp, :], gh0, h0), h0)

        # TODO(synk): inter-layer GRU dropout(p=0.5) treated as eval-mode identity.
        gi1 = jnp.dot(h0.astype(jnp.bfloat16), wih1,
                      preferred_element_type=jnp.float32) + bi1
        gh1 = jnp.dot(h1.astype(jnp.bfloat16), whh1,
                      preferred_element_type=jnp.float32) + bh1
        h1 = jnp.where(keep, gru_gate(gi1, gh1, h1), h1)

    # ---- MLP head: h1 is already concat(h_comment, h_parent) in lanes -------
    y = jnp.dot(h1.astype(jnp.bfloat16), w1,
                preferred_element_type=jnp.float32) + bslab_ref[3:4, 0:Hm]
    y = jnp.where(y > 0, y, 0.01 * y)      # LeakyReLU(0.01)
    # TODO(synk): head Dropout(0.1) treated as eval-mode identity.
    w2_row = bslab_ref[4:5, 0:Hm]          # Linear(128,1) weight as a lane vector (f32)
    b2 = bslab_ref[3:4, Hm:Hm + 1]         # [1, 1]
    out_ref[...] = jnp.sum(y * w2_row, axis=-1, keepdims=True) + b2


# ----------------------------------------------------------------------------
# Parameter init (deterministic, synthetic), fused-gate layout [in, 3H], gate
# order (r,z,n).  (Importing real torch weights would require transposing
# weight_ih_l*/weight_hh_l* from [3H,in] and keeping gate order.)
# ----------------------------------------------------------------------------
def init_params(key, vocab_size):
    ks = iter(jax.random.split(key, 32))

    def nrm(shape, scale=0.1):
        return (scale * jax.random.normal(next(ks), shape)).astype(jnp.float32)

    def gru_layer(in_dim):
        return {"w_ih": nrm((in_dim, GATES)), "w_hh": nrm((HIDDEN, GATES)),
                "b_ih": nrm((1, GATES)), "b_hh": nrm((1, GATES))}

    def gru():
        return {"l0": gru_layer(EMB_DIM), "l1": gru_layer(HIDDEN)}

    return {
        "emb": nrm((vocab_size, EMB_DIM), scale=1.0),
        "gru_comment": gru(),
        "gru_parent": gru(),
        "head": {"w1": nrm((2 * HIDDEN, 128)), "b1": nrm((1, 128)),
                 "w2": nrm((128, 1)), "b2": nrm((1, 1))},
    }


# ----------------------------------------------------------------------------
# One-time packing: fold emb into the layer-0 table, interleave/merge the two
# GRUs (block-diagonal), pack everything into 2 slabs.
# ----------------------------------------------------------------------------
def _interleave(c, p):
    """[rows,3H] comment + parent -> [rows,GM] with per-gate (c|p) lane packing."""
    out = jnp.zeros((c.shape[0], GM), c.dtype)
    for g in range(3):
        out = out.at[:, g * HM:g * HM + HIDDEN].set(c[:, g * HIDDEN:(g + 1) * HIDDEN])
        out = out.at[:, g * HM + HIDDEN:(g + 1) * HM].set(p[:, g * HIDDEN:(g + 1) * HIDDEN])
    return out


def _block_diag(c, p):
    """[H,3H] each -> [HM,GM] block-diagonal, gate-interleaved."""
    out = jnp.zeros((HM, GM), c.dtype)
    for g in range(3):
        out = out.at[:HIDDEN, g * HM:g * HM + HIDDEN].set(c[:, g * HIDDEN:(g + 1) * HIDDEN])
        out = out.at[HIDDEN:, g * HM + HIDDEN:(g + 1) * HM].set(p[:, g * HIDDEN:(g + 1) * HIDDEN])
    return out


def _bias_i(layer):
    """b_ih with b_hh pre-summed into r,z (n keeps b_hn inside the recurrence)."""
    return layer["b_ih"].at[:, :2 * HIDDEN].add(layer["b_hh"][:, :2 * HIDDEN])


def _bias_hn(layer):
    return jnp.zeros((1, GATES), jnp.float32).at[:, 2 * HIDDEN:].set(
        layer["b_hh"][:, 2 * HIDDEN:])


def pack_params(params):
    emb = params["emb"]
    V = emb.shape[0]
    assert V < HALF, "vocab must leave column HALF-1 free for the bias column"
    c, p = params["gru_comment"], params["gru_parent"]

    # layer-0: token -> gate pre-activation table (embedding folded into W_ih0)
    tab_c = emb @ c["l0"]["w_ih"]                      # [V, 3H]
    tab_p = emb @ p["l0"]["w_ih"]
    table = jnp.zeros((2 * HALF, GM), jnp.float32)
    for g in range(3):
        table = table.at[:V, g * HM:g * HM + HIDDEN].set(
            tab_c[:, g * HIDDEN:(g + 1) * HIDDEN])
        table = table.at[HALF:HALF + V, g * HM + HIDDEN:(g + 1) * HM].set(
            tab_p[:, g * HIDDEN:(g + 1) * HIDDEN])
    # always-selected bias column carries both GRUs' layer-0 input biases
    table = table.at[HALF - 1:HALF, :].set(_interleave(_bias_i(c["l0"]), _bias_i(p["l0"])))

    whh0 = _block_diag(c["l0"]["w_hh"], p["l0"]["w_hh"])
    wih1 = _block_diag(c["l1"]["w_ih"], p["l1"]["w_ih"])
    whh1 = _block_diag(c["l1"]["w_hh"], p["l1"]["w_hh"])

    hd = params["head"]
    w1 = jnp.zeros((HM, GM), jnp.float32).at[:, :HM].set(hd["w1"])  # concat(h_c,h_p) @ W1

    wslab = jnp.concatenate([table, whh0, wih1, whh1, w1], axis=0).astype(jnp.bfloat16)

    bslab = jnp.zeros((5, GM), jnp.float32)
    bslab = bslab.at[0:1].set(_interleave(_bias_hn(c["l0"]), _bias_hn(p["l0"])))
    bslab = bslab.at[1:2].set(_interleave(_bias_i(c["l1"]), _bias_i(p["l1"])))
    bslab = bslab.at[2:3].set(_interleave(_bias_hn(c["l1"]), _bias_hn(p["l1"])))
    bslab = bslab.at[3, :HM].set(hd["b1"][0])
    bslab = bslab.at[3, HM].set(hd["b2"][0, 0])
    bslab = bslab.at[4, :HM].set(hd["w2"][:, 0])
    return {"wslab": wslab, "bslab": bslab}


# ----------------------------------------------------------------------------
# Forward: trivial layout glue + ONE pallas_call with 4 inputs
# ----------------------------------------------------------------------------
def net_forward(packed, x1, x1_lengths, x2, x2_lengths):
    B, T = x1.shape
    Bp = max(BP, ((B + 7) // 8) * 8)        # pad batch to the 8-row sublane tile

    def pad_tm(a):                          # [B,T] -> time-major flat [T*Bp]
        a = jnp.asarray(a, jnp.int32).T
        return jnp.pad(a, ((0, 0), (0, Bp - B))).reshape(T * Bp)

    ids = jnp.stack([pad_tm(x1), pad_tm(x2) + HALF], axis=1)         # [T*Bp, 2]
    lens = jnp.stack([jnp.pad(jnp.asarray(x1_lengths, jnp.int32), (0, Bp - B)),
                      jnp.pad(jnp.asarray(x2_lengths, jnp.int32), (0, Bp - B))],
                     axis=1)                                          # [Bp, 2]

    kernel = functools.partial(fused_net_kernel, T=T, half=HALF)
    out = pl.pallas_call(
        kernel,
        out_shape=jax.ShapeDtypeStruct((Bp, 1), jnp.float32),
        in_specs=[_vmem()] * 4,
        out_specs=_vmem(),
    )(ids, lens, packed["wslab"], packed["bslab"])
    return out[:B]


if __name__ == "__main__":
    key = jax.random.PRNGKey(0)
    k_param, k_x1, k_x2 = jax.random.split(key, 3)

    vocab_size = 50
    B, T = 2, 8

    params = init_params(k_param, vocab_size)
    packed = pack_params(params)            # one-time precompute (fold + merge + pack)

    x1 = jax.random.randint(k_x1, (B, T), 0, vocab_size, dtype=jnp.int32)
    x2 = jax.random.randint(k_x2, (B, T), 0, vocab_size, dtype=jnp.int32)
    x1_lengths = jnp.array([T, T - 2], dtype=jnp.int32)
    x2_lengths = jnp.array([T - 1, T], dtype=jnp.int32)

    out = jax.jit(net_forward)(packed, x1, x1_lengths, x2, x2_lengths)
    jax.block_until_ready(out)
    assert out.shape == (B, 1)
    print("KERNEL_OK")
</pallas_src>

<mosaic_0001>
module attributes {stable_mosaic.version = 11 : i64} {
  func.func @fused_net_kernel(%arg0: memref<64x2xi32, #tpu.memory_space<vmem>>, %arg1: memref<8x2xi32, #tpu.memory_space<vmem>>, %arg2: memref<640x384xbf16, #tpu.memory_space<vmem>>, %arg3: memref<5x384xf32, #tpu.memory_space<vmem>>, %arg4: memref<8x1xf32, #tpu.memory_space<vmem>>) attributes {dimension_semantics = [], scalar_prefetch = 0 : i64, scratch_operands = 0 : i64, tpu.core_type = #tpu.core_type<tc>} {
    %c0 = arith.constant 0 : index
    %c0_0 = arith.constant 0 : index
    %0 = vector.load %arg0[%c0, %c0_0] : memref<64x2xi32, #tpu.memory_space<vmem>>, vector<64x2xi32>
    %1 = tpu.iota {dimensions = array<i32: 1>} : vector<64x128xi32>
    %2 = vector.extract_strided_slice %0 {offsets = [0, 0], sizes = [64, 1], strides = [1, 1]} : vector<64x2xi32> to vector<64x1xi32>
    %3 = vector.broadcast %2 : vector<64x1xi32> to vector<64x128xi32>
    %4 = arith.cmpi eq, %1, %3 : vector<64x128xi32>
    %5 = vector.extract_strided_slice %0 {offsets = [0, 1], sizes = [64, 1], strides = [1, 1]} : vector<64x2xi32> to vector<64x1xi32>
    %6 = vector.broadcast %5 : vector<64x1xi32> to vector<64x128xi32>
    %7 = arith.cmpi eq, %1, %6 : vector<64x128xi32>
    %8 = arith.ori %4, %7 : vector<64x128xi1>
    %c63_i32 = arith.constant 63 : i32
    %9 = vector.broadcast %c63_i32 : i32 to vector<64x128xi32>
    %10 = arith.cmpi eq, %1, %9 : vector<64x128xi32>
    %11 = arith.ori %8, %10 : vector<64x128xi1>
    %12 = arith.extui %11 : vector<64x128xi1> to vector<64x128xi32>
    %13 = arith.sitofp %12 : vector<64x128xi32> to vector<64x128xf32>
    %14 = arith.truncf %13 : vector<64x128xf32> to vector<64x128xbf16>
    %c0_1 = arith.constant 0 : index
    %c0_2 = arith.constant 0 : index
    %15 = vector.load %arg2[%c0_1, %c0_2] : memref<640x384xbf16, #tpu.memory_space<vmem>>, vector<128x384xbf16>
    %cst = arith.constant dense<0.000000e+00> : vector<64x384xf32>
    %16 = tpu.matmul %14, %15, %cst {dimension_numbers = #tpu.dot_dimension_numbers<[1], [0], [0], [1], [0, 0, 1, 1], [], []>} : vector<64x128xbf16>, vector<128x384xbf16>, vector<64x384xf32> -> vector<64x384xf32>
    %c128 = arith.constant 128 : index
    %c0_3 = arith.constant 0 : index
    %17 = vector.load %arg2[%c128, %c0_3] : memref<640x384xbf16, #tpu.memory_space<vmem>>, vector<128x384xbf16>
    %c256 = arith.constant 256 : index
    %c0_4 = arith.constant 0 : index
    %18 = vector.load %arg2[%c256, %c0_4] : memref<640x384xbf16, #tpu.memory_space<vmem>>, vector<128x384xbf16>
    %c384 = arith.constant 384 : index
    %c0_5 = arith.constant 0 : index
    %19 = vector.load %arg2[%c384, %c0_5] : memref<640x384xbf16, #tpu.memory_space<vmem>>, vector<128x384xbf16>
    %c512 = arith.constant 512 : index
    %c0_6 = arith.constant 0 : index
    %20 = vector.load %arg2[%c512, %c0_6] : memref<640x384xbf16, #tpu.memory_space<vmem>>, vector<128x128xbf16>
    %c0_7 = arith.constant 0 : index
    %c0_8 = arith.constant 0 : index
    %21 = vector.load %arg3[%c0_7, %c0_8] : memref<5x384xf32, #tpu.memory_space<vmem>>, vector<1x384xf32>
    %22 = vector.shape_cast %21 : vector<1x384xf32> to vector<1x384xf32>
    %23 = vector.broadcast %22 : vector<1x384xf32> to vector<8x384xf32>
    %c1 = arith.constant 1 : index
    %c0_9 = arith.constant 0 : index
    %24 = vector.load %arg3[%c1, %c0_9] : memref<5x384xf32, #tpu.memory_space<vmem>>, vector<1x384xf32>
    %25 = vector.shape_cast %24 : vector<1x384xf32> to vector<1x384xf32>
    %26 = vector.broadcast %25 : vector<1x384xf32> to vector<8x384xf32>
    %c2 = arith.constant 2 : index
    %c0_10 = arith.constant 0 : index
    %27 = vector.load %arg3[%c2, %c0_10] : memref<5x384xf32, #tpu.memory_space<vmem>>, vector<1x384xf32>
    %28 = vector.shape_cast %27 : vector<1x384xf32> to vector<1x384xf32>
    %29 = vector.broadcast %28 : vector<1x384xf32> to vector<8x384xf32>
    %c0_11 = arith.constant 0 : index
    %c0_12 = arith.constant 0 : index
    %30 = vector.load %arg1[%c0_11, %c0_12] : memref<8x2xi32, #tpu.memory_space<vmem>>, vector<8x2xi32>
    %31 = tpu.iota {dimensions = array<i32: 1>} : vector<8x128xi32>
    %c64_i32 = arith.constant 64 : i32
    %32 = vector.broadcast %c64_i32 : i32 to vector<8x128xi32>
    %33 = arith.cmpi slt, %31, %32 : vector<8x128xi32>
    %34 = vector.extract_strided_slice %30 {offsets = [0, 0], sizes = [8, 1], strides = [1, 1]} : vector<8x2xi32> to vector<8x1xi32>
    %35 = vector.extract_strided_slice %30 {offsets = [0, 1], sizes = [8, 1], strides = [1, 1]} : vector<8x2xi32> to vector<8x1xi32>
    %36 = vector.shape_cast %34 : vector<8x1xi32> to vector<8x1xi32>
    %37 = vector.broadcast %36 : vector<8x1xi32> to vector<8x128xi32>
    %38 = vector.shape_cast %35 : vector<8x1xi32> to vector<8x1xi32>
    %39 = vector.broadcast %38 : vector<8x1xi32> to vector<8x128xi32>
    %40 = arith.select %33, %37, %39 : vector<8x128xi1>, vector<8x128xi32>
    %cst_13 = arith.constant 0.000000e+00 : f32
    %41 = vector.broadcast %cst_13 : f32 to vector<8x128xf32>
    %cst_14 = arith.constant 0.000000e+00 : f32
    %42 = vector.broadcast %cst_14 : f32 to vector<8x128xf32>
    %c0_i32 = arith.constant 0 : i32
    %43 = vector.broadcast %c0_i32 : i32 to vector<8x128xi32>
    %44 = arith.cmpi sgt, %40, %43 : vector<8x128xi32>
    %45 = arith.truncf %41 : vector<8x128xf32> to vector<8x128xbf16>
    %cst_15 = arith.constant dense<0.000000e+00> : vector<8x384xf32>
    %46 = tpu.matmul %45, %17, %cst_15 {dimension_numbers = #tpu.dot_dimension_numbers<[1], [0], [0], [1], [0, 0, 1, 1], [], []>} : vector<8x128xbf16>, vector<128x384xbf16>, vector<8x384xf32> -> vector<8x384xf32>
    %47 = arith.addf %46, %23 : vector<8x384xf32>
    %48 = vector.extract_strided_slice %16 {offsets = [0, 0], sizes = [8, 384], strides = [1, 1]} : vector<64x384xf32> to vector<8x384xf32>
    %49 = vector.extract_strided_slice %48 {offsets = [0, 0], sizes = [8, 256], strides = [1, 1]} : vector<8x384xf32> to vector<8x256xf32>
    %50 = vector.extract_strided_slice %47 {offsets = [0, 0], sizes = [8, 256], strides = [1, 1]} : vector<8x384xf32> to vector<8x256xf32>
    %51 = arith.addf %49, %50 : vector<8x256xf32>
    %52 = arith.negf %51 : vector<8x256xf32>
    %53 = math.exp %52 : vector<8x256xf32>
    %cst_16 = arith.constant 1.000000e+00 : f32
    %54 = vector.broadcast %cst_16 : f32 to vector<8x256xf32>
    %55 = arith.addf %54, %53 : vector<8x256xf32>
    %56 = arith.divf %54, %55 : vector<8x256xf32>
    %57 = vector.extract_strided_slice %56 {offsets = [0, 0], sizes = [8, 128], strides = [1, 1]} : vector<8x256xf32> to vector<8x128xf32>
    %58 = vector.extract_strided_slice %56 {offsets = [0, 128], sizes = [8, 128], strides = [1, 1]} : vector<8x256xf32> to vector<8x128xf32>
    %59 = vector.extract_strided_slice %48 {offsets = [0, 256], sizes = [8, 128], strides = [1, 1]} : vector<8x384xf32> to vector<8x128xf32>
    %60 = vector.extract_strided_slice %47 {offsets = [0, 256], sizes = [8, 128], strides = [1, 1]} : vector<8x384xf32> to vector<8x128xf32>
    %61 = arith.mulf %57, %60 : vector<8x128xf32>
    %62 = arith.addf %59, %61 : vector<8x128xf32>
    %63 = math.tanh %62 : vector<8x128xf32>
    %cst_17 = arith.constant 1.000000e+00 : f32
    %64 = vector.broadcast %cst_17 : f32 to vector<8x128xf32>
    %65 = arith.subf %64, %58 : vector<8x128xf32>
    %66 = arith.mulf %65, %63 : vector<8x128xf32>
    %67 = arith.mulf %58, %41 : vector<8x128xf32>
    %68 = arith.addf %66, %67 : vector<8x128xf32>
    %69 = arith.select %44, %68, %41 : vector<8x128xi1>, vector<8x128xf32>
    %70 = arith.truncf %69 : vector<8x128xf32> to vector<8x128xbf16>
    %cst_18 = arith.constant dense<0.000000e+00> : vector<8x384xf32>
    %71 = tpu.matmul %70, %18, %cst_18 {dimension_numbers = #tpu.dot_dimension_numbers<[1], [0], [0], [1], [0, 0, 1, 1], [], []>} : vector<8x128xbf16>, vector<128x384xbf16>, vector<8x384xf32> -> vector<8x384xf32>
    %72 = arith.addf %71, %26 : vector<8x384xf32>
    %73 = arith.truncf %42 : vector<8x128xf32> to vector<8x128xbf16>
    %cst_19 = arith.constant dense<0.000000e+00> : vector<8x384xf32>
    %74 = tpu.matmul %73, %19, %cst_19 {dimension_numbers = #tpu.dot_dimension_numbers<[1], [0], [0], [1], [0, 0, 1, 1], [], []>} : vector<8x128xbf16>, vector<128x384xbf16>, vector<8x384xf32> -> vector<8x384xf32>
    %75 = arith.addf %74, %29 : vector<8x384xf32>
    %76 = vector.extract_strided_slice %72 {offsets = [0, 0], sizes = [8, 256], strides = [1, 1]} : vector<8x384xf32> to vector<8x256xf32>
    %77 = vector.extract_strided_slice %75 {offsets = [0, 0], sizes = [8, 256], strides = [1, 1]} : vector<8x384xf32> to vector<8x256xf32>
    %78 = arith.addf %76, %77 : vector<8x256xf32>
    %79 = arith.negf %78 : vector<8x256xf32>
    %80 = math.exp %79 : vector<8x256xf32>
    %cst_20 = arith.constant 1.000000e+00 : f32
    %81 = vector.broadcast %cst_20 : f32 to vector<8x256xf32>
    %82 = arith.addf %81, %80 : vector<8x256xf32>
    %83 = arith.divf %81, %82 : vector<8x256xf32>
    %84 = vector.extract_strided_slice %83 {offsets = [0, 0], sizes = [8, 128], strides = [1, 1]} : vector<8x256xf32> to vector<8x128xf32>
    %85 = vector.extract_strided_slice %83 {offsets = [0, 128], sizes = [8, 128], strides = [1, 1]} : vector<8x256xf32> to vector<8x128xf32>
    %86 = vector.extract_strided_slice %72 {offsets = [0, 256], sizes = [8, 128], strides = [1, 1]} : vector<8x384xf32> to vector<8x128xf32>
    %87 = vector.extract_strided_slice %75 {offsets = [0, 256], sizes = [8, 128], strides = [1, 1]} : vector<8x384xf32> to vector<8x128xf32>
    %88 = arith.mulf %84, %87 : vector<8x128xf32>
    %89 = arith.addf %86, %88 : vector<8x128xf32>
    %90 = math.tanh %89 : vector<8x128xf32>
    %cst_21 = arith.constant 1.000000e+00 : f32
    %91 = vector.broadcast %cst_21 : f32 to vector<8x128xf32>
    %92 = arith.subf %91, %85 : vector<8x128xf32>
    %93 = arith.mulf %92, %90 : vector<8x128xf32>
    %94 = arith.mulf %85, %42 : vector<8x128xf32>
    %95 = arith.addf %93, %94 : vector<8x128xf32>
    %96 = arith.select %44, %95, %42 : vector<8x128xi1>, vector<8x128xf32>
    %c1_i32 = arith.constant 1 : i32
    %97 = vector.broadcast %c1_i32 : i32 to vector<8x128xi32>
    %98 = arith.cmpi sgt, %40, %97 : vector<8x128xi32>
    %99 = arith.truncf %69 : vector<8x128xf32> to vector<8x128xbf16>
    %cst_22 = arith.constant dense<0.000000e+00> : vector<8x384xf32>
    %100 = tpu.matmul %99, %17, %cst_22 {dimension_numbers = #tpu.dot_dimension_numbers<[1], [0], [0], [1], [0, 0, 1, 1], [], []>} : vector<8x128xbf16>, vector<128x384xbf16>, vector<8x384xf32> -> vector<8x384xf32>
    %101 = arith.addf %100, %23 : vector<8x384xf32>
    %102 = vector.extract_strided_slice %16 {offsets = [8, 0], sizes = [8, 384], strides = [1, 1]} : vector<64x384xf32> to vector<8x384xf32>
    %103 = vector.extract_strided_slice %102 {offsets = [0, 0], sizes = [8, 256], strides = [1, 1]} : vector<8x384xf32> to vector<8x256xf32>
    %104 = vector.extract_strided_slice %101 {offsets = [0, 0], sizes = [8, 256], strides = [1, 1]} : vector<8x384xf32> to vector<8x256xf32>
    %105 = arith.addf %103, %104 : vector<8x256xf32>
    %106 = arith.negf %105 : vector<8x256xf32>
    %107 = math.exp %106 : vector<8x256xf32>
    %cst_23 = arith.constant 1.000000e+00 : f32
    %108 = vector.broadcast %cst_23 : f32 to vector<8x256xf32>
    %109 = arith.addf %108, %107 : vector<8x256xf32>
    %110 = arith.divf %108, %109 : vector<8x256xf32>
    %111 = vector.extract_strided_slice %110 {offsets = [0, 0], sizes = [8, 128], strides = [1, 1]} : vector<8x256xf32> to vector<8x128xf32>
    %112 = vector.extract_strided_slice %110 {offsets = [0, 128], sizes = [8, 128], strides = [1, 1]} : vector<8x256xf32> to vector<8x128xf32>
    %113 = vector.extract_strided_slice %102 {offsets = [0, 256], sizes = [8, 128], strides = [1, 1]} : vector<8x384xf32> to vector<8x128xf32>
    %114 = vector.extract_strided_slice %101 {offsets = [0, 256], sizes = [8, 128], strides = [1, 1]} : vector<8x384xf32> to vector<8x128xf32>
    %115 = arith.mulf %111, %114 : vector<8x128xf32>
    %116 = arith.addf %113, %115 : vector<8x128xf32>
    %117 = math.tanh %116 : vector<8x128xf32>
    %cst_24 = arith.constant 1.000000e+00 : f32
    %118 = vector.broadcast %cst_24 : f32 to vector<8x128xf32>
    %119 = arith.subf %118, %112 : vector<8x128xf32>
    %120 = arith.mulf %119, %117 : vector<8x128xf32>
    %121 = arith.mulf %112, %69 : vector<8x128xf32>
    %122 = arith.addf %120, %121 : vector<8x128xf32>
    %123 = arith.select %98, %122, %69 : vector<8x128xi1>, vector<8x128xf32>
    %124 = arith.truncf %123 : vector<8x128xf32> to vector<8x128xbf16>
    %cst_25 = arith.constant dense<0.000000e+00> : vector<8x384xf32>
    %125 = tpu.matmul %124, %18, %cst_25 {dimension_numbers = #tpu.dot_dimension_numbers<[1], [0], [0], [1], [0, 0, 1, 1], [], []>} : vector<8x128xbf16>, vector<128x384xbf16>, vector<8x384xf32> -> vector<8x384xf32>
    %126 = arith.addf %125, %26 : vector<8x384xf32>
    %127 = arith.truncf %96 : vector<8x128xf32> to vector<8x128xbf16>
    %cst_26 = arith.constant dense<0.000000e+00> : vector<8x384xf32>
    %128 = tpu.matmul %127, %19, %cst_26 {dimension_numbers = #tpu.dot_dimension_numbers<[1], [0], [0], [1], [0, 0, 1, 1], [], []>} : vector<8x128xbf16>, vector<128x384xbf16>, vector<8x384xf32> -> vector<8x384xf32>
    %129 = arith.addf %128, %29 : vector<8x384xf32>
    %130 = vector.extract_strided_slice %126 {offsets = [0, 0], sizes = [8, 256], strides = [1, 1]} : vector<8x384xf32> to vector<8x256xf32>
    %131 = vector.extract_strided_slice %129 {offsets = [0, 0], sizes = [8, 256], strides = [1, 1]} : vector<8x384xf32> to vector<8x256xf32>
    %132 = arith.addf %130, %131 : vector<8x256xf32>
    %133 = arith.negf %132 : vector<8x256xf32>
    %134 = math.exp %133 : vector<8x256xf32>
    %cst_27 = arith.constant 1.000000e+00 : f32
    %135 = vector.broadcast %cst_27 : f32 to vector<8x256xf32>
    %136 = arith.addf %135, %134 : vector<8x256xf32>
    %137 = arith.divf %135, %136 : vector<8x256xf32>
    %138 = vector.extract_strided_slice %137 {offsets = [0, 0], sizes = [8, 128], strides = [1, 1]} : vector<8x256xf32> to vector<8x128xf32>
    %139 = vector.extract_strided_slice %137 {offsets = [0, 128], sizes = [8, 128], strides = [1, 1]} : vector<8x256xf32> to vector<8x128xf32>
    %140 = vector.extract_strided_slice %126 {offsets = [0, 256], sizes = [8, 128], strides = [1, 1]} : vector<8x384xf32> to vector<8x128xf32>
    %141 = vector.extract_strided_slice %129 {offsets = [0, 256], sizes = [8, 128], strides = [1, 1]} : vector<8x384xf32> to vector<8x128xf32>
    %142 = arith.mulf %138, %141 : vector<8x128xf32>
    %143 = arith.addf %140, %142 : vector<8x128xf32>
    %144 = math.tanh %143 : vector<8x128xf32>
    %cst_28 = arith.constant 1.000000e+00 : f32
    %145 = vector.broadcast %cst_28 : f32 to vector<8x128xf32>
    %146 = arith.subf %145, %139 : vector<8x128xf32>
    %147 = arith.mulf %146, %144 : vector<8x128xf32>
    %148 = arith.mulf %139, %96 : vector<8x128xf32>
    %149 = arith.addf %147, %148 : vector<8x128xf32>
    %150 = arith.select %98, %149, %96 : vector<8x128xi1>, vector<8x128xf32>
    %c2_i32 = arith.constant 2 : i32
    %151 = vector.broadcast %c2_i32 : i32 to vector<8x128xi32>
    %152 = arith.cmpi sgt, %40, %151 : vector<8x128xi32>
    %153 = arith.truncf %123 : vector<8x128xf32> to vector<8x128xbf16>
    %cst_29 = arith.constant dense<0.000000e+00> : vector<8x384xf32>
    %154 = tpu.matmul %153, %17, %cst_29 {dimension_numbers = #tpu.dot_dimension_numbers<[1], [0], [0], [1], [0, 0, 1, 1], [], []>} : vector<8x128xbf16>, vector<128x384xbf16>, vector<8x384xf32> -> vector<8x384xf32>
    %155 = arith.addf %154, %23 : vector<8x384xf32>
    %156 = vector.extract_strided_slice %16 {offsets = [16, 0], sizes = [8, 384], strides = [1, 1]} : vector<64x384xf32> to vector<8x384xf32>
    %157 = vector.extract_strided_slice %156 {offsets = [0, 0], sizes = [8, 256], strides = [1, 1]} : vector<8x384xf32> to vector<8x256xf32>
    %158 = vector.extract_strided_slice %155 {offsets = [0, 0], sizes = [8, 256], strides = [1, 1]} : vector<8x384xf32> to vector<8x256xf32>
    %159 = arith.addf %157, %158 : vector<8x256xf32>
    %160 = arith.negf %159 : vector<8x256xf32>
    %161 = math.exp %160 : vector<8x256xf32>
    %cst_30 = arith.constant 1.000000e+00 : f32
    %162 = vector.broadcast %cst_30 : f32 to vector<8x256xf32>
    %163 = arith.addf %162, %161 : vector<8x256xf32>
    %164 = arith.divf %162, %163 : vector<8x256xf32>
    %165 = vector.extract_strided_slice %164 {offsets = [0, 0], sizes = [8, 128], strides = [1, 1]} : vector<8x256xf32> to vector<8x128xf32>
    %166 = vector.extract_strided_slice %164 {offsets = [0, 128], sizes = [8, 128], strides = [1, 1]} : vector<8x256xf32> to vector<8x128xf32>
    %167 = vector.extract_strided_slice %156 {offsets = [0, 256], sizes = [8, 128], strides = [1, 1]} : vector<8x384xf32> to vector<8x128xf32>
    %168 = vector.extract_strided_slice %155 {offsets = [0, 256], sizes = [8, 128], strides = [1, 1]} : vector<8x384xf32> to vector<8x128xf32>
    %169 = arith.mulf %165, %168 : vector<8x128xf32>
    %170 = arith.addf %167, %169 : vector<8x128xf32>
    %171 = math.tanh %170 : vector<8x128xf32>
    %cst_31 = arith.constant 1.000000e+00 : f32
    %172 = vector.broadcast %cst_31 : f32 to vector<8x128xf32>
    %173 = arith.subf %172, %166 : vector<8x128xf32>
    %174 = arith.mulf %173, %171 : vector<8x128xf32>
    %175 = arith.mulf %166, %123 : vector<8x128xf32>
    %176 = arith.addf %174, %175 : vector<8x128xf32>
    %177 = arith.select %152, %176, %123 : vector<8x128xi1>, vector<8x128xf32>
    %178 = arith.truncf %177 : vector<8x128xf32> to vector<8x128xbf16>
    %cst_32 = arith.constant dense<0.000000e+00> : vector<8x384xf32>
    %179 = tpu.matmul %178, %18, %cst_32 {dimension_numbers = #tpu.dot_dimension_numbers<[1], [0], [0], [1], [0, 0, 1, 1], [], []>} : vector<8x128xbf16>, vector<128x384xbf16>, vector<8x384xf32> -> vector<8x384xf32>
    %180 = arith.addf %179, %26 : vector<8x384xf32>
    %181 = arith.truncf %150 : vector<8x128xf32> to vector<8x128xbf16>
    %cst_33 = arith.constant dense<0.000000e+00> : vector<8x384xf32>
    %182 = tpu.matmul %181, %19, %cst_33 {dimension_numbers = #tpu.dot_dimension_numbers<[1], [0], [0], [1], [0, 0, 1, 1], [], []>} : vector<8x128xbf16>, vector<128x384xbf16>, vector<8x384xf32> -> vector<8x384xf32>
    %183 = arith.addf %182, %29 : vector<8x384xf32>
    %184 = vector.extract_strided_slice %180 {offsets = [0, 0], sizes = [8, 256], strides = [1, 1]} : vector<8x384xf32> to vector<8x256xf32>
    %185 = vector.extract_strided_slice %183 {offsets = [0, 0], sizes = [8, 256], strides = [1, 1]} : vector<8x384xf32> to vector<8x256xf32>
    %186 = arith.addf %184, %185 : vector<8x256xf32>
    %187 = arith.negf %186 : vector<8x256xf32>
    %188 = math.exp %187 : vector<8x256xf32>
    %cst_34 = arith.constant 1.000000e+00 : f32
    %189 = vector.broadcast %cst_34 : f32 to vector<8x256xf32>
    %190 = arith.addf %189, %188 : vector<8x256xf32>
    %191 = arith.divf %189, %190 : vector<8x256xf32>
    %192 = vector.extract_strided_slice %191 {offsets = [0, 0], sizes = [8, 128], strides = [1, 1]} : vector<8x256xf32> to vector<8x128xf32>
    %193 = vector.extract_strided_slice %191 {offsets = [0, 128], sizes = [8, 128], strides = [1, 1]} : vector<8x256xf32> to vector<8x128xf32>
    %194 = vector.extract_strided_slice %180 {offsets = [0, 256], sizes = [8, 128], strides = [1, 1]} : vector<8x384xf32> to vector<8x128xf32>
    %195 = vector.extract_strided_slice %183 {offsets = [0, 256], sizes = [8, 128], strides = [1, 1]} : vector<8x384xf32> to vector<8x128xf32>
    %196 = arith.mulf %192, %195 : vector<8x128xf32>
    %197 = arith.addf %194, %196 : vector<8x128xf32>
    %198 = math.tanh %197 : vector<8x128xf32>
    %cst_35 = arith.constant 1.000000e+00 : f32
    %199 = vector.broadcast %cst_35 : f32 to vector<8x128xf32>
    %200 = arith.subf %199, %193 : vector<8x128xf32>
    %201 = arith.mulf %200, %198 : vector<8x128xf32>
    %202 = arith.mulf %193, %150 : vector<8x128xf32>
    %203 = arith.addf %201, %202 : vector<8x128xf32>
    %204 = arith.select %152, %203, %150 : vector<8x128xi1>, vector<8x128xf32>
    %c3_i32 = arith.constant 3 : i32
    %205 = vector.broadcast %c3_i32 : i32 to vector<8x128xi32>
    %206 = arith.cmpi sgt, %40, %205 : vector<8x128xi32>
    %207 = arith.truncf %177 : vector<8x128xf32> to vector<8x128xbf16>
    %cst_36 = arith.constant dense<0.000000e+00> : vector<8x384xf32>
    %208 = tpu.matmul %207, %17, %cst_36 {dimension_numbers = #tpu.dot_dimension_numbers<[1], [0], [0], [1], [0, 0, 1, 1], [], []>} : vector<8x128xbf16>, vector<128x384xbf16>, vector<8x384xf32> -> vector<8x384xf32>
    %209 = arith.addf %208, %23 : vector<8x384xf32>
    %210 = vector.extract_strided_slice %16 {offsets = [24, 0], sizes = [8, 384], strides = [1, 1]} : vector<64x384xf32> to vector<8x384xf32>
    %211 = vector.extract_strided_slice %210 {offsets = [0, 0], sizes = [8, 256], strides = [1, 1]} : vector<8x384xf32> to vector<8x256xf32>
    %212 = vector.extract_strided_slice %209 {offsets = [0, 0], sizes = [8, 256], strides = [1, 1]} : vector<8x384xf32> to vector<8x256xf32>
    %213 = arith.addf %211, %212 : vector<8x256xf32>
    %214 = arith.negf %213 : vector<8x256xf32>
    %215 = math.exp %214 : vector<8x256xf32>
    %cst_37 = arith.constant 1.000000e+00 : f32
    %216 = vector.broadcast %cst_37 : f32 to vector<8x256xf32>
    %217 = arith.addf %216, %215 : vector<8x256xf32>
    %218 = arith.divf %216, %217 : vector<8x256xf32>
    %219 = vector.extract_strided_slice %218 {offsets = [0, 0], sizes = [8, 128], strides = [1, 1]} : vector<8x256xf32> to vector<8x128xf32>
    %220 = vector.extract_strided_slice %218 {offsets = [0, 128], sizes = [8, 128], strides = [1, 1]} : vector<8x256xf32> to vector<8x128xf32>
    %221 = vector.extract_strided_slice %210 {offsets = [0, 256], sizes = [8, 128], strides = [1, 1]} : vector<8x384xf32> to vector<8x128xf32>
    %222 = vector.extract_strided_slice %209 {offsets = [0, 256], sizes = [8, 128], strides = [1, 1]} : vector<8x384xf32> to vector<8x128xf32>
    %223 = arith.mulf %219, %222 : vector<8x128xf32>
    %224 = arith.addf %221, %223 : vector<8x128xf32>
    %225 = math.tanh %224 : vector<8x128xf32>
    %cst_38 = arith.constant 1.000000e+00 : f32
    %226 = vector.broadcast %cst_38 : f32 to vector<8x128xf32>
    %227 = arith.subf %226, %220 : vector<8x128xf32>
    %228 = arith.mulf %227, %225 : vector<8x128xf32>
    %229 = arith.mulf %220, %177 : vector<8x128xf32>
    %230 = arith.addf %228, %229 : vector<8x128xf32>
    %231 = arith.select %206, %230, %177 : vector<8x128xi1>, vector<8x128xf32>
    %232 = arith.truncf %231 : vector<8x128xf32> to vector<8x128xbf16>
    %cst_39 = arith.constant dense<0.000000e+00> : vector<8x384xf32>
    %233 = tpu.matmul %232, %18, %cst_39 {dimension_numbers = #tpu.dot_dimension_numbers<[1], [0], [0], [1], [0, 0, 1, 1], [], []>} : vector<8x128xbf16>, vector<128x384xbf16>, vector<8x384xf32> -> vector<8x384xf32>
    %234 = arith.addf %233, %26 : vector<8x384xf32>
    %235 = arith.truncf %204 : vector<8x128xf32> to vector<8x128xbf16>
    %cst_40 = arith.constant dense<0.000000e+00> : vector<8x384xf32>
    %236 = tpu.matmul %235, %19, %cst_40 {dimension_numbers = #tpu.dot_dimension_numbers<[1], [0], [0], [1], [0, 0, 1, 1], [], []>} : vector<8x128xbf16>, vector<128x384xbf16>, vector<8x384xf32> -> vector<8x384xf32>
    %237 = arith.addf %236, %29 : vector<8x384xf32>
    %238 = vector.extract_strided_slice %234 {offsets = [0, 0], sizes = [8, 256], strides = [1, 1]} : vector<8x384xf32> to vector<8x256xf32>
    %239 = vector.extract_strided_slice %237 {offsets = [0, 0], sizes = [8, 256], strides = [1, 1]} : vector<8x384xf32> to vector<8x256xf32>
    %240 = arith.addf %238, %239 : vector<8x256xf32>
    %241 = arith.negf %240 : vector<8x256xf32>
    %242 = math.exp %241 : vector<8x256xf32>
    %cst_41 = arith.constant 1.000000e+00 : f32
    %243 = vector.broadcast %cst_41 : f32 to vector<8x256xf32>
    %244 = arith.addf %243, %242 : vector<8x256xf32>
    %245 = arith.divf %243, %244 : vector<8x256xf32>
    %246 = vector.extract_strided_slice %245 {offsets = [0, 0], sizes = [8, 128], strides = [1, 1]} : vector<8x256xf32> to vector<8x128xf32>
    %247 = vector.extract_strided_slice %245 {offsets = [0, 128], sizes = [8, 128], strides = [1, 1]} : vector<8x256xf32> to vector<8x128xf32>
    %248 = vector.extract_strided_slice %234 {offsets = [0, 256], sizes = [8, 128], strides = [1, 1]} : vector<8x384xf32> to vector<8x128xf32>
    %249 = vector.extract_strided_slice %237 {offsets = [0, 256], sizes = [8, 128], strides = [1, 1]} : vector<8x384xf32> to vector<8x128xf32>
    %250 = arith.mulf %246, %249 : vector<8x128xf32>
    %251 = arith.addf %248, %250 : vector<8x128xf32>
    %252 = math.tanh %251 : vector<8x128xf32>
    %cst_42 = arith.constant 1.000000e+00 : f32
    %253 = vector.broadcast %cst_42 : f32 to vector<8x128xf32>
    %254 = arith.subf %253, %247 : vector<8x128xf32>
    %255 = arith.mulf %254, %252 : vector<8x128xf32>
    %256 = arith.mulf %247, %204 : vector<8x128xf32>
    %257 = arith.addf %255, %256 : vector<8x128xf32>
    %258 = arith.select %206, %257, %204 : vector<8x128xi1>, vector<8x128xf32>
    %c4_i32 = arith.constant 4 : i32
    %259 = vector.broadcast %c4_i32 : i32 to vector<8x128xi32>
    %260 = arith.cmpi sgt, %40, %259 : vector<8x128xi32>
    %261 = arith.truncf %231 : vector<8x128xf32> to vector<8x128xbf16>
    %cst_43 = arith.constant dense<0.000000e+00> : vector<8x384xf32>
    %262 = tpu.matmul %261, %17, %cst_43 {dimension_numbers = #tpu.dot_dimension_numbers<[1], [0], [0], [1], [0, 0, 1, 1], [], []>} : vector<8x128xbf16>, vector<128x384xbf16>, vector<8x384xf32> -> vector<8x384xf32>
    %263 = arith.addf %262, %23 : vector<8x384xf32>
    %264 = vector.extract_strided_slice %16 {offsets = [32, 0], sizes = [8, 384], strides = [1, 1]} : vector<64x384xf32> to vector<8x384xf32>
    %265 = vector.extract_strided_slice %264 {offsets = [0, 0], sizes = [8, 256], strides = [1, 1]} : vector<8x384xf32> to vector<8x256xf32>
    %266 = vector.extract_strided_slice %263 {offsets = [0, 0], sizes = [8, 256], strides = [1, 1]} : vector<8x384xf32> to vector<8x256xf32>
    %267 = arith.addf %265, %266 : vector<8x256xf32>
    %268 = arith.negf %267 : vector<8x256xf32>
    %269 = math.exp %268 : vector<8x256xf32>
    %cst_44 = arith.constant 1.000000e+00 : f32
    %270 = vector.broadcast %cst_44 : f32 to vector<8x256xf32>
    %271 = arith.addf %270, %269 : vector<8x256xf32>
    %272 = arith.divf %270, %271 : vector<8x256xf32>
    %273 = vector.extract_strided_slice %272 {offsets = [0, 0], sizes = [8, 128], strides = [1, 1]} : vector<8x256xf32> to vector<8x128xf32>
    %274 = vector.extract_strided_slice %272 {offsets = [0, 128], sizes = [8, 128], strides = [1, 1]} : vector<8x256xf32> to vector<8x128xf32>
    %275 = vector.extract_strided_slice %264 {offsets = [0, 256], sizes = [8, 128], strides = [1, 1]} : vector<8x384xf32> to vector<8x128xf32>
    %276 = vector.extract_strided_slice %263 {offsets = [0, 256], sizes = [8, 128], strides = [1, 1]} : vector<8x384xf32> to vector<8x128xf32>
    %277 = arith.mulf %273, %276 : vector<8x128xf32>
    %278 = arith.addf %275, %277 : vector<8x128xf32>
    %279 = math.tanh %278 : vector<8x128xf32>
    %cst_45 = arith.constant 1.000000e+00 : f32
    %280 = vector.broadcast %cst_45 : f32 to vector<8x128xf32>
    %281 = arith.subf %280, %274 : vector<8x128xf32>
    %282 = arith.mulf %281, %279 : vector<8x128xf32>
    %283 = arith.mulf %274, %231 : vector<8x128xf32>
    %284 = arith.addf %282, %283 : vector<8x128xf32>
    %285 = arith.select %260, %284, %231 : vector<8x128xi1>, vector<8x128xf32>
    %286 = arith.truncf %285 : vector<8x128xf32> to vector<8x128xbf16>
    %cst_46 = arith.constant dense<0.000000e+00> : vector<8x384xf32>
    %287 = tpu.matmul %286, %18, %cst_46 {dimension_numbers = #tpu.dot_dimension_numbers<[1], [0], [0], [1], [0, 0, 1, 1], [], []>} : vector<8x128xbf16>, vector<128x384xbf16>, vector<8x384xf32> -> vector<8x384xf32>
    %288 = arith.addf %287, %26 : vector<8x384xf32>
    %289 = arith.truncf %258 : vector<8x128xf32> to vector<8x128xbf16>
    %cst_47 = arith.constant dense<0.000000e+00> : vector<8x384xf32>
    %290 = tpu.matmul %289, %19, %cst_47 {dimension_numbers = #tpu.dot_dimension_numbers<[1], [0], [0], [1], [0, 0, 1, 1], [], []>} : vector<8x128xbf16>, vector<128x384xbf16>, vector<8x384xf32> -> vector<8x384xf32>
    %291 = arith.addf %290, %29 : vector<8x384xf32>
    %292 = vector.extract_strided_slice %288 {offsets = [0, 0], sizes = [8, 256], strides = [1, 1]} : vector<8x384xf32> to vector<8x256xf32>
    %293 = vector.extract_strided_slice %291 {offsets = [0, 0], sizes = [8, 256], strides = [1, 1]} : vector<8x384xf32> to vector<8x256xf32>
    %294 = arith.addf %292, %293 : vector<8x256xf32>
    %295 = arith.negf %294 : vector<8x256xf32>
    %296 = math.exp %295 : vector<8x256xf32>
    %cst_48 = arith.constant 1.000000e+00 : f32
    %297 = vector.broadcast %cst_48 : f32 to vector<8x256xf32>
    %298 = arith.addf %297, %296 : vector<8x256xf32>
    %299 = arith.divf %297, %298 : vector<8x256xf32>
    %300 = vector.extract_strided_slice %299 {offsets = [0, 0], sizes = [8, 128], strides = [1, 1]} : vector<8x256xf32> to vector<8x128xf32>
    %301 = vector.extract_strided_slice %299 {offsets = [0, 128], sizes = [8, 128], strides = [1, 1]} : vector<8x256xf32> to vector<8x128xf32>
    %302 = vector.extract_strided_slice %288 {offsets = [0, 256], sizes = [8, 128], strides = [1, 1]} : vector<8x384xf32> to vector<8x128xf32>
    %303 = vector.extract_strided_slice %291 {offsets = [0, 256], sizes = [8, 128], strides = [1, 1]} : vector<8x384xf32> to vector<8x128xf32>
    %304 = arith.mulf %300, %303 : vector<8x128xf32>
    %305 = arith.addf %302, %304 : vector<8x128xf32>
    %306 = math.tanh %305 : vector<8x128xf32>
    %cst_49 = arith.constant 1.000000e+00 : f32
    %307 = vector.broadcast %cst_49 : f32 to vector<8x128xf32>
    %308 = arith.subf %307, %301 : vector<8x128xf32>
    %309 = arith.mulf %308, %306 : vector<8x128xf32>
    %310 = arith.mulf %301, %258 : vector<8x128xf32>
    %311 = arith.addf %309, %310 : vector<8x128xf32>
    %312 = arith.select %260, %311, %258 : vector<8x128xi1>, vector<8x128xf32>
    %c5_i32 = arith.constant 5 : i32
    %313 = vector.broadcast %c5_i32 : i32 to vector<8x128xi32>
    %314 = arith.cmpi sgt, %40, %313 : vector<8x128xi32>
    %315 = arith.truncf %285 : vector<8x128xf32> to vector<8x128xbf16>
    %cst_50 = arith.constant dense<0.000000e+00> : vector<8x384xf32>
    %316 = tpu.matmul %315, %17, %cst_50 {dimension_numbers = #tpu.dot_dimension_numbers<[1], [0], [0], [1], [0, 0, 1, 1], [], []>} : vector<8x128xbf16>, vector<128x384xbf16>, vector<8x384xf32> -> vector<8x384xf32>
    %317 = arith.addf %316, %23 : vector<8x384xf32>
    %318 = vector.extract_strided_slice %16 {offsets = [40, 0], sizes = [8, 384], strides = [1, 1]} : vector<64x384xf32> to vector<8x384xf32>
    %319 = vector.extract_strided_slice %318 {offsets = [0, 0], sizes = [8, 256], strides = [1, 1]} : vector<8x384xf32> to vector<8x256xf32>
    %320 = vector.extract_strided_slice %317 {offsets = [0, 0], sizes = [8, 256], strides = [1, 1]} : vector<8x384xf32> to vector<8x256xf32>
    %321 = arith.addf %319, %320 : vector<8x256xf32>
    %322 = arith.negf %321 : vector<8x256xf32>
    %323 = math.exp %322 : vector<8x256xf32>
    %cst_51 = arith.constant 1.000000e+00 : f32
    %324 = vector.broadcast %cst_51 : f32 to vector<8x256xf32>
    %325 = arith.addf %324, %323 : vector<8x256xf32>
    %326 = arith.divf %324, %325 : vector<8x256xf32>
    %327 = vector.extract_strided_slice %326 {offsets = [0, 0], sizes = [8, 128], strides = [1, 1]} : vector<8x256xf32> to vector<8x128xf32>
    %328 = vector.extract_strided_slice %326 {offsets = [0, 128], sizes = [8, 128], strides = [1, 1]} : vector<8x256xf32> to vector<8x128xf32>
    %329 = vector.extract_strided_slice %318 {offsets = [0, 256], sizes = [8, 128], strides = [1, 1]} : vector<8x384xf32> to vector<8x128xf32>
    %330 = vector.extract_strided_slice %317 {offsets = [0, 256], sizes = [8, 128], strides = [1, 1]} : vector<8x384xf32> to vector<8x128xf32>
    %331 = arith.mulf %327, %330 : vector<8x128xf32>
    %332 = arith.addf %329, %331 : vector<8x128xf32>
    %333 = math.tanh %332 : vector<8x128xf32>
    %cst_52 = arith.constant 1.000000e+00 : f32
    %334 = vector.broadcast %cst_52 : f32 to vector<8x128xf32>
    %335 = arith.subf %334, %328 : vector<8x128xf32>
    %336 = arith.mulf %335, %333 : vector<8x128xf32>
    %337 = arith.mulf %328, %285 : vector<8x128xf32>
    %338 = arith.addf %336, %337 : vector<8x128xf32>
    %339 = arith.select %314, %338, %285 : vector<8x128xi1>, vector<8x128xf32>
    %340 = arith.truncf %339 : vector<8x128xf32> to vector<8x128xbf16>
    %cst_53 = arith.constant dense<0.000000e+00> : vector<8x384xf32>
    %341 = tpu.matmul %340, %18, %cst_53 {dimension_numbers = #tpu.dot_dimension_numbers<[1], [0], [0], [1], [0, 0, 1, 1], [], []>} : vector<8x128xbf16>, vector<128x384xbf16>, vector<8x384xf32> -> vector<8x384xf32>
    %342 = arith.addf %341, %26 : vector<8x384xf32>
    %343 = arith.truncf %312 : vector<8x128xf32> to vector<8x128xbf16>
    %cst_54 = arith.constant dense<0.000000e+00> : vector<8x384xf32>
    %344 = tpu.matmul %343, %19, %cst_54 {dimension_numbers = #tpu.dot_dimension_numbers<[1], [0], [0], [1], [0, 0, 1, 1], [], []>} : vector<8x128xbf16>, vector<128x384xbf16>, vector<8x384xf32> -> vector<8x384xf32>
    %345 = arith.addf %344, %29 : vector<8x384xf32>
    %346 = vector.extract_strided_slice %342 {offsets = [0, 0], sizes = [8, 256], strides = [1, 1]} : vector<8x384xf32> to vector<8x256xf32>
    %347 = vector.extract_strided_slice %345 {offsets = [0, 0], sizes = [8, 256], strides = [1, 1]} : vector<8x384xf32> to vector<8x256xf32>
    %348 = arith.addf %346, %347 : vector<8x256xf32>
    %349 = arith.negf %348 : vector<8x256xf32>
    %350 = math.exp %349 : vector<8x256xf32>
    %cst_55 = arith.constant 1.000000e+00 : f32
    %351 = vector.broadcast %cst_55 : f32 to vector<8x256xf32>
    %352 = arith.addf %351, %350 : vector<8x256xf32>
    %353 = arith.divf %351, %352 : vector<8x256xf32>
    %354 = vector.extract_strided_slice %353 {offsets = [0, 0], sizes = [8, 128], strides = [1, 1]} : vector<8x256xf32> to vector<8x128xf32>
    %355 = vector.extract_strided_slice %353 {offsets = [0, 128], sizes = [8, 128], strides = [1, 1]} : vector<8x256xf32> to vector<8x128xf32>
    %356 = vector.extract_strided_slice %342 {offsets = [0, 256], sizes = [8, 128], strides = [1, 1]} : vector<8x384xf32> to vector<8x128xf32>
    %357 = vector.extract_strided_slice %345 {offsets = [0, 256], sizes = [8, 128], strides = [1, 1]} : vector<8x384xf32> to vector<8x128xf32>
    %358 = arith.mulf %354, %357 : vector<8x128xf32>
    %359 = arith.addf %356, %358 : vector<8x128xf32>
    %360 = math.tanh %359 : vector<8x128xf32>
    %cst_56 = arith.constant 1.000000e+00 : f32
    %361 = vector.broadcast %cst_56 : f32 to vector<8x128xf32>
    %362 = arith.subf %361, %355 : vector<8x128xf32>
    %363 = arith.mulf %362, %360 : vector<8x128xf32>
    %364 = arith.mulf %355, %312 : vector<8x128xf32>
    %365 = arith.addf %363, %364 : vector<8x128xf32>
    %366 = arith.select %314, %365, %312 : vector<8x128xi1>, vector<8x128xf32>
    %c6_i32 = arith.constant 6 : i32
    %367 = vector.broadcast %c6_i32 : i32 to vector<8x128xi32>
    %368 = arith.cmpi sgt, %40, %367 : vector<8x128xi32>
    %369 = arith.truncf %339 : vector<8x128xf32> to vector<8x128xbf16>
    %cst_57 = arith.constant dense<0.000000e+00> : vector<8x384xf32>
    %370 = tpu.matmul %369, %17, %cst_57 {dimension_numbers = #tpu.dot_dimension_numbers<[1], [0], [0], [1], [0, 0, 1, 1], [], []>} : vector<8x128xbf16>, vector<128x384xbf16>, vector<8x384xf32> -> vector<8x384xf32>
    %371 = arith.addf %370, %23 : vector<8x384xf32>
    %372 = vector.extract_strided_slice %16 {offsets = [48, 0], sizes = [8, 384], strides = [1, 1]} : vector<64x384xf32> to vector<8x384xf32>
    %373 = vector.extract_strided_slice %372 {offsets = [0, 0], sizes = [8, 256], strides = [1, 1]} : vector<8x384xf32> to vector<8x256xf32>
    %374 = vector.extract_strided_slice %371 {offsets = [0, 0], sizes = [8, 256], strides = [1, 1]} : vector<8x384xf32> to vector<8x256xf32>
    %375 = arith.addf %373, %374 : vector<8x256xf32>
    %376 = arith.negf %375 : vector<8x256xf32>
    %377 = math.exp %376 : vector<8x256xf32>
    %cst_58 = arith.constant 1.000000e+00 : f32
    %378 = vector.broadcast %cst_58 : f32 to vector<8x256xf32>
    %379 = arith.addf %378, %377 : vector<8x256xf32>
    %380 = arith.divf %378, %379 : vector<8x256xf32>
    %381 = vector.extract_strided_slice %380 {offsets = [0, 0], sizes = [8, 128], strides = [1, 1]} : vector<8x256xf32> to vector<8x128xf32>
    %382 = vector.extract_strided_slice %380 {offsets = [0, 128], sizes = [8, 128], strides = [1, 1]} : vector<8x256xf32> to vector<8x128xf32>
    %383 = vector.extract_strided_slice %372 {offsets = [0, 256], sizes = [8, 128], strides = [1, 1]} : vector<8x384xf32> to vector<8x128xf32>
    %384 = vector.extract_strided_slice %371 {offsets = [0, 256], sizes = [8, 128], strides = [1, 1]} : vector<8x384xf32> to vector<8x128xf32>
    %385 = arith.mulf %381, %384 : vector<8x128xf32>
    %386 = arith.addf %383, %385 : vector<8x128xf32>
    %387 = math.tanh %386 : vector<8x128xf32>
    %cst_59 = arith.constant 1.000000e+00 : f32
    %388 = vector.broadcast %cst_59 : f32 to vector<8x128xf32>
    %389 = arith.subf %388, %382 : vector<8x128xf32>
    %390 = arith.mulf %389, %387 : vector<8x128xf32>
    %391 = arith.mulf %382, %339 : vector<8x128xf32>
    %392 = arith.addf %390, %391 : vector<8x128xf32>
    %393 = arith.select %368, %392, %339 : vector<8x128xi1>, vector<8x128xf32>
    %394 = arith.truncf %393 : vector<8x128xf32> to vector<8x128xbf16>
    %cst_60 = arith.constant dense<0.000000e+00> : vector<8x384xf32>
    %395 = tpu.matmul %394, %18, %cst_60 {dimension_numbers = #tpu.dot_dimension_numbers<[1], [0], [0], [1], [0, 0, 1, 1], [], []>} : vector<8x128xbf16>, vector<128x384xbf16>, vector<8x384xf32> -> vector<8x384xf32>
    %396 = arith.addf %395, %26 : vector<8x384xf32>
    %397 = arith.truncf %366 : vector<8x128xf32> to vector<8x128xbf16>
    %cst_61 = arith.constant dense<0.000000e+00> : vector<8x384xf32>
    %398 = tpu.matmul %397, %19, %cst_61 {dimension_numbers = #tpu.dot_dimension_numbers<[1], [0], [0], [1], [0, 0, 1, 1], [], []>} : vector<8x128xbf16>, vector<128x384xbf16>, vector<8x384xf32> -> vector<8x384xf32>
    %399 = arith.addf %398, %29 : vector<8x384xf32>
    %400 = vector.extract_strided_slice %396 {offsets = [0, 0], sizes = [8, 256], strides = [1, 1]} : vector<8x384xf32> to vector<8x256xf32>
    %401 = vector.extract_strided_slice %399 {offsets = [0, 0], sizes = [8, 256], strides = [1, 1]} : vector<8x384xf32> to vector<8x256xf32>
    %402 = arith.addf %400, %401 : vector<8x256xf32>
    %403 = arith.negf %402 : vector<8x256xf32>
    %404 = math.exp %403 : vector<8x256xf32>
    %cst_62 = arith.constant 1.000000e+00 : f32
    %405 = vector.broadcast %cst_62 : f32 to vector<8x256xf32>
    %406 = arith.addf %405, %404 : vector<8x256xf32>
    %407 = arith.divf %405, %406 : vector<8x256xf32>
    %408 = vector.extract_strided_slice %407 {offsets = [0, 0], sizes = [8, 128], strides = [1, 1]} : vector<8x256xf32> to vector<8x128xf32>
    %409 = vector.extract_strided_slice %407 {offsets = [0, 128], sizes = [8, 128], strides = [1, 1]} : vector<8x256xf32> to vector<8x128xf32>
    %410 = vector.extract_strided_slice %396 {offsets = [0, 256], sizes = [8, 128], strides = [1, 1]} : vector<8x384xf32> to vector<8x128xf32>
    %411 = vector.extract_strided_slice %399 {offsets = [0, 256], sizes = [8, 128], strides = [1, 1]} : vector<8x384xf32> to vector<8x128xf32>
    %412 = arith.mulf %408, %411 : vector<8x128xf32>
    %413 = arith.addf %410, %412 : vector<8x128xf32>
    %414 = math.tanh %413 : vector<8x128xf32>
    %cst_63 = arith.constant 1.000000e+00 : f32
    %415 = vector.broadcast %cst_63 : f32 to vector<8x128xf32>
    %416 = arith.subf %415, %409 : vector<8x128xf32>
    %417 = arith.mulf %416, %414 : vector<8x128xf32>
    %418 = arith.mulf %409, %366 : vector<8x128xf32>
    %419 = arith.addf %417, %418 : vector<8x128xf32>
    %420 = arith.select %368, %419, %366 : vector<8x128xi1>, vector<8x128xf32>
    %c7_i32 = arith.constant 7 : i32
    %421 = vector.broadcast %c7_i32 : i32 to vector<8x128xi32>
    %422 = arith.cmpi sgt, %40, %421 : vector<8x128xi32>
    %423 = arith.truncf %393 : vector<8x128xf32> to vector<8x128xbf16>
    %cst_64 = arith.constant dense<0.000000e+00> : vector<8x384xf32>
    %424 = tpu.matmul %423, %17, %cst_64 {dimension_numbers = #tpu.dot_dimension_numbers<[1], [0], [0], [1], [0, 0, 1, 1], [], []>} : vector<8x128xbf16>, vector<128x384xbf16>, vector<8x384xf32> -> vector<8x384xf32>
    %425 = arith.addf %424, %23 : vector<8x384xf32>
    %426 = vector.extract_strided_slice %16 {offsets = [56, 0], sizes = [8, 384], strides = [1, 1]} : vector<64x384xf32> to vector<8x384xf32>
    %427 = vector.extract_strided_slice %426 {offsets = [0, 0], sizes = [8, 256], strides = [1, 1]} : vector<8x384xf32> to vector<8x256xf32>
    %428 = vector.extract_strided_slice %425 {offsets = [0, 0], sizes = [8, 256], strides = [1, 1]} : vector<8x384xf32> to vector<8x256xf32>
    %429 = arith.addf %427, %428 : vector<8x256xf32>
    %430 = arith.negf %429 : vector<8x256xf32>
    %431 = math.exp %430 : vector<8x256xf32>
    %cst_65 = arith.constant 1.000000e+00 : f32
    %432 = vector.broadcast %cst_65 : f32 to vector<8x256xf32>
    %433 = arith.addf %432, %431 : vector<8x256xf32>
    %434 = arith.divf %432, %433 : vector<8x256xf32>
    %435 = vector.extract_strided_slice %434 {offsets = [0, 0], sizes = [8, 128], strides = [1, 1]} : vector<8x256xf32> to vector<8x128xf32>
    %436 = vector.extract_strided_slice %434 {offsets = [0, 128], sizes = [8, 128], strides = [1, 1]} : vector<8x256xf32> to vector<8x128xf32>
    %437 = vector.extract_strided_slice %426 {offsets = [0, 256], sizes = [8, 128], strides = [1, 1]} : vector<8x384xf32> to vector<8x128xf32>
    %438 = vector.extract_strided_slice %425 {offsets = [0, 256], sizes = [8, 128], strides = [1, 1]} : vector<8x384xf32> to vector<8x128xf32>
    %439 = arith.mulf %435, %438 : vector<8x128xf32>
    %440 = arith.addf %437, %439 : vector<8x128xf32>
    %441 = math.tanh %440 : vector<8x128xf32>
    %cst_66 = arith.constant 1.000000e+00 : f32
    %442 = vector.broadcast %cst_66 : f32 to vector<8x128xf32>
    %443 = arith.subf %442, %436 : vector<8x128xf32>
    %444 = arith.mulf %443, %441 : vector<8x128xf32>
    %445 = arith.mulf %436, %393 : vector<8x128xf32>
    %446 = arith.addf %444, %445 : vector<8x128xf32>
    %447 = arith.select %422, %446, %393 : vector<8x128xi1>, vector<8x128xf32>
    %448 = arith.truncf %447 : vector<8x128xf32> to vector<8x128xbf16>
    %cst_67 = arith.constant dense<0.000000e+00> : vector<8x384xf32>
    %449 = tpu.matmul %448, %18, %cst_67 {dimension_numbers = #tpu.dot_dimension_numbers<[1], [0], [0], [1], [0, 0, 1, 1], [], []>} : vector<8x128xbf16>, vector<128x384xbf16>, vector<8x384xf32> -> vector<8x384xf32>
    %450 = arith.addf %449, %26 : vector<8x384xf32>
    %451 = arith.truncf %420 : vector<8x128xf32> to vector<8x128xbf16>
    %cst_68 = arith.constant dense<0.000000e+00> : vector<8x384xf32>
    %452 = tpu.matmul %451, %19, %cst_68 {dimension_numbers = #tpu.dot_dimension_numbers<[1], [0], [0], [1], [0, 0, 1, 1], [], []>} : vector<8x128xbf16>, vector<128x384xbf16>, vector<8x384xf32> -> vector<8x384xf32>
    %453 = arith.addf %452, %29 : vector<8x384xf32>
    %454 = vector.extract_strided_slice %450 {offsets = [0, 0], sizes = [8, 256], strides = [1, 1]} : vector<8x384xf32> to vector<8x256xf32>
    %455 = vector.extract_strided_slice %453 {offsets = [0, 0], sizes = [8, 256], strides = [1, 1]} : vector<8x384xf32> to vector<8x256xf32>
    %456 = arith.addf %454, %455 : vector<8x256xf32>
    %457 = arith.negf %456 : vector<8x256xf32>
    %458 = math.exp %457 : vector<8x256xf32>
    %cst_69 = arith.constant 1.000000e+00 : f32
    %459 = vector.broadcast %cst_69 : f32 to vector<8x256xf32>
    %460 = arith.addf %459, %458 : vector<8x256xf32>
    %461 = arith.divf %459, %460 : vector<8x256xf32>
    %462 = vector.extract_strided_slice %461 {offsets = [0, 0], sizes = [8, 128], strides = [1, 1]} : vector<8x256xf32> to vector<8x128xf32>
    %463 = vector.extract_strided_slice %461 {offsets = [0, 128], sizes = [8, 128], strides = [1, 1]} : vector<8x256xf32> to vector<8x128xf32>
    %464 = vector.extract_strided_slice %450 {offsets = [0, 256], sizes = [8, 128], strides = [1, 1]} : vector<8x384xf32> to vector<8x128xf32>
    %465 = vector.extract_strided_slice %453 {offsets = [0, 256], sizes = [8, 128], strides = [1, 1]} : vector<8x384xf32> to vector<8x128xf32>
    %466 = arith.mulf %462, %465 : vector<8x128xf32>
    %467 = arith.addf %464, %466 : vector<8x128xf32>
    %468 = math.tanh %467 : vector<8x128xf32>
    %cst_70 = arith.constant 1.000000e+00 : f32
    %469 = vector.broadcast %cst_70 : f32 to vector<8x128xf32>
    %470 = arith.subf %469, %463 : vector<8x128xf32>
    %471 = arith.mulf %470, %468 : vector<8x128xf32>
    %472 = arith.mulf %463, %420 : vector<8x128xf32>
    %473 = arith.addf %471, %472 : vector<8x128xf32>
    %474 = arith.select %422, %473, %420 : vector<8x128xi1>, vector<8x128xf32>
    %475 = arith.truncf %474 : vector<8x128xf32> to vector<8x128xbf16>
    %cst_71 = arith.constant dense<0.000000e+00> : vector<8x128xf32>
    %476 = tpu.matmul %475, %20, %cst_71 {dimension_numbers = #tpu.dot_dimension_numbers<[1], [0], [0], [1], [0, 0, 1, 1], [], []>} : vector<8x128xbf16>, vector<128x128xbf16>, vector<8x128xf32> -> vector<8x128xf32>
    %c3 = arith.constant 3 : index
    %c0_72 = arith.constant 0 : index
    %477 = vector.load %arg3[%c3, %c0_72] : memref<5x384xf32, #tpu.memory_space<vmem>>, vector<1x128xf32>
    %478 = vector.broadcast %477 : vector<1x128xf32> to vector<8x128xf32>
    %479 = arith.addf %476, %478 : vector<8x128xf32>
    %cst_73 = arith.constant 0.000000e+00 : f32
    %480 = vector.broadcast %cst_73 : f32 to vector<8x128xf32>
    %481 = arith.cmpf ogt, %479, %480 : vector<8x128xf32>
    %cst_74 = arith.constant 0.00999999977 : f32
    %482 = vector.broadcast %cst_74 : f32 to vector<8x128xf32>
    %483 = arith.mulf %482, %479 : vector<8x128xf32>
    %484 = arith.select %481, %479, %483 : vector<8x128xi1>, vector<8x128xf32>
    %c4 = arith.constant 4 : index
    %c0_75 = arith.constant 0 : index
    %485 = vector.load %arg3[%c4, %c0_75] : memref<5x384xf32, #tpu.memory_space<vmem>>, vector<1x128xf32>
    %c3_76 = arith.constant 3 : index
    %c128_77 = arith.constant 128 : index
    %486 = vector.load %arg3[%c3_76, %c128_77] : memref<5x384xf32, #tpu.memory_space<vmem>>, vector<1x1xf32>
    %487 = vector.broadcast %485 : vector<1x128xf32> to vector<8x128xf32>
    %488 = arith.mulf %484, %487 : vector<8x128xf32>
    %cst_78 = arith.constant dense<0.000000e+00> : vector<8xf32>
    %489 = vector.multi_reduction <add>, %488, %cst_78 [1] : vector<8x128xf32> to vector<8xf32>
    %490 = vector.shape_cast %489 : vector<8xf32> to vector<8x1xf32>
    %491 = vector.broadcast %486 : vector<1x1xf32> to vector<8x1xf32>
    %492 = arith.addf %490, %491 : vector<8x1xf32>
    %c0_79 = arith.constant 0 : index
    %c0_80 = arith.constant 0 : index
    %493 = vector.load %arg4[%c0_79, %c0_80] : memref<8x1xf32, #tpu.memory_space<vmem>>, vector<8x1xf32>
    tpu.vector_store %arg4[%c0_79, %c0_80], %492 {strides = array<i32>} : memref<8x1xf32, #tpu.memory_space<vmem>>, vector<8x1xf32>,
    return
  }
}

</mosaic_0001>

<bundles_post_ra>
// kernel: net_forward.1
= control target key start
LH: loop header
LB: loop body
LE: loop exit
PB: predicated region body
PF: predicated region fallthrough
CT: control target
= control target key end

     0   :  { %9 = vsyncpa [#allocation3], 0  ;;  %s4913_s15 = smov [#allocation2]   ;;  %s6699_s0 = inlined_call_operand.vmem [shape: s32[64,2], index: 0, kind: input, shape index: {}]   ;;  %s6700_s1 = inlined_call_operand.vmem [shape: s32[8,2], index: 1, kind: input, shape index: {}]   ;;  %s6701_s2 = inlined_call_operand.hbm [shape: bf16[640,384], index: 2, kind: input, shape index: {}]   ;;  %s6702_s3 = inlined_call_operand.vmem [shape: f32[5,384], index: 3, kind: input, shape index: {}]   ;;  %s6703_s4 = inlined_call_operand.vmem [shape: f32[8,1], index: 4, kind: output, shape index: {}]  }
   0x1   :  { %s19_s16 = sshll.u32 %s4913_s15, 4  ;;  %s4889_s19 = scalar_lea.hbm %s6701_s2, 15360  ;;  %s20_s16 = int_to_ptr.vmem [resolvable:$true] %s19_s16 }
   0x2   :  { %p4890_p0 = scmp.ne.s32.totalorder %s6701_s2, %s4889_s19  ;;  %p4893_p1 = scmp.lt.u32.totalorder %s4889_s19, %s6701_s2 }
   0x4   :  { %p4895_p2 = pnand %p4893_p1, %p4890_p0 }
   0x6   :  { %4898 = shalt.err (!%p4895_p2)
}
   0x7   :  { %s4899_s24 = scalar_lea.vmem %s20_s16, 15360  ;;  %p4904_p4 = scmp.lt.s32.totalorder %s20_s16, %s20_s16 }
   0x8   :  { %p4900_p3 = scmp.ne.s32.totalorder %s20_s16, %s4899_s24  ;;  %p4905_p5 = scmp.lt.s32.totalorder %s4899_s24, %s4899_s24 }
   0xa   :  { %p4906_p6 = por %p4905_p5, %p4904_p4 }
   0xc   :  { %p4907_p7 = pnand %p4906_p6, %p4900_p3 }
   0xe   :  { %4910 = shalt.err (!%p4907_p7)
}
   0xf   :  { %s4914_s25 = smov 192   ;;  %s4915_s26 = smov 12  }
  0x10   :  { %25 = dma.hbm_to_vmem [thread:$0]  %s6701_s2, 15360, %s20_s16, [#allocation3], %s4914_s25, %s4914_s25, %s4915_s26  }
  0x11   :  { %4911 = dma.done.wait [#allocation3], 15360  }
  0x12   :  { %4912 = vsyncadd [#allocation3], 4294951936  ;;  %v4916_v0 = vmov 1   ;;  %v6704_v1 = vmov 0   ;;  %v32_v2 = vld [vmem:[%s6699_s0] sm:$0xff]  ;;  %v33_v3 = vld [vmem:[%s6699_s0 + $0x8] sm:$0xff]  ;;  %v6708_v37 = vlaneseq }
  0x13   :  { %4438 = vset.pattern.permute.xlu1 %v4916_v0  ;;  %4437 = vset.pattern.permute.xlu0 %v6704_v1  ;;  %v4449_v4 = vld [vmem:[#allocation2 + $0x4] ss:$12 sps:$4 sm:$0xff]   ;;  %v4451_v5 = vld [vmem:[#allocation2] ss:$12 sps:$4 sm:$0xff]   ;;  %v35_v6 = vld [vmem:[%s6699_s0 + $0x18] sm:$0xff]  ;;  %v6706_v36 = vmov 0.0  }
  0x14   :  { %335 = vmatprep.mubr.bf16.mxu0 %v6704_v1  ;;  %75 = vperm.xlu1 %4438, %v32_v2   ;;  %v4452_v7 = vld [vmem:[#allocation2 + $0x1c] ss:$12 sps:$4 sm:$0xff]   ;;  %v34_v8 = vld [vmem:[%s6699_s0 + $0x10] sm:$0xff]  ;;  %v4454_v9 = vld [vmem:[#allocation2 + $0x18] ss:$12 sps:$4 sm:$0xff]   ;;  %v5003_v38 = vand.u32 127, %v6708_v37 }
  0x15   :  { %43 = vperm.xlu0 %4437, %v32_v2   ;;  %303 = vmatprep.subr.bf16.mxu0 %v4449_v4  ;;  %v4458_v10 = vld [vmem:[#allocation2 + $0x8] ss:$12 sps:$4 sm:$0xff]   ;;  %v4462_v12 = vld [vmem:[#allocation2 + $0x20] ss:$12 sps:$4 sm:$0xff]   ;;  %v4457_v13 = vld [vmem:[#allocation2 + $0x30] ss:$12 sps:$4 sm:$0xff]  }
  0x16   :  { %304 = vmatpush1.bf16.msra.mxu0 %v4451_v5  ;;  %v4455_v11 = vld [vmem:[#allocation2 + $0x34] ss:$12 sps:$4 sm:$0xff]   ;;  %3841 = vmatprep.subr.bf16.mxu1 %v4458_v10  ;;  %v4459_v14 = vld [vmem:[#allocation2 + $0x4c] ss:$12 sps:$4 sm:$0xff]   ;;  %v4463_v19 = vld [vmem:[#allocation2 + $0x64] ss:$12 sps:$4 sm:$0xff]  }
  0x17   :  { %305 = vmatprep.subr.bf16.mxu0 %v4452_v7  ;;  %3842 = vmatpush3.bf16.msra.mxu1 %v4458_v10  ;;  %v4466_v15 = vld [vmem:[#allocation2 + $0x38] ss:$12 sps:$4 sm:$0xff]   ;;  %v37_v16 = vld [vmem:[%s6699_s0 + $0x28] sm:$0xff]  ;;  %v4470_v20 = vld [vmem:[#allocation2 + $0x50] ss:$12 sps:$4 sm:$0xff]   ;;  %vm114_vm2 = vcmp.eq.s32.totalorder %v5003_v38, 63 }
  0x18   :  { %78 = vperm.xlu1 %4438, %v33_v3   ;;  %3843 = vmatprep.subr.bf16.mxu1 %v4462_v12  ;;  %v36_v17 = vld [vmem:[%s6699_s0 + $0x20] sm:$0xff]  ;;  %v4461_v18 = vld [vmem:[#allocation2 + $0x48] ss:$12 sps:$4 sm:$0xff]   ;;  %v4473_v27 = vld [vmem:[#allocation2 + $0x90] ss:$12 sps:$4 sm:$0xff]  }
  0x19   :  { %46 = vperm.xlu0 %4437, %v33_v3   ;;  %v38_v21 = vld [vmem:[%s6699_s0 + $0x30] sm:$0xff]  ;;  %v4465_v22 = vld [vmem:[#allocation2 + $0x60] ss:$12 sps:$4 sm:$0xff]   ;;  %v4467_v23 = vld [vmem:[#allocation2 + $0x7c] ss:$12 sps:$4 sm:$0xff]  }
  0x1a   :  { %306 = vmatpush1.bf16.msra.mxu0 %v4454_v9  ;;  %v4469_v24 = vld [vmem:[#allocation2 + $0x78] ss:$12 sps:$4 sm:$0xff]   ;;  %v4474_v25 = vld [vmem:[#allocation2 + $0x68] ss:$12 sps:$4 sm:$0xff]   ;;  %v4478_v30 = vld [vmem:[#allocation2 + $0x80] ss:$12 sps:$4 sm:$0xff]  }
  0x1b   :  { %307 = vmatprep.subr.bf16.mxu0 %v4455_v11  ;;  %3844 = vmatpush3.bf16.msra.mxu1 %v4462_v12  ;;  %v4471_v26 = vld [vmem:[#allocation2 + $0x94] ss:$12 sps:$4 sm:$0xff]   ;;  %v4475_v29 = vld [vmem:[#allocation2 + $0xac] ss:$12 sps:$4 sm:$0xff]   ;;  %v4995_v34 = vld [vmem:[#allocation2 + $0xc4] ss:$12 sps:$4 sm:$0xff]  }
  0x1c   :  { %4439 = vset.pattern.permute.xlu1 %v6704_v1  ;;  %3845 = vmatprep.subr.bf16.mxu1 %v4466_v15  ;;  %v606_v28 = vld [vmem:[%s6700_s1] sm:$0xff]  ;;  %v39_v31 = vld [vmem:[%s6699_s0 + $0x38] sm:$0xff]  ;;  %v4477_v32 = vld [vmem:[#allocation2 + $0xa8] ss:$12 sps:$4 sm:$0xff]   ;;  %v4919_v46 = vmov 1.0|1.0  }
  0x1d   :  { %4440 = vset.pattern.permute.xlu0 %v4916_v0  ;;  %52 = vperm.xlu1 %4439, %v35_v6   ;;  %v4479_v33 = vld [vmem:[#allocation2 + $0x98] ss:$12 sps:$4 sm:$0xff]   ;;  %v4480_v35 = vld [vmem:[#allocation2 + $0xb0] ss:$12 sps:$4 sm:$0xff]   ;;  %v5012_v43 = vld [vmem:[#allocation2 + $0xc0] ss:$12 sps:$4 sm:$0xff]  }
  0x1e   :  { %81 = vperm.xlu0 %4440, %v34_v8   ;;  %308 = vmatpush1.bf16.msra.mxu0 %v4457_v13  ;;  %v5016_v44 = vld [vmem:[#allocation2 + $0xdc] ss:$12 sps:$4 sm:$0xff]   ;;  %v5022_v48 = vld [vmem:[#allocation2 + $0xd8] ss:$12 sps:$4 sm:$0xff]   ;;  %v5025_v49 = vld [vmem:[#allocation2 + $0xf4] ss:$12 sps:$4 sm:$0xff]  }
  0x1f   :  { %309 = vmatprep.subr.bf16.mxu0 %v4459_v14  ;;  %3846 = vmatpush3.bf16.msra.mxu1 %v4466_v15  ;;  %v5028_v52 = vld [vmem:[#allocation2 + $0xf0] ss:$12 sps:$4 sm:$0xff]   ;;  %v5035_v53 = vld [vmem:[#allocation2 + $0x10c] ss:$12 sps:$4 sm:$0xff]   ;;  %v5040_v55 = vld [vmem:[#allocation2 + $0x108] ss:$12 sps:$4 sm:$0xff]  }
  0x20   :  { %3847 = vmatprep.subr.bf16.mxu1 %v4470_v20  ;;  %v5045_v57 = vld [vmem:[#allocation2 + $0x124] ss:$12 sps:$4 sm:$0xff]   ;;  %v5047_v58 = vld [vmem:[#allocation2 + $0xc8] ss:$12 sps:$4 sm:$0xff]   ;;  %v5053_v59 = vld [vmem:[#allocation2 + $0x120] ss:$12 sps:$4 sm:$0xff]  }
  0x21   :  { %4442 = vset.pattern.permute.xlu1 %v4916_v0  ;;  %v5056_v60 = vld [vmem:[#allocation2 + $0x13c] ss:$12 sps:$4 sm:$0xff]   ;;  %v5059_v61 = vld [vmem:[#allocation2 + $0xe0] ss:$12 sps:$4 sm:$0xff]   ;;  %v5071_v3 = vld [vmem:[#allocation2 + $0xf8] ss:$12 sps:$4 sm:$0xff]  }
  0x22   :  { %4441 = vset.pattern.permute.xlu0 %v6704_v1  ;;  %84 = vperm.xlu1 %4442, %v35_v6   ;;  %v5068_v2 = vld [vmem:[#allocation2 + $0x154] ss:$12 sps:$4 sm:$0xff]   ;;  %v5084_v7 = vld [vmem:[#allocation2 + $0x150] ss:$12 sps:$4 sm:$0xff]   ;;  %v5124_v15 = vld [vmem:[#allocation2 + $0x158] ss:$12 sps:$4 sm:$0xff]  }
  0x23   :  { %49 = vperm.xlu0 %4441, %v34_v8   ;;  %310 = vmatpush1.bf16.msra.mxu0 %v4461_v18  ;;  %6861 = vst [vmem:[#allocation5_spill] sm:$0xff] %v5084_v7  ;;  %v5089_v8 = vld [vmem:[#allocation2 + $0x16c] ss:$12 sps:$4 sm:$0xff]   ;;  %v5092_v9 = vld [vmem:[#allocation2 + $0x110] ss:$12 sps:$4 sm:$0xff]   ;;  %6864 = vst [vmem:[#allocation8_spill] sm:$0xff] %v5124_v15 }
  0x24   :  { %311 = vmatprep.subr.bf16.mxu0 %v4463_v19  ;;  %3848 = vmatpush3.bf16.msra.mxu1 %v4470_v20  ;;  %6862 = vst [vmem:[#allocation6_spill] sm:$0xff] %v5089_v8  ;;  %v5102_v11 = vld [vmem:[#allocation2 + $0x168] ss:$12 sps:$4 sm:$0xff]   ;;  %v5115_v14 = vld [vmem:[#allocation2 + $0x140] ss:$12 sps:$4 sm:$0xff]  }
  0x25   :  { %3849 = vmatprep.subr.bf16.mxu1 %v4474_v25  ;;  %6863 = vst [vmem:[#allocation7_spill] sm:$0xff] %v5102_v11  ;;  %v5106_v12 = vld [vmem:[#allocation2 + $0x128] ss:$12 sps:$4 sm:$0xff]   ;;  %v5142_v18 = vld [vmem:[#allocation2 + $0x180] ss:$12 sps:$4 sm:$0xff]  }
  0x26   :  { %4443 = vset.pattern.permute.xlu1 %v6704_v1  ;;  %6867 = vst [vmem:[#allocation11_spill] sm:$0xff] %v5142_v18  ;;  %v5144_v19 = vld [vmem:[#allocation2 + $0x188] ss:$12 sps:$4 sm:$0xff]  }
  0x27   :  { %58 = vperm.xlu0 %4441, %v37_v16   ;;  %55 = vperm.xlu1 %4443, %v36_v17   ;;  %6868 = vst [vmem:[#allocation12_spill] sm:$0xff] %v5144_v19  ;;  %v5149_v20 = vld [vmem:[#allocation2 + $0x19c] ss:$12 sps:$4 sm:$0xff]  }
  0x28   :  { %312 = vmatpush1.bf16.msra.mxu0 %v4465_v22  ;;  %3850 = vmatpush3.bf16.msra.mxu1 %v4474_v25  ;;  %6869 = vst [vmem:[#allocation13_spill] sm:$0xff] %v5149_v20  ;;  %v5154_v22 = vld [vmem:[#allocation2 + $0x1a0] ss:$12 sps:$4 sm:$0xff]   ;;  %v5164_v25 = vld [vmem:[#allocation2 + $0x1b8] ss:$12 sps:$4 sm:$0xff]  }
  0x29   :  { %313 = vmatprep.subr.bf16.mxu0 %v4467_v23  ;;  %3851 = vmatprep.subr.bf16.mxu1 %v4478_v30  ;;  %6871 = vst [vmem:[#allocation15_spill] sm:$0xff] %v5154_v22  ;;  %v5159_v23 = vld [vmem:[#allocation2 + $0x1b4] ss:$12 sps:$4 sm:$0xff]   ;;  %6874 = vst [vmem:[#allocation18_spill] sm:$0xff] %v5164_v25 }
  0x2a   :  { %6872 = vst [vmem:[#allocation16_spill] sm:$0xff] %v5159_v23 }
  0x2b   :  { %61 = vperm.xlu0 %4441, %v38_v21   ;;  %4444 = vset.pattern.permute.xlu1 %v4916_v0 }
  0x2c   :  { %87 = vperm.xlu1 %4444, %v36_v17   ;;  %314 = vmatpush1.bf16.msra.mxu0 %v4469_v24  ;;  %v5140_v17 = vld [vmem:[#allocation2 + $0x184] ss:$12 sps:$4 sm:$0xff]  }
  0x2d   :  { %315 = vmatprep.subr.bf16.mxu0 %v4471_v26  ;;  %3852 = vmatpush3.bf16.msra.mxu1 %v4478_v30  ;;  %6866 = vst [vmem:[#allocation10_spill] sm:$0xff] %v5140_v17  ;;  %v5162_v24 = vld [vmem:[#allocation2 + $0x1b0] ss:$12 sps:$4 sm:$0xff]   ;;  %v5169_v26 = vld [vmem:[#allocation2 + $0x1cc] ss:$12 sps:$4 sm:$0xff]  }
  0x2e   :  { %3853 = vmatprep.subr.bf16.mxu1 %v4479_v33  ;;  %6873 = vst [vmem:[#allocation17_spill] sm:$0xff] %v5162_v24  ;;  %6875 = vst [vmem:[#allocation19_spill] sm:$0xff] %v5169_v26  ;;  %v5182_v30 = vld [vmem:[#allocation2 + $0x1e0] ss:$12 sps:$4 sm:$0xff]  }
  0x2f   :  { %4446 = vset.pattern.permute.xlu0 %v4916_v0  ;;  %6879 = vst [vmem:[#allocation23_spill] sm:$0xff] %v5182_v30 }
  0x30   :  { %93 = vperm.xlu0 %4446, %v38_v21   ;;  %90 = vperm.xlu1 %4444, %v37_v16   ;;  %v5130_v16 = vld [vmem:[#allocation2 + $0x170] ss:$12 sps:$4 sm:$0xff]   ;;  %v5152_v21 = vld [vmem:[#allocation2 + $0x198] ss:$12 sps:$4 sm:$0xff]  }
  0x31   :  { %316 = vmatpush1.bf16.msra.mxu0 %v4473_v27  ;;  %3854 = vmatpush3.bf16.msra.mxu1 %v4479_v33  ;;  %6865 = vst [vmem:[#allocation9_spill] sm:$0xff] %v5130_v16  ;;  %6870 = vst [vmem:[#allocation14_spill] sm:$0xff] %v5152_v21  ;;  %v5172_v27 = vld [vmem:[#allocation2 + $0x1c8] ss:$12 sps:$4 sm:$0xff]   ;;  %v5191_v33 = vld [vmem:[#allocation2 + $0x1f8] ss:$12 sps:$4 sm:$0xff]  }
  0x32   :  { %317 = vmatprep.subr.bf16.mxu0 %v4475_v29  ;;  %3855 = vmatprep.subr.bf16.mxu1 %v4480_v35  ;;  %6876 = vst [vmem:[#allocation20_spill] sm:$0xff] %v5172_v27  ;;  %v5179_v29 = vld [vmem:[#allocation2 + $0x1e4] ss:$12 sps:$4 sm:$0xff]   ;;  %6882 = vst [vmem:[#allocation26_spill] sm:$0xff] %v5191_v33 }
  0x33   :  { %6878 = vst [vmem:[#allocation22_spill] sm:$0xff] %v5179_v29 }
  0x34   :  { %612 = vperm.xlu0 %4446, %v606_v28   ;;  %4445 = vset.pattern.permute.xlu1 %v6704_v1 }
  0x35   :  { %64 = vperm.xlu1 %4445, %v39_v31   ;;  %318 = vmatpush1.bf16.msra.mxu0 %v4477_v32  ;;  %v5186_v32 = vld [vmem:[#allocation2 + $0x1fc] ss:$12 sps:$4 sm:$0xff]  }
  0x36   :  { %744 = vmatprep.subr.bf16.mxu0 %v4995_v34  ;;  %3856 = vmatpush3.bf16.msra.mxu1 %v4480_v35  ;;  %6881 = vst [vmem:[#allocation25_spill] sm:$0xff] %v5186_v32  ;;  %v5193_v35 = vld [vmem:[#allocation2 + $0x200] ss:$12 sps:$4 sm:$0xff]  }
  0x37   :  { %3865 = vmatprep.subr.bf16.mxu1 %v6706_v36  ;;  %6883 = vst [vmem:[#allocation27_spill] sm:$0xff] %v5193_v35 }
  0x39   :  { %4447 = vset.pattern.permute.xlu1 %v4916_v0  ;;  %v5065_v0 = vld [vmem:[#allocation2 + $0x138] ss:$12 sps:$4 sm:$0xff]  }
  0x3a   :  { %96 = vperm.xlu1 %4447, %v39_v31   ;;  %v5184_v31 = vld [vmem:[#allocation2 + $0x1e8] ss:$12 sps:$4 sm:$0xff]  }
  0x3b   :  { %6880 = vst [vmem:[#allocation24_spill] sm:$0xff] %v5184_v31 }
  0x3e   :  { %4448 = vset.pattern.permute.xlu1 %v6704_v1 }
  0x3f   :  { %609 = vperm.xlu1 %4448, %v606_v28   ;;  %v5174_v28 = vld [vmem:[#allocation2 + $0x1d0] ss:$12 sps:$4 sm:$0xff]  }
  0x40   :  { %6877 = vst [vmem:[#allocation21_spill] sm:$0xff] %v5174_v28 }
  0x93   :  { %v76_v39 = vpop.permute.xlu1 %75 }
  0x94   :  { %v44_v40 = vpop.permute.xlu0 %43  ;;  %vm98_vm0 = vcmp.eq.s32.totalorder %v5003_v38, %v76_v39  ;;  %v5197_v39 = vld [vmem:[#allocation2 + $0x214] ss:$12 sps:$4 sm:$0xff]  }
  0x95   :  { %vm66_vm1 = vcmp.eq.s32.totalorder %v5003_v38, %v44_v40  ;;  %6884 = vst [vmem:[#allocation28_spill] sm:$0xff] %v5197_v39  ;;  %v5201_v40 = vld [vmem:[#allocation2 + $0x210] ss:$12 sps:$4 sm:$0xff]  }
  0x96   :  { %vm106_vm3 = vmor %vm66_vm1, %vm98_vm0  ;;  %6885 = vst [vmem:[#allocation29_spill] sm:$0xff] %v5201_v40 }
  0x97   :  { %v79_v41 = vpop.permute.xlu1 %78  ;;  %vm115_vm4 = vmor %vm106_vm3, %vm114_vm2 }
  0x98   :  { %v47_v42 = vpop.permute.xlu0 %46  ;;  %vm99_vm5 = vcmp.eq.s32.totalorder %v5003_v38, %v79_v41  ;;  %v5203_v41 = vld [vmem:[#allocation2 + $0x218] ss:$12 sps:$4 sm:$0xff]  }
  0x99   :  { %vm67_vm6 = vcmp.eq.s32.totalorder %v5003_v38, %v47_v42  ;;  %6886 = vst [vmem:[#allocation30_spill] sm:$0xff] %v5203_v41  ;;  %v5207_v42 = vld [vmem:[#allocation2 + $0x22c] ss:$12 sps:$4 sm:$0xff]  }
  0x9a   :  { %vm107_vm7 = vmor %vm67_vm6, %vm99_vm5  ;;  %6887 = vst [vmem:[#allocation31_spill] sm:$0xff] %v5207_v42 }
  0x9b   :  { %vm116_vm8 = vmor %vm107_vm7, %vm114_vm2 }
  0x9c   :  { %vm3456_vm9 = vmpackc.low %vm116_vm8, %vm115_vm4  ;;  %v53_v45 = vpop.permute.xlu1 %52 }
  0x9d   :  { %3457 = vmatmul.mubr.msk.bf16.vlgmr.msra.gmra.mrb[0].mxu0 %vm3456_vm9, %v4919_v46  ;;  %3857 = vmatprep.mubr.msk.bf16.mxu1 %vm3456_vm9, %v4919_v46  ;;  %v82_v47 = vpop.permute.xlu0 %81  ;;  %vm69_vm10 = vcmp.eq.s32.totalorder %v5003_v38, %v53_v45  ;;  %v5211_v45 = vld [vmem:[#allocation2 + $0x228] ss:$12 sps:$4 sm:$0xff]  }
  0x9e   :  { %345 = vmatprep.mubr.bf16.mxu0 %v6704_v1  ;;  %745 = vmatpush1.bf16.msra.mxu0 %v5012_v43  ;;  %vm100_vm11 = vcmp.eq.s32.totalorder %v5003_v38, %v82_v47  ;;  %6888 = vst [vmem:[#allocation32_spill] sm:$0xff] %v5211_v45  ;;  %v5217_v47 = vld [vmem:[#allocation2 + $0x244] ss:$12 sps:$4 sm:$0xff]  }
  0x9f   :  { %746 = vmatprep.subr.bf16.mxu0 %v5016_v44  ;;  %6890 = vst [vmem:[#allocation34_spill] sm:$0xff] %v5217_v47 }
  0xa1   :  { %v85_v50 = vpop.permute.xlu1 %84 }
  0xa2   :  { %v50_v51 = vpop.permute.xlu0 %49  ;;  %747 = vmatpush1.bf16.msra.mxu0 %v5022_v48  ;;  %vm101_vm12 = vcmp.eq.s32.totalorder %v5003_v38, %v85_v50 }
  0xa3   :  { %vm68_vm13 = vcmp.eq.s32.totalorder %v5003_v38, %v50_v51  ;;  %748 = vmatprep.subr.bf16.mxu0 %v5025_v49  ;;  %vm109_vm14 = vmor %vm69_vm10, %vm101_vm12 }
  0xa4   :  { %vm118_vm15 = vmor %vm109_vm14, %vm114_vm2 }
  0xa5   :  { %vm108_vm0 = vmor %vm68_vm13, %vm100_vm11 }
  0xa6   :  { %v59_v54 = vpop.permute.xlu0 %58  ;;  %749 = vmatpush1.bf16.msra.mxu0 %v5028_v52  ;;  %vm117_vm1 = vmor %vm108_vm0, %vm114_vm2  ;;  %v56_v56 = vpop.permute.xlu1 %55 }
  0xa7   :  { %750 = vmatprep.subr.bf16.mxu0 %v5035_v53  ;;  %vm3458_vm3 = vmpackc.low %vm118_vm15, %vm117_vm1  ;;  %vm70_vm5 = vcmp.eq.s32.totalorder %v5003_v38, %v56_v56  ;;  %vm71_vm8 = vcmp.eq.s32.totalorder %v5003_v38, %v59_v54 }
  0xa8   :  { %3459 = vmatmul.mubr.msk.bf16.gmra.mrb[4].mxu0 %vm3458_vm3, %v4919_v46  ;;  %3858 = vmatmul.mubr.msk.bf16.vlgmr.msra.gmra.mrb[0].mxu1 %vm3458_vm3, %v4919_v46 }
  0xa9   :  { %355 = vmatprep.mubr.bf16.mxu0 %v6704_v1  ;;  %3866 = vmatpush3.bf16.msra.mxu1 %v5047_v58 }
  0xaa   :  { %751 = vmatpush1.bf16.msra.mxu0 %v5040_v55  ;;  %v62_v62 = vpop.permute.xlu0 %61  ;;  %3867 = vmatprep.subr.bf16.mxu1 %v6706_v36 }
  0xab   :  { %752 = vmatprep.subr.bf16.mxu0 %v5045_v57  ;;  %v88_v63 = vpop.permute.xlu1 %87  ;;  %vm72_vm14 = vcmp.eq.s32.totalorder %v5003_v38, %v62_v62 }
  0xac   :  { %vm102_vm4 = vcmp.eq.s32.totalorder %v5003_v38, %v88_v63 }
  0xad   :  { %vm110_vm6 = vmor %vm70_vm5, %vm102_vm4  ;;  %3868 = vmatpush3.bf16.msra.mxu1 %v5059_v61 }
  0xae   :  { %753 = vmatpush1.bf16.msra.mxu0 %v5053_v59  ;;  %3869 = vmatprep.subr.bf16.mxu1 %v6706_v36  ;;  %vm5078_vm9 = vmor %vm110_vm6, %vm114_vm2 }
  0xaf   :  { %754 = vmatprep.subr.bf16.mxu0 %v5056_v60  ;;  %v91_v4 = vpop.permute.xlu1 %90  ;;  %v94_v6 = vpop.permute.xlu0 %93 }
  0xb0   :  { %vm103_vm7 = vcmp.eq.s32.totalorder %v5003_v38, %v91_v4  ;;  %vm104_vm12 = vcmp.eq.s32.totalorder %v5003_v38, %v94_v6 }
  0xb1   :  { %vm111_vm10 = vmor %vm71_vm8, %vm103_vm7  ;;  %3870 = vmatpush3.bf16.msra.mxu1 %v5071_v3  ;;  %vm4920_vm7 = vmmov 0  }
  0xb2   :  { %755 = vmatpush1.bf16.msra.mxu0 %v5065_v0  ;;  %vm120_vm11 = vmor %vm111_vm10, %vm114_vm2  ;;  %3871 = vmatprep.subr.bf16.mxu1 %v6706_v36 }
  0xb3   :  { %756 = vmatprep.subr.bf16.mxu0 %v5068_v2  ;;  %vm3460_vm13 = vmpackc.low %vm120_vm11, %vm5078_vm9 }
  0xb4   :  { %v65_v10 = vpop.permute.xlu1 %64  ;;  %3461 = vmatmul.mubr.msk.bf16.gmra.mrb[8].mxu0 %vm3460_vm13, %v4919_v46  ;;  %3861 = vmatprep.mubr.msk.bf16.mxu1 %vm3460_vm13, %v4919_v46  ;;  %vm112_vm15 = vmor %vm72_vm14, %vm104_vm12 }
  0xb5   :  { %365 = vmatprep.mubr.bf16.mxu0 %v6704_v1  ;;  %3872 = vmatpush3.bf16.msra.mxu1 %v5092_v9  ;;  %vm121_vm0 = vmor %vm112_vm15, %vm114_vm2  ;;  %vm73_vm1 = vcmp.eq.s32.totalorder %v5003_v38, %v65_v10 }
  0xb6   :  { %757 = vmatpush1.bf16.msra.mxu0 %v5084_v7  ;;  %3873 = vmatprep.subr.bf16.mxu1 %v6706_v36 }
  0xb7   :  { %758 = vmatprep.subr.bf16.mxu0 %v5089_v8 }
  0xb9   :  { %v97_v13 = vpop.permute.xlu1 %96  ;;  %3874 = vmatpush3.bf16.msra.mxu1 %v5106_v12 }
  0xba   :  { %vm105_vm3 = vcmp.eq.s32.totalorder %v5003_v38, %v97_v13  ;;  %759 = vmatpush1.bf16.msra.mxu0 %v5102_v11  ;;  %3875 = vmatprep.subr.bf16.mxu1 %v6706_v36 }
  0xbb   :  { %vm113_vm4 = vmor %vm73_vm1, %vm105_vm3  ;;  %976 = vmatprep.subr.bf16.mxu0 %v5140_v17  ;;  %vm3417_vm3 = vcmask 7168  }
  0xbc   :  { %vm122_vm5 = vmor %vm113_vm4, %vm114_vm2  ;;  %vm607_vm2 = vcmp.lt.s32.totalorder %v5003_v38, 64  ;;  %v5301_v38 = vld [vmem:[#allocation2 + $0x25c] ss:$12 sps:$4 sm:$0xff]  }
  0xbd   :  { %vm3462_vm6 = vmpackc.low %vm122_vm5, %vm121_vm0  ;;  %3876 = vmatpush3.bf16.msra.mxu1 %v5115_v14 }
  0xbe   :  { %3463 = vmatmul.mubr.msk.bf16.gmra.mrb[12].mxu0 %vm3462_vm6, %v4919_v46  ;;  %3862 = vmatmul.mubr.msk.bf16.gmra.mrb[4].mxu1 %vm3462_vm6, %v4919_v46  ;;  %v5213_v46 = vld [vmem:[#allocation2 + $0x230] ss:$12 sps:$4 sm:$0xff]  }
  0xbf   :  { %776 = vmatprep.mubr.bf16.mxu0 %v6704_v1  ;;  %3877 = vmatprep.subr.bf16.mxu1 %v6706_v36  ;;  %6889 = vst [vmem:[#allocation33_spill] sm:$0xff] %v5213_v46 }
  0xc0   :  { %3881 = vmatprep.mubr.msk.bf16.mxu1 %vm4920_vm7, %v6706_v36 }
  0xc1   :  { %3878 = vmatpush3.bf16.msra.mxu1 %v5124_v15 }
  0xc2   :  { %3879 = vmatprep.subr.bf16.mxu1 %v6706_v36 }
  0xc5   :  { %3880 = vmatpush3.bf16.msra.mxu1 %v5130_v16 }
  0xc6   :  { %777 = vmatmul.mubr.bf16.vlgmr.msra.gmra.mrb[16].mxu0 %v6704_v1  ;;  %3885 = vmatprep.subr.bf16.mxu1 %v6706_v36 }
  0xc7   :  { %1008 = vmatprep.mubr.bf16.mxu0 %v6704_v1  ;;  %977 = vmatpush1.bf16.msra.mxu0 %v5142_v18 }
  0xc8   :  { %3882 = vmatmul.mubr.bf16.vlgmr.msra.gmra.mrb[8].mxu1 %v6704_v1  ;;  %978 = vmatprep.subr.bf16.mxu0 %v5149_v20 }
  0xc9   :  { %3901 = vmatprep.mubr.msk.bf16.mxu1 %vm4920_vm7, %v6706_v36  ;;  %3886 = vmatpush3.bf16.msra.mxu1 %v5144_v19 }
  0xca   :  { %3887 = vmatprep.subr.bf16.mxu1 %v6706_v36 }
  0xcb   :  { %979 = vmatpush1.bf16.msra.mxu0 %v5152_v21 }
  0xcc   :  { %980 = vmatprep.subr.bf16.mxu0 %v5159_v23 }
  0xcd   :  { %3888 = vmatpush3.bf16.msra.mxu1 %v5154_v22 }
  0xce   :  { %3889 = vmatprep.subr.bf16.mxu1 %v6706_v36 }
  0xcf   :  { %981 = vmatpush1.bf16.msra.mxu0 %v5162_v24 }
  0xd0   :  { %982 = vmatprep.subr.bf16.mxu0 %v5169_v26 }
  0xd1   :  { %3890 = vmatpush3.bf16.msra.mxu1 %v5164_v25 }
  0xd2   :  { %3891 = vmatprep.subr.bf16.mxu1 %v6706_v36 }
  0xd3   :  { %983 = vmatpush1.bf16.msra.mxu0 %v5172_v27 }
  0xd4   :  { %984 = vmatprep.subr.bf16.mxu0 %v5179_v29 }
  0xd5   :  { %3892 = vmatpush3.bf16.msra.mxu1 %v5174_v28 }
  0xd6   :  { %3893 = vmatprep.subr.bf16.mxu1 %v6706_v36 }
  0xd7   :  { %985 = vmatpush1.bf16.msra.mxu0 %v5182_v30 }
  0xd8   :  { %986 = vmatprep.subr.bf16.mxu0 %v5186_v32 }
  0xd9   :  { %3894 = vmatpush3.bf16.msra.mxu1 %v5184_v31 }
  0xda   :  { %3895 = vmatprep.subr.bf16.mxu1 %v6706_v36 }
  0xdb   :  { %987 = vmatpush1.bf16.msra.mxu0 %v5191_v33 }
  0xdc   :  { %988 = vmatprep.subr.bf16.mxu0 %v5197_v39 }
  0xdd   :  { %3896 = vmatpush3.bf16.msra.mxu1 %v5193_v35 }
  0xde   :  { %3897 = vmatprep.subr.bf16.mxu1 %v6706_v36 }
  0xdf   :  { %989 = vmatpush1.bf16.msra.mxu0 %v5201_v40 }
  0xe0   :  { %990 = vmatprep.subr.bf16.mxu0 %v5207_v42 }
  0xe1   :  { %3898 = vmatpush3.bf16.msra.mxu1 %v5203_v41 }
  0xe2   :  { %3899 = vmatprep.subr.bf16.mxu1 %v6706_v36 }
  0xe3   :  { %991 = vmatpush1.bf16.msra.mxu0 %v5211_v45 }
  0xe4   :  { %1185 = vmatprep.subr.bf16.mxu0 %v5217_v47 }
  0xe5   :  { %3900 = vmatpush3.bf16.msra.mxu1 %v5213_v46 }
  0xe6   :  { %3905 = vmatprep.subr.bf16.mxu1 %v6706_v36 }
 0x170   :  { %v337_v50 = vpop.f32.mrb[0].mxu0 }
 0x171   :  { %v339_v51 = vpop.f32.mrb[1].mxu0 }
 0x172   :  { %v5223_v54 = vpop.f32.mrb[2].mxu0 }
 0x173   :  { %6891 = vst [vmem:[#allocation35_spill] sm:$0xff] %v5223_v54  ;;  %v5225_v56 = vpop.f32.mrb[3].mxu0 }
 0x174   :  { %6892 = vst [vmem:[#allocation36_spill] sm:$0xff] %v5225_v56 }
 0x17b   :  { %v5227_v62 = vpop.f32.mrb[4].mxu0  ;;  %v5229_v63 = vpop.f32.mrb[0].mxu1 }
 0x17c   :  { %6893 = vst [vmem:[#allocation37_spill] sm:$0xff] %v5227_v62  ;;  %6894 = vst [vmem:[#allocation38_spill] sm:$0xff] %v5229_v63  ;;  %v5231_v4 = vpop.f32.mrb[5].mxu0  ;;  %v410_v5 = vpop.f32.mrb[1].mxu1  ;;  %v6904_v63 = vlaneseq }
 0x17d   :  { %6895 = vst [vmem:[#allocation39_spill] sm:$0xff] %v5231_v4  ;;  %v5233_v6 = vpop.f32.mrb[6].mxu0  ;;  %v5235_v10 = vpop.f32.mrb[2].mxu1 }
 0x17e   :  { %6896 = vst [vmem:[#allocation40_spill] sm:$0xff] %v5233_v6  ;;  %6897 = vst [vmem:[#allocation41_spill] sm:$0xff] %v5235_v10  ;;  %v5237_v13 = vpop.f32.mrb[7].mxu0  ;;  %v5239_v1 = vpop.f32.mrb[3].mxu1  ;;  %v556_v54 = vshrl.u32 %v6904_v63, 7 }
 0x17f   :  { %6898 = vst [vmem:[#allocation42_spill] sm:$0xff] %v5237_v13  ;;  %6899 = vst [vmem:[#allocation43_spill] sm:$0xff] %v5239_v1 }
 0x180   :  { %v5258_v13 = vsub.s32 0, %v556_v54  ;;  %v5281_v32 = vsub.s32 2, %v556_v54 }
 0x182   :  { %6909 = vst [vmem:[#allocation52_spill] sm:$0xff] %v5258_v13 }
 0x187   :  { %v5241_v36 = vpop.f32.mrb[8].mxu0 }
 0x188   :  { %6900 = vst [vmem:[#allocation44_spill] sm:$0xff] %v5241_v36  ;;  %v5243_v37 = vpop.f32.mrb[9].mxu0 }
 0x189   :  { %6901 = vst [vmem:[#allocation45_spill] sm:$0xff] %v5243_v37  ;;  %v5245_v56 = vpop.f32.mrb[10].mxu0 }
 0x18a   :  { %6902 = vst [vmem:[#allocation46_spill] sm:$0xff] %v5245_v56  ;;  %v5247_v62 = vpop.f32.mrb[11].mxu0  ;;  %v5267_v56 = vsub.s32 1, %v556_v54 }
 0x18b   :  { %6903 = vst [vmem:[#allocation47_spill] sm:$0xff] %v5247_v62  ;;  %v553_v62 = vld [vmem:[%s6702_s3] ss:$8 sm:$0x7] }
 0x18c   :  { %6912 = vst [vmem:[#allocation55_spill] sm:$0xff] %v5267_v56 }
 0x191   :  { %v5250_v4 = vpop.f32.mrb[12].mxu0  ;;  %v5252_v47 = vpop.f32.mrb[4].mxu1 }
 0x192   :  { %6905 = vst [vmem:[#allocation48_spill] sm:$0xff] %v5250_v4  ;;  %6906 = vst [vmem:[#allocation49_spill] sm:$0xff] %v5252_v47  ;;  %v5254_v6 = vpop.f32.mrb[13].mxu0  ;;  %v5256_v10 = vpop.f32.mrb[5].mxu1  ;;  %v5274_v47 = vrot.slane %v553_v62, %v5258_v13 }
 0x193   :  { %6907 = vst [vmem:[#allocation50_spill] sm:$0xff] %v5254_v6  ;;  %6908 = vst [vmem:[#allocation51_spill] sm:$0xff] %v5256_v10  ;;  %v5260_v1 = vpop.f32.mrb[14].mxu0  ;;  %v5262_v36 = vpop.f32.mrb[6].mxu1  ;;  %v5277_v6 = vrot.slane %v553_v62, %v5267_v56 }
 0x194   :  { %6910 = vst [vmem:[#allocation53_spill] sm:$0xff] %v5260_v1  ;;  %6911 = vst [vmem:[#allocation54_spill] sm:$0xff] %v5262_v36  ;;  %v5269_v63 = vpop.f32.mrb[15].mxu0  ;;  %v5271_v4 = vpop.f32.mrb[7].mxu1 }
 0x195   :  { %6913 = vst [vmem:[#allocation56_spill] sm:$0xff] %v5269_v63  ;;  %6914 = vst [vmem:[#allocation57_spill] sm:$0xff] %v5271_v4 }
 0x196   :  { %6915 = vst [vmem:[#allocation58_spill] sm:$0xff] %v5277_v6 }
 0x199   :  { %v778_v10 = vpop.f32.mrb[16].mxu0 }
 0x19a   :  { %v779_v1 = vadd.f32 %v778_v10, %v5274_v47  ;;  %v780_v36 = vpop.f32.mrb[17].mxu0  ;;  %v5284_v10 = vrot.slane %v553_v62, %v5281_v32 }
 0x19b   :  { %v781_v37 = vadd.f32 %v780_v36, %v5277_v6  ;;  %v782_v46 = vpop.f32.mrb[18].mxu0  ;;  %v819_v40 = vpop.f32.mrb[8].mxu1 }
 0x19c   :  { %v825_v45 = vadd.f32 %v779_v1, %v337_v50  ;;  %v783_v42 = vpop.f32.mrb[19].mxu0  ;;  %v3883_v39 = vpop.f32.mrb[9].mxu1 }
 0x19d   :  { %v826_v41 = vadd.f32 %v781_v37, %v339_v51  ;;  %v822_v4 = vpop.f32.mrb[10].mxu1  ;;  %v820_v37 = vadd.f32 %v819_v40, %v5284_v10  ;;  %v5293_v40 = vld [vmem:[#allocation2 + $0x240] ss:$12 sps:$4 sm:$0xff]  }
 0x19e   :  { %v3498_v63 = vmul.f32 -1.442695, %v825_v45  ;;  %v3884_v13 = vpop.f32.mrb[11].mxu1  ;;  %v5295_v4 = vld [vmem:[#allocation2 + $0x248] ss:$12 sps:$4 sm:$0xff]  }
 0x19f   :  { %v3499_v35 = vmul.f32 -1.442695, %v826_v41  ;;  %v613_v41 = vpop.permute.xlu0 %612  ;;  %v6971_v13 = vld [vmem:[#allocation23_spill] sm:$0xff] }
 0x1a0   :  { %4585 = vpow2.f32 %v3498_v63  ;;  %v5318_v63 = vld [vmem:[#allocation2 + $0x258] ss:$12 sps:$4 sm:$0xff]  }
 0x1a1   :  { %4587 = vpow2.f32 %v3499_v35  ;;  %v610_v35 = vpop.permute.xlu1 %609 }
 0x1aa   :  { %v4586_v56 = vpop.eup %4585 }
 0x1ab   :  { %v833_v33 = vadd.f32 1.0, %v4586_v56  ;;  %v4588_v36 = vpop.eup %4587 }
 0x1ac   :  { %v834_v1 = vadd.f32 1.0, %v4588_v36  ;;  %v5320_v36 = vld [vmem:[#allocation2 + $0x260] ss:$12 sps:$4 sm:$0xff]  }
 0x1ad   :  { %4589 = vrcp.f32 %v833_v33  ;;  %v5288_v33 = vsel %vm607_vm2, %v610_v35, %v613_v41  ;;  %v5341_v35 = vld [vmem:[#allocation2 + $0x288] ss:$12 sps:$4 sm:$0xff]   ;;  %v5343_v41 = vld [vmem:[#allocation2 + $0x290] ss:$12 sps:$4 sm:$0xff]  }
 0x1ae   :  { %4591 = vrcp.f32 %v834_v1  ;;  %vm615_vm8 = vcmp.gt.s32.totalorder %v5288_v33, 0  ;;  %v6918_v1 = vmov 0.0   ;;  %6922 = vst [vmem:[#allocation61_spill] sm:$0xff] %v5341_v35  ;;  %6923 = vst [vmem:[#allocation62_spill] sm:$0xff] %v5343_v41  ;;  %vm1288_vm10 = vcmp.gt.s32.totalorder %v5288_v33, 1 }
 0x1af   :  { %vm5306_vm9 = vmpackc.low %vm615_vm8, %vm615_vm8  ;;  %vm1578_vm11 = vcmp.gt.s32.totalorder %v5288_v33, 2  ;;  %vm1868_vm12 = vcmp.gt.s32.totalorder %v5288_v33, 3  ;;  %vm2158_vm13 = vcmp.gt.s32.totalorder %v5288_v33, 4  ;;  %vm2448_vm14 = vcmp.gt.s32.totalorder %v5288_v33, 5 }
 0x1b0   :  { %vm2738_vm15 = vcmp.gt.s32.totalorder %v5288_v33, 6  ;;  %vm3028_vm0 = vcmp.gt.s32.totalorder %v5288_v33, 7 }
 0x1b7   :  { %v4590_v42 = vpop.eup %4589 }
 0x1b8   :  { %v839_v39 = vmul.f32 %v4590_v42, %v820_v37  ;;  %v4592_v46 = vpop.eup %4591  ;;  %v5324_v37 = vld [vmem:[#allocation2 + $0x274] ss:$12 sps:$4 sm:$0xff]   ;;  %v6919_v42 = vmov 0  }
 0x1b9   :  { %v842_v50 = vsub.f32 1.0, %v4592_v46  ;;  %v844_v56 = vmul.f32 0.0, %v4592_v46  ;;  %v5337_v46 = vld [vmem:[#allocation2 + $0x28c] ss:$12 sps:$4 sm:$0xff]  }
 0x1ba   :  { %v840_v45 = vadd.f32 %v839_v39, %v410_v5  ;;  %v5331_v39 = vld [vmem:[#allocation2 + $0x270] ss:$12 sps:$4 sm:$0xff]   ;;  %6921 = vst [vmem:[#allocation60_spill] sm:$0xff] %v5337_v46 }
 0x1bc   :  { %4593 = vtanh.f32 %v840_v45  ;;  %v5333_v45 = vld [vmem:[#allocation2 + $0x278] ss:$12 sps:$4 sm:$0xff]  }
 0x1bd   :  { %6920 = vst [vmem:[#allocation59_spill] sm:$0xff] %v5333_v45 }
 0x1c6   :  { %v4594_v51 = vpop.eup %4593 }
 0x1c7   :  { %v843_v54 = vmul.f32 %v4594_v51, %v842_v50  ;;  %v5347_v50 = vld [vmem:[#allocation2 + $0x2a4] ss:$12 sps:$4 sm:$0xff]   ;;  %v5351_v51 = vld [vmem:[#allocation2 + $0x2a0] ss:$12 sps:$4 sm:$0xff]  }
 0x1c8   :  { %6924 = vst [vmem:[#allocation63_spill] sm:$0xff] %v5347_v50  ;;  %6925 = vst [vmem:[#allocation64_spill] sm:$0xff] %v5351_v51 }
 0x1c9   :  { %v5291_v62 = vadd.f32 %v844_v56, %v843_v54  ;;  %v5353_v54 = vld [vmem:[#allocation2 + $0x2a8] ss:$12 sps:$4 sm:$0xff]  }
 0x1ca   :  { %6926 = vst [vmem:[#allocation65_spill] sm:$0xff] %v5353_v54  ;;  %v5357_v56 = vld [vmem:[#allocation2 + $0x2bc] ss:$12 sps:$4 sm:$0xff]  }
 0x1cb   :  { %v5299_v5 = vpack.c.bf16 %v5291_v62, %v5291_v62  ;;  %6927 = vst [vmem:[#allocation66_spill] sm:$0xff] %v5357_v56 }
 0x1cd   :  { %3526 = vmatmul.mubr.msk.bf16.vlgmr.msra.gmra.mrb[20].mxu0 %vm5306_vm9, %v5299_v5  ;;  %3902 = vmatmul.mubr.msk.bf16.vlgmr.msra.gmra.mrb[12].mxu1 %vm5306_vm9, %v5299_v5 }
 0x1ce   :  { %1186 = vmatpush1.bf16.msra.mxu0 %v5293_v40  ;;  %3906 = vmatpush3.bf16.msra.mxu1 %v5295_v4 }
 0x1cf   :  { %1187 = vmatprep.subr.bf16.mxu0 %v5301_v38  ;;  %3907 = vmatprep.subr.bf16.mxu1 %v6918_v1 }
 0x1d0   :  { %1217 = vmatprep.mubr.bf16.mxu0 %v6919_v42  ;;  %3921 = vmatprep.mubr.msk.bf16.mxu1 %vm4920_vm7, %v6918_v1 }
 0x1d2   :  { %1188 = vmatpush1.bf16.msra.mxu0 %v5318_v63  ;;  %3908 = vmatpush3.bf16.msra.mxu1 %v5320_v36 }
 0x1d3   :  { %1189 = vmatprep.subr.bf16.mxu0 %v5324_v37  ;;  %3909 = vmatprep.subr.bf16.mxu1 %v6918_v1 }
 0x1d6   :  { %1190 = vmatpush1.bf16.msra.mxu0 %v5331_v39  ;;  %3910 = vmatpush3.bf16.msra.mxu1 %v5333_v45  ;;  %v5363_v45 = vld [vmem:[#allocation2 + $0x2c0] ss:$12 sps:$4 sm:$0xff]  }
 0x1d7   :  { %1191 = vmatprep.subr.bf16.mxu0 %v5337_v46  ;;  %3911 = vmatprep.subr.bf16.mxu1 %v6918_v1  ;;  %v5361_v46 = vld [vmem:[#allocation2 + $0x2b8] ss:$12 sps:$4 sm:$0xff]  }
 0x1da   :  { %1192 = vmatpush1.bf16.msra.mxu0 %v5341_v35  ;;  %3912 = vmatpush3.bf16.msra.mxu1 %v5343_v41  ;;  %v5367_v41 = vld [vmem:[#allocation2 + $0x2d4] ss:$12 sps:$4 sm:$0xff]   ;;  %v5373_v35 = vld [vmem:[#allocation2 + $0x2d8] ss:$12 sps:$4 sm:$0xff]  }
 0x1db   :  { %1193 = vmatprep.subr.bf16.mxu0 %v5347_v50  ;;  %3913 = vmatprep.subr.bf16.mxu1 %v6918_v1  ;;  %v5371_v50 = vld [vmem:[#allocation2 + $0x2d0] ss:$12 sps:$4 sm:$0xff]  }
 0x1de   :  { %1194 = vmatpush1.bf16.msra.mxu0 %v5351_v51  ;;  %3914 = vmatpush3.bf16.msra.mxu1 %v5353_v54  ;;  %v5377_v54 = vld [vmem:[#allocation2 + $0x2ec] ss:$12 sps:$4 sm:$0xff]   ;;  %v5383_v51 = vld [vmem:[#allocation2 + $0x2f0] ss:$12 sps:$4 sm:$0xff]  }
 0x1df   :  { %1195 = vmatprep.subr.bf16.mxu0 %v5357_v56  ;;  %3915 = vmatprep.subr.bf16.mxu1 %v6918_v1  ;;  %v5381_v56 = vld [vmem:[#allocation2 + $0x2e8] ss:$12 sps:$4 sm:$0xff]  }
 0x1e2   :  { %1196 = vmatpush1.bf16.msra.mxu0 %v5361_v46  ;;  %3916 = vmatpush3.bf16.msra.mxu1 %v5363_v45 }
 0x1e3   :  { %1197 = vmatprep.subr.bf16.mxu0 %v5367_v41  ;;  %3917 = vmatprep.subr.bf16.mxu1 %v6918_v1 }
 0x1e6   :  { %1198 = vmatpush1.bf16.msra.mxu0 %v5371_v50  ;;  %3918 = vmatpush3.bf16.msra.mxu1 %v5373_v35 }
 0x1e7   :  { %1199 = vmatprep.subr.bf16.mxu0 %v5377_v54  ;;  %3919 = vmatprep.subr.bf16.mxu1 %v6918_v1 }
 0x1ea   :  { %1200 = vmatpush1.bf16.msra.mxu0 %v5381_v56  ;;  %3920 = vmatpush3.bf16.msra.mxu1 %v5383_v51 }
 0x1eb   :  { %1289 = vmatprep.subr.bf16.mxu0 %v4995_v34  ;;  %3925 = vmatprep.subr.bf16.mxu1 %v6918_v1  ;;  %v6928_v34 = vld [vmem:[#allocation25_spill] sm:$0xff] }
 0x1ed   :  { %1218 = vmatmul.mubr.bf16.vlgmr.msra.gmra.mrb[20].mxu0 %v6919_v42  ;;  %3922 = vmatmul.mubr.bf16.vlgmr.msra.gmra.mrb[16].mxu1 %v6919_v42 }
 0x1ee   :  { %1290 = vmatpush1.bf16.msra.mxu0 %v5012_v43  ;;  %3926 = vmatpush3.bf16.msra.mxu1 %v5047_v58 }
 0x1ef   :  { %1291 = vmatprep.subr.bf16.mxu0 %v5016_v44  ;;  %3927 = vmatprep.subr.bf16.mxu1 %v6918_v1 }
 0x1f0   :  { %1321 = vmatprep.mubr.bf16.mxu0 %v6919_v42  ;;  %3941 = vmatprep.mubr.msk.bf16.mxu1 %vm4920_vm7, %v6918_v1 }
 0x1f2   :  { %1292 = vmatpush1.bf16.msra.mxu0 %v5022_v48  ;;  %3928 = vmatpush3.bf16.msra.mxu1 %v5059_v61 }
 0x1f3   :  { %1293 = vmatprep.subr.bf16.mxu0 %v5025_v49  ;;  %3929 = vmatprep.subr.bf16.mxu1 %v6918_v1 }
 0x1f6   :  { %1294 = vmatpush1.bf16.msra.mxu0 %v5028_v52  ;;  %3930 = vmatpush3.bf16.msra.mxu1 %v5071_v3 }
 0x1f7   :  { %1295 = vmatprep.subr.bf16.mxu0 %v5035_v53  ;;  %3931 = vmatprep.subr.bf16.mxu1 %v6918_v1 }
 0x1fa   :  { %1296 = vmatpush1.bf16.msra.mxu0 %v5040_v55  ;;  %3932 = vmatpush3.bf16.msra.mxu1 %v5092_v9 }
 0x1fb   :  { %1297 = vmatprep.subr.bf16.mxu0 %v5045_v57  ;;  %3933 = vmatprep.subr.bf16.mxu1 %v6918_v1 }
 0x1fe   :  { %1298 = vmatpush1.bf16.msra.mxu0 %v5053_v59  ;;  %3934 = vmatpush3.bf16.msra.mxu1 %v5106_v12 }
 0x1ff   :  { %1299 = vmatprep.subr.bf16.mxu0 %v5056_v60  ;;  %3935 = vmatprep.subr.bf16.mxu1 %v6918_v1 }
 0x202   :  { %1300 = vmatpush1.bf16.msra.mxu0 %v5065_v0  ;;  %3936 = vmatpush3.bf16.msra.mxu1 %v5115_v14 }
 0x203   :  { %1301 = vmatprep.subr.bf16.mxu0 %v5068_v2  ;;  %3937 = vmatprep.subr.bf16.mxu1 %v6918_v1 }
 0x206   :  { %1302 = vmatpush1.bf16.msra.mxu0 %v5084_v7  ;;  %3938 = vmatpush3.bf16.msra.mxu1 %v5124_v15 }
 0x207   :  { %1303 = vmatprep.subr.bf16.mxu0 %v5089_v8  ;;  %3939 = vmatprep.subr.bf16.mxu1 %v6918_v1 }
 0x20a   :  { %1304 = vmatpush1.bf16.msra.mxu0 %v5102_v11  ;;  %3940 = vmatpush3.bf16.msra.mxu1 %v5130_v16 }
 0x20b   :  { %1393 = vmatprep.subr.bf16.mxu0 %v5140_v17  ;;  %3945 = vmatprep.subr.bf16.mxu1 %v6918_v1 }
 0x20d   :  { %3558 = vmatmul.mubr.msk.bf16.vlgmr.msra.gmra.mrb[24].mxu0 %vm5306_vm9, %v5299_v5  ;;  %3942 = vmatmul.mubr.msk.bf16.vlgmr.msra.gmra.mrb[20].mxu1 %vm5306_vm9, %v5299_v5  ;;  %v6929_v5 = vld [vmem:[#allocation26_spill] sm:$0xff] }
 0x20e   :  { %1394 = vmatpush1.bf16.msra.mxu0 %v5142_v18  ;;  %3946 = vmatpush3.bf16.msra.mxu1 %v5144_v19 }
 0x20f   :  { %1395 = vmatprep.subr.bf16.mxu0 %v5149_v20  ;;  %3947 = vmatprep.subr.bf16.mxu1 %v6918_v1 }
 0x210   :  { %1425 = vmatprep.mubr.bf16.mxu0 %v6919_v42  ;;  %3961 = vmatprep.mubr.msk.bf16.mxu1 %vm4920_vm7, %v6918_v1 }
 0x212   :  { %1396 = vmatpush1.bf16.msra.mxu0 %v5152_v21  ;;  %3948 = vmatpush3.bf16.msra.mxu1 %v5154_v22 }
 0x213   :  { %1397 = vmatprep.subr.bf16.mxu0 %v5159_v23  ;;  %3949 = vmatprep.subr.bf16.mxu1 %v6918_v1  ;;  %v6939_v23 = vld [vmem:[#allocation55_spill] sm:$0xff] }
 0x216   :  { %1398 = vmatpush1.bf16.msra.mxu0 %v5162_v24  ;;  %3950 = vmatpush3.bf16.msra.mxu1 %v5164_v25  ;;  %v6931_v25 = vld [vmem:[#allocation28_spill] sm:$0xff] }
 0x217   :  { %1399 = vmatprep.subr.bf16.mxu0 %v5169_v26  ;;  %3951 = vmatprep.subr.bf16.mxu1 %v6918_v1  ;;  %v6930_v26 = vld [vmem:[#allocation27_spill] sm:$0xff] }
 0x21a   :  { %1400 = vmatpush1.bf16.msra.mxu0 %v5172_v27  ;;  %3952 = vmatpush3.bf16.msra.mxu1 %v5174_v28  ;;  %v6932_v28 = vld [vmem:[#allocation29_spill] sm:$0xff]  ;;  %v6934_v27 = vld [vmem:[#allocation31_spill] sm:$0xff] }
 0x21b   :  { %1401 = vmatprep.subr.bf16.mxu0 %v5179_v29  ;;  %3953 = vmatprep.subr.bf16.mxu1 %v6918_v1  ;;  %v6933_v29 = vld [vmem:[#allocation30_spill] sm:$0xff] }
 0x21e   :  { %1402 = vmatpush1.bf16.msra.mxu0 %v5182_v30  ;;  %3954 = vmatpush3.bf16.msra.mxu1 %v5184_v31  ;;  %v6935_v31 = vld [vmem:[#allocation32_spill] sm:$0xff]  ;;  %v6937_v30 = vld [vmem:[#allocation34_spill] sm:$0xff] }
 0x21f   :  { %1403 = vmatprep.subr.bf16.mxu0 %v6928_v34  ;;  %3955 = vmatprep.subr.bf16.mxu1 %v6918_v1  ;;  %v6936_v34 = vld [vmem:[#allocation33_spill] sm:$0xff] }
 0x222   :  { %1404 = vmatpush1.bf16.msra.mxu0 %v6929_v5  ;;  %3956 = vmatpush3.bf16.msra.mxu1 %v6930_v26 }
 0x223   :  { %1405 = vmatprep.subr.bf16.mxu0 %v6931_v25  ;;  %3957 = vmatprep.subr.bf16.mxu1 %v6918_v1 }
 0x226   :  { %1406 = vmatpush1.bf16.msra.mxu0 %v6932_v28  ;;  %3958 = vmatpush3.bf16.msra.mxu1 %v6933_v29  ;;  %v3473_v29 = vld [vmem:[%s6702_s3 + $0x2] ss:$8 sm:$0x7]  ;;  %v6938_v28 = vld [vmem:[#allocation52_spill] sm:$0xff] }
 0x227   :  { %1407 = vmatprep.subr.bf16.mxu0 %v6934_v27  ;;  %3959 = vmatprep.subr.bf16.mxu1 %v6918_v1  ;;  %v3472_v27 = vld [vmem:[%s6702_s3 + $0x1] ss:$8 sm:$0x7]  ;;  %v598_v22 = vrot.slane %v3473_v29, %v6939_v23 }
 0x22a   :  { %1408 = vmatpush1.bf16.msra.mxu0 %v6935_v31  ;;  %3960 = vmatpush3.bf16.msra.mxu1 %v6936_v34  ;;  %v576_v31 = vrot.slane %v3472_v27, %v6938_v28  ;;  %v594_v34 = vrot.slane %v3473_v29, %v6938_v28 }
 0x22b   :  { %1475 = vmatprep.subr.bf16.mxu0 %v6937_v30  ;;  %3965 = vmatprep.subr.bf16.mxu1 %v6918_v1  ;;  %v580_v30 = vrot.slane %v3472_v27, %v6939_v23 }
 0x22c   :  { %v5479_v21 = vadd.f32 %v594_v34, %v576_v31  ;;  %v5489_v34 = vrot.slane %v3472_v27, %v5281_v32 }
 0x2a0   :  { %v1051_v26 = vpop.f32.mrb[12].mxu1 }
 0x2a1   :  { %v3903_v25 = vpop.f32.mrb[13].mxu1 }
 0x2a2   :  { %v1054_v5 = vpop.f32.mrb[14].mxu1 }
 0x2a3   :  { %v3904_v24 = vpop.f32.mrb[15].mxu1 }
 0x2a4   :  { %v5481_v24 = vadd.f32 %v598_v22, %v580_v30  ;;  %v5486_v22 = vrot.slane %v3473_v29, %v5281_v32 }
 0x2a6   :  { %6940 = vst [vmem:[#allocation52_spill] sm:$0xff] %v5481_v24  ;;  %6941 = vst [vmem:[#allocation55_spill] sm:$0xff] %v5486_v22 }
 0x2c0   :  { %v1219_v25 = vpop.f32.mrb[20].mxu0  ;;  %v1260_v5 = vpop.f32.mrb[16].mxu1 }
 0x2c1   :  { %v4366_v20 = vadd.f32 %v5479_v21, %v1219_v25  ;;  %v1221_v19 = vpop.f32.mrb[21].mxu0  ;;  %v3923_v18 = vpop.f32.mrb[17].mxu1 }
 0x2c2   :  { %v1223_v17 = vpop.f32.mrb[22].mxu0  ;;  %v1263_v16 = vpop.f32.mrb[18].mxu1  ;;  %v4368_v28 = vadd.f32 %v5481_v24, %v1221_v19 }
 0x2c3   :  { %v3554_v11 = vmul.f32 -1.442695, %v4366_v20  ;;  %v1224_v8 = vpop.f32.mrb[23].mxu0  ;;  %v3924_v15 = vpop.f32.mrb[19].mxu1  ;;  %v1261_v16 = vadd.f32 %v1260_v5, %v5486_v22  ;;  %v6943_v22 = vld [vmem:[#allocation36_spill] sm:$0xff] }
 0x2c4   :  { %v3555_v7 = vmul.f32 -1.442695, %v4368_v28  ;;  %v1052_v15 = vadd.f32 %v1051_v26, %v5489_v34 }
 0x2c5   :  { %4595 = vpow2.f32 %v3554_v11 }
 0x2c6   :  { %4597 = vpow2.f32 %v3555_v7 }
 0x2cf   :  { %v4596_v23 = vpop.eup %4595 }
 0x2d0   :  { %v1274_v31 = vadd.f32 1.0, %v4596_v23  ;;  %v4598_v30 = vpop.eup %4597  ;;  %v6942_v23 = vld [vmem:[#allocation35_spill] sm:$0xff] }
 0x2d1   :  { %v1275_v17 = vadd.f32 1.0, %v4598_v30 }
 0x2d2   :  { %4599 = vrcp.f32 %v1274_v31 }
 0x2d3   :  { %4601 = vrcp.f32 %v1275_v17 }
 0x2dc   :  { %v4600_v8 = vpop.eup %4599 }
 0x2dd   :  { %v1280_v11 = vmul.f32 %v4600_v8, %v1261_v16  ;;  %v4602_v8 = vpop.eup %4601 }
 0x2df   :  { %v1281_v18 = vadd.f32 %v1280_v11, %v1052_v15  ;;  %v1283_v15 = vsub.f32 1.0, %v4602_v8 }
 0x2e0   :  { %v1323_v7 = vpop.f32.mrb[24].mxu0  ;;  %v1364_v19 = vpop.f32.mrb[20].mxu1 }
 0x2e1   :  { %4603 = vtanh.f32 %v1281_v18  ;;  %v1324_v20 = vadd.f32 %v1323_v7, %v5274_v47  ;;  %v1325_v29 = vpop.f32.mrb[25].mxu0  ;;  %v3943_v25 = vpop.f32.mrb[21].mxu1  ;;  %v1285_v18 = vmul.f32 0.0, %v4602_v8 }
 0x2e2   :  { %v1326_v28 = vadd.f32 %v1325_v29, %v5277_v6  ;;  %v1327_v27 = vpop.f32.mrb[26].mxu0  ;;  %v1367_v32 = vpop.f32.mrb[22].mxu1 }
 0x2e3   :  { %v1370_v31 = vadd.f32 %v1324_v20, %v6942_v23  ;;  %v1328_v5 = vpop.f32.mrb[27].mxu0  ;;  %v3944_v30 = vpop.f32.mrb[23].mxu1  ;;  %v1365_v20 = vadd.f32 %v1364_v19, %v5284_v10 }
 0x2e4   :  { %v1371_v26 = vadd.f32 %v1326_v28, %v6943_v22  ;;  %v6944_v30 = vld [vmem:[#allocation43_spill] sm:$0xff] }
 0x2e5   :  { %v3562_v17 = vmul.f32 -1.442695, %v1370_v31  ;;  %v846_v31 = vsel %vm615_vm8, %v5291_v62, 0.0  ;;  %v6945_v62 = vld [vmem:[#allocation59_spill] sm:$0xff] }
 0x2e6   :  { %v3563_v16 = vmul.f32 -1.442695, %v1371_v26 }
 0x2e7   :  { %4605 = vpow2.f32 %v3562_v17 }
 0x2e8   :  { %4607 = vpow2.f32 %v3563_v16 }
 0x2eb   :  { %v4604_v11 = vpop.eup %4603 }
 0x2ec   :  { %v1284_v7 = vmul.f32 %v4604_v11, %v1283_v15  ;;  %v6946_v11 = vld [vmem:[#allocation60_spill] sm:$0xff] }
 0x2ee   :  { %v5497_v25 = vadd.f32 %v1285_v18, %v1284_v7  ;;  %v6947_v18 = vld [vmem:[#allocation61_spill] sm:$0xff]  ;;  %v6948_v7 = vld [vmem:[#allocation62_spill] sm:$0xff] }
 0x2f1   :  { %v4606_v29 = vpop.eup %4605 }
 0x2f2   :  { %v4608_v27 = vpop.eup %4607  ;;  %v1378_v32 = vadd.f32 1.0, %v4606_v29  ;;  %v6949_v29 = vld [vmem:[#allocation63_spill] sm:$0xff] }
 0x2f3   :  { %v1379_v6 = vadd.f32 1.0, %v4608_v27  ;;  %v6950_v27 = vld [vmem:[#allocation64_spill] sm:$0xff] }
 0x2f4   :  { %4609 = vrcp.f32 %v1378_v32  ;;  %v6951_v32 = vld [vmem:[#allocation65_spill] sm:$0xff] }
 0x2f5   :  { %4611 = vrcp.f32 %v1379_v6 }
 0x2fe   :  { %v4610_v22 = vpop.eup %4609 }
 0x2ff   :  { %v4612_v28 = vpop.eup %4611  ;;  %v1384_v23 = vmul.f32 %v4610_v22, %v1365_v20  ;;  %v6952_v20 = vld [vmem:[#allocation66_spill] sm:$0xff]  ;;  %v3565_v22 = vpack.c.bf16 %v5497_v25, %v5497_v25 }
 0x300   :  { %v1389_v5 = vmul.f32 %v4612_v28, %v846_v31  ;;  %v1387_v17 = vsub.f32 1.0, %v4612_v28  ;;  %v5550_v28 = vld [vmem:[#allocation2 + $0xc4] ss:$12 sps:$4 sm:$0xff]  }
 0x301   :  { %v1385_v26 = vadd.f32 %v1384_v23, %v6944_v30  ;;  %v6972_v23 = vld [vmem:[#allocation24_spill] sm:$0xff]  ;;  %v6975_v30 = vld [vmem:[#allocation27_spill] sm:$0xff] }
 0x303   :  { %4613 = vtanh.f32 %v1385_v26  ;;  %v6976_v26 = vld [vmem:[#allocation28_spill] sm:$0xff] }
 0x30d   :  { %v4614_v16 = vpop.eup %4613 }
 0x30e   :  { %v1388_v8 = vmul.f32 %v4614_v16, %v1387_v17  ;;  %v6977_v17 = vld [vmem:[#allocation29_spill] sm:$0xff]  ;;  %v6978_v16 = vld [vmem:[#allocation30_spill] sm:$0xff] }
 0x310   :  { %v1390_v15 = vadd.f32 %v1389_v5, %v1388_v8  ;;  %v6974_v5 = vld [vmem:[#allocation26_spill] sm:$0xff]  ;;  %v6979_v8 = vld [vmem:[#allocation31_spill] sm:$0xff] }
 0x312   :  { %v5507_v6 = vsel %vm1288_vm10, %v1390_v15, %v846_v31  ;;  %v6973_v31 = vld [vmem:[#allocation25_spill] sm:$0xff]  ;;  %v6980_v15 = vld [vmem:[#allocation32_spill] sm:$0xff] }
 0x313   :  { %v5511_v19 = vpack.c.bf16 %v5507_v6, %v5507_v6 }
 0x315   :  { %1426 = vmatmul.mubr.bf16.vlgmr.msra.gmra.mrb[28].mxu0 %v5511_v19  ;;  %3962 = vmatmul.mubr.bf16.vlgmr.msra.gmra.mrb[24].mxu1 %v5511_v19 }
 0x316   :  { %1476 = vmatpush1.bf16.msra.mxu0 %v5293_v40  ;;  %3966 = vmatpush3.bf16.msra.mxu1 %v5295_v4 }
 0x317   :  { %1477 = vmatprep.subr.bf16.mxu0 %v5301_v38  ;;  %3967 = vmatprep.subr.bf16.mxu1 %v6918_v1 }
 0x318   :  { %1507 = vmatprep.mubr.bf16.mxu0 %v6919_v42  ;;  %3981 = vmatprep.mubr.msk.bf16.mxu1 %vm4920_vm7, %v6918_v1 }
 0x31a   :  { %1478 = vmatpush1.bf16.msra.mxu0 %v5318_v63  ;;  %3968 = vmatpush3.bf16.msra.mxu1 %v5320_v36 }
 0x31b   :  { %1479 = vmatprep.subr.bf16.mxu0 %v5324_v37  ;;  %3969 = vmatprep.subr.bf16.mxu1 %v6918_v1 }
 0x31e   :  { %1480 = vmatpush1.bf16.msra.mxu0 %v5331_v39  ;;  %3970 = vmatpush3.bf16.msra.mxu1 %v6945_v62 }
 0x31f   :  { %1481 = vmatprep.subr.bf16.mxu0 %v6946_v11  ;;  %3971 = vmatprep.subr.bf16.mxu1 %v6918_v1 }
 0x322   :  { %1482 = vmatpush1.bf16.msra.mxu0 %v6947_v18  ;;  %3972 = vmatpush3.bf16.msra.mxu1 %v6948_v7 }
 0x323   :  { %1483 = vmatprep.subr.bf16.mxu0 %v6949_v29  ;;  %3973 = vmatprep.subr.bf16.mxu1 %v6918_v1 }
 0x326   :  { %1484 = vmatpush1.bf16.msra.mxu0 %v6950_v27  ;;  %3974 = vmatpush3.bf16.msra.mxu1 %v6951_v32 }
 0x327   :  { %1485 = vmatprep.subr.bf16.mxu0 %v6952_v20  ;;  %3975 = vmatprep.subr.bf16.mxu1 %v6918_v1 }
 0x32a   :  { %1486 = vmatpush1.bf16.msra.mxu0 %v5361_v46  ;;  %3976 = vmatpush3.bf16.msra.mxu1 %v5363_v45 }
 0x32b   :  { %1487 = vmatprep.subr.bf16.mxu0 %v5367_v41  ;;  %3977 = vmatprep.subr.bf16.mxu1 %v6918_v1 }
 0x32e   :  { %1488 = vmatpush1.bf16.msra.mxu0 %v5371_v50  ;;  %3978 = vmatpush3.bf16.msra.mxu1 %v5373_v35 }
 0x32f   :  { %1489 = vmatprep.subr.bf16.mxu0 %v5377_v54  ;;  %3979 = vmatprep.subr.bf16.mxu1 %v6918_v1 }
 0x332   :  { %1490 = vmatpush1.bf16.msra.mxu0 %v5381_v56  ;;  %3980 = vmatpush3.bf16.msra.mxu1 %v5383_v51 }
 0x333   :  { %1579 = vmatprep.subr.bf16.mxu0 %v5550_v28  ;;  %3985 = vmatprep.subr.bf16.mxu1 %v6918_v1 }
 0x335   :  { %3566 = vmatmul.mubr.msk.bf16.vlgmr.msra.gmra.mrb[28].mxu0 %vm5306_vm9, %v3565_v22  ;;  %3982 = vmatmul.mubr.msk.bf16.vlgmr.msra.gmra.mrb[28].mxu1 %vm5306_vm9, %v3565_v22  ;;  %v6982_v22 = vld [vmem:[#allocation34_spill] sm:$0xff] }
 0x336   :  { %1580 = vmatpush1.bf16.msra.mxu0 %v5012_v43  ;;  %3986 = vmatpush3.bf16.msra.mxu1 %v5047_v58  ;;  %v6953_v43 = vld [vmem:[#allocation5_spill] sm:$0xff] }
 0x337   :  { %1581 = vmatprep.subr.bf16.mxu0 %v5016_v44  ;;  %3987 = vmatprep.subr.bf16.mxu1 %v6918_v1  ;;  %v6954_v44 = vld [vmem:[#allocation8_spill] sm:$0xff]  ;;  %v6961_v58 = vld [vmem:[#allocation13_spill] sm:$0xff] }
 0x338   :  { %1611 = vmatprep.mubr.bf16.mxu0 %v6919_v42  ;;  %4001 = vmatprep.mubr.msk.bf16.mxu1 %vm4920_vm7, %v6918_v1 }
 0x33a   :  { %1582 = vmatpush1.bf16.msra.mxu0 %v5022_v48  ;;  %3988 = vmatpush3.bf16.msra.mxu1 %v5059_v61  ;;  %v6955_v48 = vld [vmem:[#allocation6_spill] sm:$0xff]  ;;  %v6964_v61 = vld [vmem:[#allocation16_spill] sm:$0xff] }
 0x33b   :  { %1583 = vmatprep.subr.bf16.mxu0 %v5025_v49  ;;  %3989 = vmatprep.subr.bf16.mxu1 %v6918_v1  ;;  %v6956_v49 = vld [vmem:[#allocation7_spill] sm:$0xff] }
 0x33e   :  { %1584 = vmatpush1.bf16.msra.mxu0 %v5028_v52  ;;  %3990 = vmatpush3.bf16.msra.mxu1 %v5071_v3  ;;  %v6957_v52 = vld [vmem:[#allocation9_spill] sm:$0xff]  ;;  %v6967_v3 = vld [vmem:[#allocation19_spill] sm:$0xff] }
 0x33f   :  { %1585 = vmatprep.subr.bf16.mxu0 %v5035_v53  ;;  %3991 = vmatprep.subr.bf16.mxu1 %v6918_v1  ;;  %v6958_v53 = vld [vmem:[#allocation10_spill] sm:$0xff] }
 0x342   :  { %1586 = vmatpush1.bf16.msra.mxu0 %v5040_v55  ;;  %3992 = vmatpush3.bf16.msra.mxu1 %v5092_v9  ;;  %v6959_v55 = vld [vmem:[#allocation11_spill] sm:$0xff]  ;;  %v6968_v9 = vld [vmem:[#allocation20_spill] sm:$0xff] }
 0x343   :  { %1587 = vmatprep.subr.bf16.mxu0 %v5045_v57  ;;  %3993 = vmatprep.subr.bf16.mxu1 %v6918_v1  ;;  %v6960_v57 = vld [vmem:[#allocation12_spill] sm:$0xff] }
 0x346   :  { %1588 = vmatpush1.bf16.msra.mxu0 %v5053_v59  ;;  %3994 = vmatpush3.bf16.msra.mxu1 %v5106_v12  ;;  %v6962_v59 = vld [vmem:[#allocation14_spill] sm:$0xff]  ;;  %v6969_v12 = vld [vmem:[#allocation21_spill] sm:$0xff] }
 0x347   :  { %1589 = vmatprep.subr.bf16.mxu0 %v5056_v60  ;;  %3995 = vmatprep.subr.bf16.mxu1 %v6918_v1  ;;  %v6963_v60 = vld [vmem:[#allocation15_spill] sm:$0xff] }
 0x34a   :  { %1590 = vmatpush1.bf16.msra.mxu0 %v5065_v0  ;;  %3996 = vmatpush3.bf16.msra.mxu1 %v5115_v14  ;;  %v6965_v0 = vld [vmem:[#allocation17_spill] sm:$0xff]  ;;  %v6970_v14 = vld [vmem:[#allocation22_spill] sm:$0xff] }
 0x34b   :  { %1591 = vmatprep.subr.bf16.mxu0 %v5068_v2  ;;  %3997 = vmatprep.subr.bf16.mxu1 %v6918_v1  ;;  %v6966_v2 = vld [vmem:[#allocation18_spill] sm:$0xff] }
 0x34e   :  { %1592 = vmatpush1.bf16.msra.mxu0 %v6953_v43  ;;  %3998 = vmatpush3.bf16.msra.mxu1 %v6954_v44 }
 0x34f   :  { %1593 = vmatprep.subr.bf16.mxu0 %v6955_v48  ;;  %3999 = vmatprep.subr.bf16.mxu1 %v6918_v1 }
 0x352   :  { %1594 = vmatpush1.bf16.msra.mxu0 %v6956_v49  ;;  %4000 = vmatpush3.bf16.msra.mxu1 %v6957_v52 }
 0x353   :  { %1683 = vmatprep.subr.bf16.mxu0 %v6958_v53  ;;  %4005 = vmatprep.subr.bf16.mxu1 %v6918_v1 }
 0x355   :  { %1612 = vmatmul.mubr.bf16.vlgmr.msra.gmra.mrb[32].mxu0 %v5511_v19  ;;  %4002 = vmatmul.mubr.bf16.vlgmr.msra.gmra.mrb[32].mxu1 %v5511_v19  ;;  %v6981_v19 = vld [vmem:[#allocation33_spill] sm:$0xff] }
 0x356   :  { %1684 = vmatpush1.bf16.msra.mxu0 %v6959_v55  ;;  %4006 = vmatpush3.bf16.msra.mxu1 %v6960_v57 }
 0x357   :  { %1685 = vmatprep.subr.bf16.mxu0 %v6961_v58  ;;  %4007 = vmatprep.subr.bf16.mxu1 %v6918_v1 }
 0x358   :  { %1715 = vmatprep.mubr.bf16.mxu0 %v6919_v42  ;;  %4021 = vmatprep.mubr.msk.bf16.mxu1 %vm4920_vm7, %v6918_v1 }
 0x35a   :  { %1686 = vmatpush1.bf16.msra.mxu0 %v6962_v59  ;;  %4008 = vmatpush3.bf16.msra.mxu1 %v6963_v60 }
 0x35b   :  { %1687 = vmatprep.subr.bf16.mxu0 %v6964_v61  ;;  %4009 = vmatprep.subr.bf16.mxu1 %v6918_v1 }
 0x35e   :  { %1688 = vmatpush1.bf16.msra.mxu0 %v6965_v0  ;;  %4010 = vmatpush3.bf16.msra.mxu1 %v6966_v2 }
 0x35f   :  { %1689 = vmatprep.subr.bf16.mxu0 %v6967_v3  ;;  %4011 = vmatprep.subr.bf16.mxu1 %v6918_v1 }
 0x362   :  { %1690 = vmatpush1.bf16.msra.mxu0 %v6968_v9  ;;  %4012 = vmatpush3.bf16.msra.mxu1 %v6969_v12 }
 0x363   :  { %1691 = vmatprep.subr.bf16.mxu0 %v6970_v14  ;;  %4013 = vmatprep.subr.bf16.mxu1 %v6918_v1 }
 0x366   :  { %1692 = vmatpush1.bf16.msra.mxu0 %v6971_v13  ;;  %4014 = vmatpush3.bf16.msra.mxu1 %v6972_v23 }
 0x367   :  { %1693 = vmatprep.subr.bf16.mxu0 %v6973_v31  ;;  %4015 = vmatprep.subr.bf16.mxu1 %v6918_v1  ;;  %v6983_v31 = vld [vmem:[#allocation55_spill] sm:$0xff] }
 0x36a   :  { %1694 = vmatpush1.bf16.msra.mxu0 %v6974_v5  ;;  %4016 = vmatpush3.bf16.msra.mxu1 %v6975_v30 }
 0x36b   :  { %1695 = vmatprep.subr.bf16.mxu0 %v6976_v26  ;;  %4017 = vmatprep.subr.bf16.mxu1 %v6918_v1 }
 0x36e   :  { %1696 = vmatpush1.bf16.msra.mxu0 %v6977_v17  ;;  %4018 = vmatpush3.bf16.msra.mxu1 %v6978_v16 }
 0x36f   :  { %1697 = vmatprep.subr.bf16.mxu0 %v6979_v8  ;;  %4019 = vmatprep.subr.bf16.mxu1 %v6918_v1  ;;  %v1287_v8 = vsel %vm615_vm8, %v5497_v25, 0.0 }
 0x372   :  { %1698 = vmatpush1.bf16.msra.mxu0 %v6980_v15  ;;  %4020 = vmatpush3.bf16.msra.mxu1 %v6981_v19 }
 0x373   :  { %1765 = vmatprep.subr.bf16.mxu0 %v6982_v22  ;;  %4025 = vmatprep.subr.bf16.mxu1 %v6918_v1 }
 0x3e8   :  { %v1468_v43 = vpop.f32.mrb[24].mxu1 }
 0x3e9   :  { %v3963_v44 = vpop.f32.mrb[25].mxu1  ;;  %v1469_v17 = vadd.f32 %v1468_v43, %v5489_v34 }
 0x3ea   :  { %v1471_v48 = vpop.f32.mrb[26].mxu1 }
 0x3eb   :  { %v3964_v49 = vpop.f32.mrb[27].mxu1 }
 0x408   :  { %v1509_v52 = vpop.f32.mrb[28].mxu0  ;;  %v1550_v53 = vpop.f32.mrb[28].mxu1 }
 0x409   :  { %v4370_v55 = vadd.f32 %v5479_v21, %v1509_v52  ;;  %v1511_v57 = vpop.f32.mrb[29].mxu0  ;;  %v3983_v58 = vpop.f32.mrb[29].mxu1  ;;  %v1551_v5 = vadd.f32 %v1550_v53, %v6983_v31 }
 0x40a   :  { %v4372_v59 = vadd.f32 %v5481_v24, %v1511_v57  ;;  %v1513_v60 = vpop.f32.mrb[30].mxu0  ;;  %v1553_v61 = vpop.f32.mrb[30].mxu1 }
 0x40b   :  { %v3570_v0 = vmul.f32 -1.442695, %v4370_v55  ;;  %v1514_v2 = vpop.f32.mrb[31].mxu0  ;;  %v3984_v3 = vpop.f32.mrb[31].mxu1  ;;  %v6984_v55 = vld [vmem:[#allocation58_spill] sm:$0xff] }
 0x40c   :  { %v3571_v9 = vmul.f32 -1.442695, %v4372_v59  ;;  %v6985_v59 = vld [vmem:[#allocation37_spill] sm:$0xff] }
 0x40d   :  { %4615 = vpow2.f32 %v3570_v0  ;;  %v6986_v0 = vld [vmem:[#allocation39_spill] sm:$0xff] }
 0x40e   :  { %4617 = vpow2.f32 %v3571_v9 }
 0x417   :  { %v4616_v12 = vpop.eup %4615 }
 0x418   :  { %v4618_v14 = vpop.eup %4617  ;;  %v1564_v13 = vadd.f32 1.0, %v4616_v12 }
 0x419   :  { %v1565_v23 = vadd.f32 1.0, %v4618_v14 }
 0x41a   :  { %4619 = vrcp.f32 %v1564_v13 }
 0x41b   :  { %4621 = vrcp.f32 %v1565_v23 }
 0x424   :  { %v4620_v30 = vpop.eup %4619 }
 0x425   :  { %v4622_v26 = vpop.eup %4621  ;;  %v1570_v16 = vmul.f32 %v4620_v30, %v1551_v5 }
 0x426   :  { %v1575_v15 = vmul.f32 %v4622_v26, %v1287_v8  ;;  %v1573_v3 = vsub.f32 1.0, %v4622_v26  ;;  %v6987_v26 = vld [vmem:[#allocation38_spill] sm:$0xff] }
 0x427   :  { %v1571_v19 = vadd.f32 %v1570_v16, %v1469_v17 }
 0x428   :  { %v1613_v22 = vpop.f32.mrb[32].mxu0  ;;  %v1654_v44 = vpop.f32.mrb[32].mxu1 }
 0x429   :  { %4623 = vtanh.f32 %v1571_v19  ;;  %v1614_v48 = vadd.f32 %v1613_v22, %v5274_v47  ;;  %v1615_v49 = vpop.f32.mrb[33].mxu0  ;;  %v4003_v52 = vpop.f32.mrb[33].mxu1  ;;  %v1655_v19 = vadd.f32 %v1654_v44, %v5284_v10 }
 0x42a   :  { %v1616_v53 = vadd.f32 %v1615_v49, %v6984_v55  ;;  %v1617_v57 = vpop.f32.mrb[34].mxu0  ;;  %v1657_v58 = vpop.f32.mrb[34].mxu1 }
 0x42b   :  { %v1660_v43 = vadd.f32 %v1614_v48, %v6985_v59  ;;  %v1618_v60 = vpop.f32.mrb[35].mxu0  ;;  %v4004_v61 = vpop.f32.mrb[35].mxu1 }
 0x42c   :  { %v1661_v2 = vadd.f32 %v1616_v53, %v6986_v0  ;;  %v5782_v60 = vld [vmem:[#allocation2 + $0x180] ss:$12 sps:$4 sm:$0xff]   ;;  %v5785_v61 = vld [vmem:[#allocation2 + $0x188] ss:$12 sps:$4 sm:$0xff]  }
 0x42d   :  { %v3572_v25 = vmul.f32 -1.442695, %v1660_v43  ;;  %v5776_v43 = vld [vmem:[#allocation2 + $0x184] ss:$12 sps:$4 sm:$0xff]   ;;  %6994 = vst [vmem:[#allocation62_spill] sm:$0xff] %v5782_v60  ;;  %6995 = vst [vmem:[#allocation63_spill] sm:$0xff] %v5785_v61 }
 0x42e   :  { %v3573_v9 = vmul.f32 -1.442695, %v1661_v2  ;;  %6993 = vst [vmem:[#allocation61_spill] sm:$0xff] %v5776_v43  ;;  %v5788_v0 = vld [vmem:[#allocation2 + $0x19c] ss:$12 sps:$4 sm:$0xff]  }
 0x42f   :  { %4625 = vpow2.f32 %v3572_v25  ;;  %6996 = vst [vmem:[#allocation64_spill] sm:$0xff] %v5788_v0  ;;  %v5795_v2 = vld [vmem:[#allocation2 + $0x198] ss:$12 sps:$4 sm:$0xff]   ;;  %v5798_v25 = vld [vmem:[#allocation2 + $0x1a0] ss:$12 sps:$4 sm:$0xff]  }
 0x430   :  { %4627 = vpow2.f32 %v3573_v9  ;;  %6997 = vst [vmem:[#allocation65_spill] sm:$0xff] %v5795_v2  ;;  %6998 = vst [vmem:[#allocation66_spill] sm:$0xff] %v5798_v25  ;;  %v5805_v9 = vld [vmem:[#allocation2 + $0x1b0] ss:$12 sps:$4 sm:$0xff]  }
 0x431   :  { %7000 = vst [vmem:[#allocation8_spill] sm:$0xff] %v5805_v9 }
 0x433   :  { %v4624_v12 = vpop.eup %4623 }
 0x434   :  { %v1574_v14 = vmul.f32 %v4624_v12, %v1573_v3  ;;  %v5801_v3 = vld [vmem:[#allocation2 + $0x1b4] ss:$12 sps:$4 sm:$0xff]   ;;  %v5808_v12 = vld [vmem:[#allocation2 + $0x1b8] ss:$12 sps:$4 sm:$0xff]  }
 0x435   :  { %6999 = vst [vmem:[#allocation5_spill] sm:$0xff] %v5801_v3  ;;  %7001 = vst [vmem:[#allocation6_spill] sm:$0xff] %v5808_v12 }
 0x436   :  { %v1576_v13 = vadd.f32 %v1575_v15, %v1574_v14  ;;  %v5811_v14 = vld [vmem:[#allocation2 + $0x1cc] ss:$12 sps:$4 sm:$0xff]  }
 0x437   :  { %7002 = vst [vmem:[#allocation7_spill] sm:$0xff] %v5811_v14 }
 0x438   :  { %v5643_v23 = vsel %vm1288_vm10, %v1576_v13, %v1287_v8  ;;  %v5815_v13 = vld [vmem:[#allocation2 + $0x1c8] ss:$12 sps:$4 sm:$0xff]  }
 0x439   :  { %v4626_v5 = vpop.eup %4625  ;;  %7003 = vst [vmem:[#allocation9_spill] sm:$0xff] %v5815_v13 }
 0x43a   :  { %v1668_v30 = vadd.f32 1.0, %v4626_v5  ;;  %v4628_v17 = vpop.eup %4627  ;;  %v5818_v5 = vld [vmem:[#allocation2 + $0x1d0] ss:$12 sps:$4 sm:$0xff]  }
 0x43b   :  { %v1669_v16 = vadd.f32 1.0, %v4628_v17  ;;  %7004 = vst [vmem:[#allocation10_spill] sm:$0xff] %v5818_v5  ;;  %v5825_v17 = vld [vmem:[#allocation2 + $0x1e0] ss:$12 sps:$4 sm:$0xff]  }
 0x43c   :  { %4629 = vrcp.f32 %v1668_v30  ;;  %v5821_v30 = vld [vmem:[#allocation2 + $0x1e4] ss:$12 sps:$4 sm:$0xff]   ;;  %7006 = vst [vmem:[#allocation12_spill] sm:$0xff] %v5825_v17 }
 0x43d   :  { %4631 = vrcp.f32 %v1669_v16  ;;  %7005 = vst [vmem:[#allocation11_spill] sm:$0xff] %v5821_v30  ;;  %v5828_v16 = vld [vmem:[#allocation2 + $0x1e8] ss:$12 sps:$4 sm:$0xff]  }
 0x43e   :  { %7007 = vst [vmem:[#allocation13_spill] sm:$0xff] %v5828_v16 }
 0x446   :  { %v4630_v22 = vpop.eup %4629 }
 0x447   :  { %v1674_v48 = vmul.f32 %v4630_v22, %v1655_v19  ;;  %v4632_v52 = vpop.eup %4631  ;;  %v5831_v19 = vld [vmem:[#allocation2 + $0x1fc] ss:$12 sps:$4 sm:$0xff]   ;;  %v5835_v22 = vld [vmem:[#allocation2 + $0x1f8] ss:$12 sps:$4 sm:$0xff]  }
 0x448   :  { %v1677_v53 = vsub.f32 1.0, %v4632_v52  ;;  %v1679_v8 = vmul.f32 %v4632_v52, %v5507_v6  ;;  %7008 = vst [vmem:[#allocation14_spill] sm:$0xff] %v5831_v19  ;;  %7009 = vst [vmem:[#allocation15_spill] sm:$0xff] %v5835_v22  ;;  %v5848_v52 = vld [vmem:[#allocation2 + $0x218] ss:$12 sps:$4 sm:$0xff]  }
 0x449   :  { %v1675_v49 = vadd.f32 %v6987_v26, %v1674_v48  ;;  %v5838_v48 = vld [vmem:[#allocation2 + $0x200] ss:$12 sps:$4 sm:$0xff]   ;;  %7013 = vst [vmem:[#allocation19_spill] sm:$0xff] %v5848_v52 }
 0x44a   :  { %7010 = vst [vmem:[#allocation16_spill] sm:$0xff] %v5838_v48  ;;  %v5841_v26 = vld [vmem:[#allocation2 + $0x214] ss:$12 sps:$4 sm:$0xff]  }
 0x44b   :  { %4633 = vtanh.f32 %v1675_v49  ;;  %7011 = vst [vmem:[#allocation17_spill] sm:$0xff] %v5841_v26  ;;  %v5845_v49 = vld [vmem:[#allocation2 + $0x210] ss:$12 sps:$4 sm:$0xff]  }
 0x44c   :  { %7012 = vst [vmem:[#allocation18_spill] sm:$0xff] %v5845_v49 }
 0x455   :  { %v4634_v15 = vpop.eup %4633 }
 0x456   :  { %v1678_v57 = vmul.f32 %v4634_v15, %v1677_v53  ;;  %v5851_v53 = vld [vmem:[#allocation2 + $0x22c] ss:$12 sps:$4 sm:$0xff]   ;;  %v5855_v15 = vld [vmem:[#allocation2 + $0x228] ss:$12 sps:$4 sm:$0xff]  }
 0x457   :  { %7014 = vst [vmem:[#allocation20_spill] sm:$0xff] %v5851_v53  ;;  %7015 = vst [vmem:[#allocation21_spill] sm:$0xff] %v5855_v15 }
 0x458   :  { %v1680_v58 = vadd.f32 %v1679_v8, %v1678_v57  ;;  %v5858_v57 = vld [vmem:[#allocation2 + $0x230] ss:$12 sps:$4 sm:$0xff]  }
 0x459   :  { %7016 = vst [vmem:[#allocation22_spill] sm:$0xff] %v5858_v57  ;;  %v5861_v8 = vld [vmem:[#allocation2 + $0x244] ss:$12 sps:$4 sm:$0xff]  }
 0x45a   :  { %v5652_v59 = vsel %vm1578_vm11, %v1680_v58, %v5507_v6  ;;  %v5746_v6 = vld [vmem:[#allocation2 + $0x13c] ss:$12 sps:$4 sm:$0xff]   ;;  %7017 = vst [vmem:[#allocation23_spill] sm:$0xff] %v5861_v8 }
 0x45b   :  { %v5656_v44 = vpack.c.bf16 %v5652_v59, %v5652_v59 }
 0x45d   :  { %1716 = vmatmul.mubr.bf16.vlgmr.msra.gmra.mrb[36].mxu0 %v5656_v44  ;;  %4022 = vmatmul.mubr.bf16.vlgmr.msra.gmra.mrb[36].mxu1 %v5656_v44 }
 0x45e   :  { %1766 = vmatpush1.bf16.msra.mxu0 %v5293_v40  ;;  %4026 = vmatpush3.bf16.msra.mxu1 %v5295_v4  ;;  %v1764_v40 = vpack.c.bf16 %v5643_v23, %v5643_v23  ;;  %v5697_v4 = vld [vmem:[#allocation2 + $0xc0] ss:$12 sps:$4 sm:$0xff]  }
 0x45f   :  { %1767 = vmatprep.subr.bf16.mxu0 %v5301_v38  ;;  %4027 = vmatprep.subr.bf16.mxu1 %v6918_v1  ;;  %v5700_v38 = vld [vmem:[#allocation2 + $0xc8] ss:$12 sps:$4 sm:$0xff]  }
 0x460   :  { %1797 = vmatprep.mubr.bf16.mxu0 %v6919_v42  ;;  %4041 = vmatprep.mubr.msk.bf16.mxu1 %vm4920_vm7, %v6918_v1 }
 0x462   :  { %1768 = vmatpush1.bf16.msra.mxu0 %v5318_v63  ;;  %4028 = vmatpush3.bf16.msra.mxu1 %v5320_v36  ;;  %v5703_v63 = vld [vmem:[#allocation2 + $0xdc] ss:$12 sps:$4 sm:$0xff]   ;;  %v5710_v36 = vld [vmem:[#allocation2 + $0xd8] ss:$12 sps:$4 sm:$0xff]  }
 0x463   :  { %1769 = vmatprep.subr.bf16.mxu0 %v5324_v37  ;;  %4029 = vmatprep.subr.bf16.mxu1 %v6918_v1  ;;  %v5713_v37 = vld [vmem:[#allocation2 + $0xe0] ss:$12 sps:$4 sm:$0xff]  }
 0x466   :  { %1770 = vmatpush1.bf16.msra.mxu0 %v5331_v39  ;;  %4030 = vmatpush3.bf16.msra.mxu1 %v6945_v62  ;;  %v5716_v39 = vld [vmem:[#allocation2 + $0xf4] ss:$12 sps:$4 sm:$0xff]   ;;  %v5750_v62 = vld [vmem:[#allocation2 + $0x138] ss:$12 sps:$4 sm:$0xff]  }
 0x467   :  { %1771 = vmatprep.subr.bf16.mxu0 %v6946_v11  ;;  %4031 = vmatprep.subr.bf16.mxu1 %v6918_v1  ;;  %v5753_v11 = vld [vmem:[#allocation2 + $0x140] ss:$12 sps:$4 sm:$0xff]  }
 0x46a   :  { %1772 = vmatpush1.bf16.msra.mxu0 %v6947_v18  ;;  %4032 = vmatpush3.bf16.msra.mxu1 %v6948_v7  ;;  %v5756_v18 = vld [vmem:[#allocation2 + $0x154] ss:$12 sps:$4 sm:$0xff]   ;;  %v5760_v7 = vld [vmem:[#allocation2 + $0x150] ss:$12 sps:$4 sm:$0xff]  }
 0x46b   :  { %1773 = vmatprep.subr.bf16.mxu0 %v6949_v29  ;;  %4033 = vmatprep.subr.bf16.mxu1 %v6918_v1  ;;  %6988 = vst [vmem:[#allocation35_spill] sm:$0xff] %v5760_v7  ;;  %v5763_v29 = vld [vmem:[#allocation2 + $0x158] ss:$12 sps:$4 sm:$0xff]  }
 0x46c   :  { %6989 = vst [vmem:[#allocation36_spill] sm:$0xff] %v5763_v29 }
 0x46e   :  { %1774 = vmatpush1.bf16.msra.mxu0 %v6950_v27  ;;  %4034 = vmatpush3.bf16.msra.mxu1 %v6951_v32  ;;  %v5766_v27 = vld [vmem:[#allocation2 + $0x16c] ss:$12 sps:$4 sm:$0xff]   ;;  %v5770_v32 = vld [vmem:[#allocation2 + $0x168] ss:$12 sps:$4 sm:$0xff]  }
 0x46f   :  { %1775 = vmatprep.subr.bf16.mxu0 %v6952_v20  ;;  %4035 = vmatprep.subr.bf16.mxu1 %v6918_v1  ;;  %6990 = vst [vmem:[#allocation43_spill] sm:$0xff] %v5766_v27  ;;  %6991 = vst [vmem:[#allocation59_spill] sm:$0xff] %v5770_v32  ;;  %v5773_v20 = vld [vmem:[#allocation2 + $0x170] ss:$12 sps:$4 sm:$0xff]  }
 0x470   :  { %6992 = vst [vmem:[#allocation60_spill] sm:$0xff] %v5773_v20 }
 0x472   :  { %1776 = vmatpush1.bf16.msra.mxu0 %v5361_v46  ;;  %4036 = vmatpush3.bf16.msra.mxu1 %v5363_v45  ;;  %v5720_v45 = vld [vmem:[#allocation2 + $0xf0] ss:$12 sps:$4 sm:$0xff]   ;;  %v5723_v46 = vld [vmem:[#allocation2 + $0xf8] ss:$12 sps:$4 sm:$0xff]  }
 0x473   :  { %1777 = vmatprep.subr.bf16.mxu0 %v5367_v41  ;;  %4037 = vmatprep.subr.bf16.mxu1 %v6918_v1  ;;  %v5730_v41 = vld [vmem:[#allocation2 + $0x108] ss:$12 sps:$4 sm:$0xff]  }
 0x476   :  { %1778 = vmatpush1.bf16.msra.mxu0 %v5371_v50  ;;  %4038 = vmatpush3.bf16.msra.mxu1 %v5373_v35  ;;  %v5726_v35 = vld [vmem:[#allocation2 + $0x10c] ss:$12 sps:$4 sm:$0xff]   ;;  %v5733_v50 = vld [vmem:[#allocation2 + $0x110] ss:$12 sps:$4 sm:$0xff]  }
 0x477   :  { %1779 = vmatprep.subr.bf16.mxu0 %v5377_v54  ;;  %4039 = vmatprep.subr.bf16.mxu1 %v6918_v1  ;;  %v5740_v54 = vld [vmem:[#allocation2 + $0x120] ss:$12 sps:$4 sm:$0xff]  }
 0x47a   :  { %1780 = vmatpush1.bf16.msra.mxu0 %v5381_v56  ;;  %4040 = vmatpush3.bf16.msra.mxu1 %v5383_v51  ;;  %v5736_v51 = vld [vmem:[#allocation2 + $0x124] ss:$12 sps:$4 sm:$0xff]   ;;  %v5743_v56 = vld [vmem:[#allocation2 + $0x128] ss:$12 sps:$4 sm:$0xff]  }
 0x47b   :  { %1869 = vmatprep.subr.bf16.mxu0 %v5550_v28  ;;  %4045 = vmatprep.subr.bf16.mxu1 %v6918_v1 }
 0x47d   :  { %1798 = vmatmul.mubr.bf16.vlgmr.msra.gmra.mrb[36].mxu0 %v1764_v40  ;;  %4042 = vmatmul.mubr.bf16.vlgmr.msra.gmra.mrb[40].mxu1 %v1764_v40 }
 0x47e   :  { %1870 = vmatpush1.bf16.msra.mxu0 %v5697_v4  ;;  %4046 = vmatpush3.bf16.msra.mxu1 %v5700_v38 }
 0x47f   :  { %1871 = vmatprep.subr.bf16.mxu0 %v5703_v63  ;;  %4047 = vmatprep.subr.bf16.mxu1 %v6918_v1 }
 0x480   :  { %1901 = vmatprep.mubr.bf16.mxu0 %v6919_v42  ;;  %4061 = vmatprep.mubr.msk.bf16.mxu1 %vm4920_vm7, %v6918_v1 }
 0x482   :  { %1872 = vmatpush1.bf16.msra.mxu0 %v5710_v36  ;;  %4048 = vmatpush3.bf16.msra.mxu1 %v5713_v37 }
 0x483   :  { %1873 = vmatprep.subr.bf16.mxu0 %v5716_v39  ;;  %4049 = vmatprep.subr.bf16.mxu1 %v6918_v1 }
 0x486   :  { %1874 = vmatpush1.bf16.msra.mxu0 %v5720_v45  ;;  %4050 = vmatpush3.bf16.msra.mxu1 %v5723_v46 }
 0x487   :  { %1875 = vmatprep.subr.bf16.mxu0 %v5726_v35  ;;  %4051 = vmatprep.subr.bf16.mxu1 %v6918_v1 }
 0x48a   :  { %1876 = vmatpush1.bf16.msra.mxu0 %v5730_v41  ;;  %4052 = vmatpush3.bf16.msra.mxu1 %v5733_v50 }
 0x48b   :  { %1877 = vmatprep.subr.bf16.mxu0 %v5736_v51  ;;  %4053 = vmatprep.subr.bf16.mxu1 %v6918_v1 }
 0x48e   :  { %1878 = vmatpush1.bf16.msra.mxu0 %v5740_v54  ;;  %4054 = vmatpush3.bf16.msra.mxu1 %v5743_v56 }
 0x48f   :  { %1879 = vmatprep.subr.bf16.mxu0 %v5746_v6  ;;  %4055 = vmatprep.subr.bf16.mxu1 %v6918_v1 }
 0x492   :  { %1880 = vmatpush1.bf16.msra.mxu0 %v5750_v62  ;;  %4056 = vmatpush3.bf16.msra.mxu1 %v5753_v11 }
 0x493   :  { %1881 = vmatprep.subr.bf16.mxu0 %v5756_v18  ;;  %4057 = vmatprep.subr.bf16.mxu1 %v6918_v1 }
 0x496   :  { %1882 = vmatpush1.bf16.msra.mxu0 %v5760_v7  ;;  %4058 = vmatpush3.bf16.msra.mxu1 %v5763_v29 }
 0x497   :  { %1883 = vmatprep.subr.bf16.mxu0 %v5766_v27  ;;  %4059 = vmatprep.subr.bf16.mxu1 %v6918_v1 }
 0x49a   :  { %1884 = vmatpush1.bf16.msra.mxu0 %v5770_v32  ;;  %4060 = vmatpush3.bf16.msra.mxu1 %v5773_v20 }
 0x49b   :  { %1973 = vmatprep.subr.bf16.mxu0 %v5776_v43  ;;  %4065 = vmatprep.subr.bf16.mxu1 %v6918_v1 }
 0x49d   :  { %1902 = vmatmul.mubr.bf16.vlgmr.msra.gmra.mrb[40].mxu0 %v5656_v44  ;;  %4062 = vmatmul.mubr.bf16.vlgmr.msra.gmra.mrb[44].mxu1 %v5656_v44 }
 0x49e   :  { %1974 = vmatpush1.bf16.msra.mxu0 %v5782_v60  ;;  %4066 = vmatpush3.bf16.msra.mxu1 %v5785_v61 }
 0x49f   :  { %1975 = vmatprep.subr.bf16.mxu0 %v5788_v0  ;;  %4067 = vmatprep.subr.bf16.mxu1 %v6918_v1 }
 0x4a0   :  { %2005 = vmatprep.mubr.bf16.mxu0 %v6919_v42  ;;  %4081 = vmatprep.mubr.msk.bf16.mxu1 %vm4920_vm7, %v6918_v1 }
 0x4a2   :  { %1976 = vmatpush1.bf16.msra.mxu0 %v5795_v2  ;;  %4068 = vmatpush3.bf16.msra.mxu1 %v5798_v25 }
 0x4a3   :  { %1977 = vmatprep.subr.bf16.mxu0 %v5801_v3  ;;  %4069 = vmatprep.subr.bf16.mxu1 %v6918_v1 }
 0x4a6   :  { %1978 = vmatpush1.bf16.msra.mxu0 %v5805_v9  ;;  %4070 = vmatpush3.bf16.msra.mxu1 %v5808_v12 }
 0x4a7   :  { %1979 = vmatprep.subr.bf16.mxu0 %v5811_v14  ;;  %4071 = vmatprep.subr.bf16.mxu1 %v6918_v1 }
 0x4aa   :  { %1980 = vmatpush1.bf16.msra.mxu0 %v5815_v13  ;;  %4072 = vmatpush3.bf16.msra.mxu1 %v5818_v5 }
 0x4ab   :  { %1981 = vmatprep.subr.bf16.mxu0 %v5821_v30  ;;  %4073 = vmatprep.subr.bf16.mxu1 %v6918_v1 }
 0x4ae   :  { %1982 = vmatpush1.bf16.msra.mxu0 %v5825_v17  ;;  %4074 = vmatpush3.bf16.msra.mxu1 %v5828_v16 }
 0x4af   :  { %1983 = vmatprep.subr.bf16.mxu0 %v5831_v19  ;;  %4075 = vmatprep.subr.bf16.mxu1 %v6918_v1 }
 0x4b2   :  { %1984 = vmatpush1.bf16.msra.mxu0 %v5835_v22  ;;  %4076 = vmatpush3.bf16.msra.mxu1 %v5838_v48 }
 0x4b3   :  { %1985 = vmatprep.subr.bf16.mxu0 %v5841_v26  ;;  %4077 = vmatprep.subr.bf16.mxu1 %v6918_v1 }
 0x4b6   :  { %1986 = vmatpush1.bf16.msra.mxu0 %v5845_v49  ;;  %4078 = vmatpush3.bf16.msra.mxu1 %v5848_v52 }
 0x4b7   :  { %1987 = vmatprep.subr.bf16.mxu0 %v5851_v53  ;;  %4079 = vmatprep.subr.bf16.mxu1 %v6918_v1 }
 0x4ba   :  { %1988 = vmatpush1.bf16.msra.mxu0 %v5855_v15  ;;  %4080 = vmatpush3.bf16.msra.mxu1 %v5858_v57 }
 0x4bb   :  { %2055 = vmatprep.subr.bf16.mxu0 %v5861_v8  ;;  %4085 = vmatprep.subr.bf16.mxu1 %v6918_v1 }
 0x530   :  { %v1758_v58 = vpop.f32.mrb[36].mxu1 }
 0x531   :  { %v4023_v44 = vpop.f32.mrb[37].mxu1 }
 0x532   :  { %v1761_v40 = vpop.f32.mrb[38].mxu1 }
 0x533   :  { %v4024_v53 = vpop.f32.mrb[39].mxu1 }
 0x550   :  { %v1799_v52 = vpop.f32.mrb[36].mxu0  ;;  %v1840_v49 = vpop.f32.mrb[40].mxu1 }
 0x551   :  { %v4374_v26 = vadd.f32 %v5479_v21, %v1799_v52  ;;  %v1801_v48 = vpop.f32.mrb[37].mxu0  ;;  %v4043_v15 = vpop.f32.mrb[41].mxu1  ;;  %v1841_v13 = vadd.f32 %v1840_v49, %v6983_v31 }
 0x552   :  { %v1803_v22 = vpop.f32.mrb[38].mxu0  ;;  %v1843_v19 = vpop.f32.mrb[42].mxu1  ;;  %v4376_v30 = vadd.f32 %v5481_v24, %v1801_v48  ;;  %v1759_v15 = vadd.f32 %v1758_v58, %v5489_v34  ;;  %v7019_v24 = vld [vmem:[#allocation42_spill] sm:$0xff] }
 0x553   :  { %v3574_v16 = vmul.f32 -1.442695, %v4374_v26  ;;  %v1804_v57 = vpop.f32.mrb[39].mxu0  ;;  %v4044_v17 = vpop.f32.mrb[43].mxu1 }
 0x554   :  { %v3575_v8 = vmul.f32 -1.442695, %v4376_v30 }
 0x555   :  { %4635 = vpow2.f32 %v3574_v16 }
 0x556   :  { %4637 = vpow2.f32 %v3575_v8 }
 0x55f   :  { %v4636_v5 = vpop.eup %4635 }
 0x560   :  { %v1854_v44 = vadd.f32 1.0, %v4636_v5  ;;  %v4638_v53 = vpop.eup %4637 }
 0x561   :  { %v1855_v40 = vadd.f32 1.0, %v4638_v53 }
 0x562   :  { %4639 = vrcp.f32 %v1854_v44  ;;  %v7018_v44 = vld [vmem:[#allocation40_spill] sm:$0xff] }
 0x563   :  { %4641 = vrcp.f32 %v1855_v40 }
 0x56c   :  { %v4640_v52 = vpop.eup %4639 }
 0x56d   :  { %v1860_v22 = vmul.f32 %v4640_v52, %v1841_v13  ;;  %v4642_v40 = vpop.eup %4641 }
 0x56e   :  { %v1863_v52 = vsub.f32 1.0, %v4642_v40 }
 0x56f   :  { %v1861_v19 = vadd.f32 %v1860_v22, %v1759_v15 }
 0x570   :  { %v1903_v26 = vpop.f32.mrb[40].mxu0  ;;  %v1944_v17 = vpop.f32.mrb[44].mxu1 }
 0x571   :  { %4643 = vtanh.f32 %v1861_v19  ;;  %v1904_v16 = vadd.f32 %v1903_v26, %v5274_v47  ;;  %v1905_v30 = vpop.f32.mrb[41].mxu0  ;;  %v4063_v48 = vpop.f32.mrb[45].mxu1  ;;  %v1865_v19 = vmul.f32 %v4642_v40, %v5643_v23 }
 0x572   :  { %v1906_v5 = vadd.f32 %v1905_v30, %v6984_v55  ;;  %v1907_v57 = vpop.f32.mrb[42].mxu0  ;;  %v1947_v8 = vpop.f32.mrb[46].mxu1 }
 0x573   :  { %v1950_v53 = vadd.f32 %v1904_v16, %v7018_v44  ;;  %v1908_v49 = vpop.f32.mrb[43].mxu0  ;;  %v4064_v31 = vpop.f32.mrb[47].mxu1  ;;  %v7020_v44 = vld [vmem:[#allocation41_spill] sm:$0xff] }
 0x574   :  { %v1951_v58 = vadd.f32 %v1906_v5, %v7019_v24  ;;  %v1945_v31 = vadd.f32 %v1944_v17, %v5284_v10 }
 0x575   :  { %v3576_v13 = vmul.f32 -1.442695, %v1950_v53 }
 0x576   :  { %v3577_v15 = vmul.f32 -1.442695, %v1951_v58 }
 0x577   :  { %4645 = vpow2.f32 %v3576_v13 }
 0x578   :  { %4647 = vpow2.f32 %v3577_v15 }
 0x57b   :  { %v4644_v22 = vpop.eup %4643 }
 0x57c   :  { %v1864_v26 = vmul.f32 %v4644_v22, %v1863_v52 }
 0x57e   :  { %v5874_v48 = vadd.f32 %v1865_v19, %v1864_v26  ;;  %v5891_v19 = vld [vmem:[#allocation2 + $0x240] ss:$12 sps:$4 sm:$0xff]   ;;  %v5894_v26 = vld [vmem:[#allocation2 + $0x248] ss:$12 sps:$4 sm:$0xff]  }
 0x581   :  { %v4646_v30 = vpop.eup %4645 }
 0x582   :  { %v1958_v57 = vadd.f32 1.0, %v4646_v30  ;;  %v4648_v16 = vpop.eup %4647  ;;  %v5897_v30 = vld [vmem:[#allocation2 + $0x25c] ss:$12 sps:$4 sm:$0xff]  }
 0x583   :  { %v1959_v8 = vadd.f32 1.0, %v4648_v16  ;;  %v5910_v16 = vld [vmem:[#allocation2 + $0x274] ss:$12 sps:$4 sm:$0xff]  }
 0x584   :  { %4649 = vrcp.f32 %v1958_v57  ;;  %v5907_v57 = vld [vmem:[#allocation2 + $0x260] ss:$12 sps:$4 sm:$0xff]  }
 0x585   :  { %4651 = vrcp.f32 %v1959_v8  ;;  %v5914_v8 = vld [vmem:[#allocation2 + $0x270] ss:$12 sps:$4 sm:$0xff]  }
 0x58e   :  { %v4650_v24 = vpop.eup %4649 }
 0x58f   :  { %v1964_v5 = vmul.f32 %v4650_v24, %v1945_v31  ;;  %v4652_v49 = vpop.eup %4651  ;;  %v5917_v31 = vld [vmem:[#allocation2 + $0x278] ss:$12 sps:$4 sm:$0xff]  }
 0x590   :  { %v1967_v58 = vsub.f32 1.0, %v4652_v49  ;;  %v1969_v52 = vmul.f32 %v4652_v49, %v5652_v59  ;;  %v5920_v24 = vld [vmem:[#allocation2 + $0x28c] ss:$12 sps:$4 sm:$0xff]  }
 0x591   :  { %v1965_v53 = vadd.f32 %v7020_v44, %v1964_v5  ;;  %v5924_v5 = vld [vmem:[#allocation2 + $0x288] ss:$12 sps:$4 sm:$0xff]   ;;  %v5927_v44 = vld [vmem:[#allocation2 + $0x290] ss:$12 sps:$4 sm:$0xff]   ;;  %v5934_v49 = vld [vmem:[#allocation2 + $0x2a0] ss:$12 sps:$4 sm:$0xff]  }
 0x592   :  { %7021 = vst [vmem:[#allocation24_spill] sm:$0xff] %v5934_v49 }
 0x593   :  { %4653 = vtanh.f32 %v1965_v53  ;;  %v5930_v53 = vld [vmem:[#allocation2 + $0x2a4] ss:$12 sps:$4 sm:$0xff]  }
 0x59d   :  { %v4654_v13 = vpop.eup %4653 }
 0x59e   :  { %v1968_v40 = vmul.f32 %v4654_v13, %v1967_v58  ;;  %v5937_v58 = vld [vmem:[#allocation2 + $0x2a8] ss:$12 sps:$4 sm:$0xff]  }
 0x59f   :  { %7022 = vst [vmem:[#allocation25_spill] sm:$0xff] %v5937_v58  ;;  %v5940_v13 = vld [vmem:[#allocation2 + $0x2bc] ss:$12 sps:$4 sm:$0xff]  }
 0x5a0   :  { %v1970_v15 = vadd.f32 %v1969_v52, %v1968_v40  ;;  %7023 = vst [vmem:[#allocation26_spill] sm:$0xff] %v5940_v13  ;;  %v5944_v40 = vld [vmem:[#allocation2 + $0x2b8] ss:$12 sps:$4 sm:$0xff]   ;;  %v5947_v52 = vld [vmem:[#allocation2 + $0x2c0] ss:$12 sps:$4 sm:$0xff]  }
 0x5a1   :  { %7024 = vst [vmem:[#allocation27_spill] sm:$0xff] %v5947_v52 }
 0x5a2   :  { %v5883_v22 = vsel %vm1868_vm12, %v1970_v15, %v5652_v59  ;;  %v5904_v59 = vld [vmem:[#allocation2 + $0x258] ss:$12 sps:$4 sm:$0xff]   ;;  %v5950_v15 = vld [vmem:[#allocation2 + $0x2d4] ss:$12 sps:$4 sm:$0xff]  }
 0x5a3   :  { %v5887_v17 = vpack.c.bf16 %v5883_v22, %v5883_v22  ;;  %7025 = vst [vmem:[#allocation28_spill] sm:$0xff] %v5950_v15 }
 0x5a5   :  { %2006 = vmatmul.mubr.bf16.vlgmr.msra.gmra.mrb[44].mxu0 %v5887_v17  ;;  %4082 = vmatmul.mubr.bf16.vlgmr.msra.gmra.mrb[48].mxu1 %v5887_v17 }
 0x5a6   :  { %2056 = vmatpush1.bf16.msra.mxu0 %v5891_v19  ;;  %4086 = vmatpush3.bf16.msra.mxu1 %v5894_v26 }
 0x5a7   :  { %2057 = vmatprep.subr.bf16.mxu0 %v5897_v30  ;;  %4087 = vmatprep.subr.bf16.mxu1 %v6918_v1 }
 0x5a8   :  { %2087 = vmatprep.mubr.bf16.mxu0 %v6919_v42  ;;  %4101 = vmatprep.mubr.msk.bf16.mxu1 %vm4920_vm7, %v6918_v1 }
 0x5aa   :  { %2058 = vmatpush1.bf16.msra.mxu0 %v5904_v59  ;;  %4088 = vmatpush3.bf16.msra.mxu1 %v5907_v57 }
 0x5ab   :  { %2059 = vmatprep.subr.bf16.mxu0 %v5910_v16  ;;  %4089 = vmatprep.subr.bf16.mxu1 %v6918_v1 }
 0x5ae   :  { %2060 = vmatpush1.bf16.msra.mxu0 %v5914_v8  ;;  %4090 = vmatpush3.bf16.msra.mxu1 %v5917_v31 }
 0x5af   :  { %2061 = vmatprep.subr.bf16.mxu0 %v5920_v24  ;;  %4091 = vmatprep.subr.bf16.mxu1 %v6918_v1 }
 0x5b2   :  { %2062 = vmatpush1.bf16.msra.mxu0 %v5924_v5  ;;  %4092 = vmatpush3.bf16.msra.mxu1 %v5927_v44 }
 0x5b3   :  { %2063 = vmatprep.subr.bf16.mxu0 %v5930_v53  ;;  %4093 = vmatprep.subr.bf16.mxu1 %v6918_v1 }
 0x5b6   :  { %2064 = vmatpush1.bf16.msra.mxu0 %v5934_v49  ;;  %4094 = vmatpush3.bf16.msra.mxu1 %v5937_v58  ;;  %v5954_v58 = vld [vmem:[#allocation2 + $0x2d0] ss:$12 sps:$4 sm:$0xff]   ;;  %v5960_v49 = vld [vmem:[#allocation2 + $0x2ec] ss:$12 sps:$4 sm:$0xff]  }
 0x5b7   :  { %2065 = vmatprep.subr.bf16.mxu0 %v5940_v13  ;;  %4095 = vmatprep.subr.bf16.mxu1 %v6918_v1  ;;  %7026 = vst [vmem:[#allocation29_spill] sm:$0xff] %v5954_v58  ;;  %v5957_v13 = vld [vmem:[#allocation2 + $0x2d8] ss:$12 sps:$4 sm:$0xff]  }
 0x5b8   :  { %7027 = vst [vmem:[#allocation30_spill] sm:$0xff] %v5957_v13 }
 0x5ba   :  { %2066 = vmatpush1.bf16.msra.mxu0 %v5944_v40  ;;  %4096 = vmatpush3.bf16.msra.mxu1 %v5947_v52  ;;  %v5970_v52 = vld [vmem:[#allocation2 + $0x2e8] ss:$12 sps:$4 sm:$0xff]  }
 0x5bb   :  { %2067 = vmatprep.subr.bf16.mxu0 %v5950_v15  ;;  %4097 = vmatprep.subr.bf16.mxu1 %v6918_v1  ;;  %v5968_v15 = vsel %vm1578_vm11, %v5874_v48, %v5643_v23  ;;  %v7029_v23 = vld [vmem:[#allocation10_spill] sm:$0xff]  ;;  %v7030_v48 = vld [vmem:[#allocation11_spill] sm:$0xff] }
 0x5be   :  { %2068 = vmatpush1.bf16.msra.mxu0 %v5954_v58  ;;  %4098 = vmatpush3.bf16.msra.mxu1 %v5957_v13  ;;  %v5973_v58 = vld [vmem:[#allocation2 + $0x2f0] ss:$12 sps:$4 sm:$0xff]   ;;  %v2054_v13 = vpack.c.bf16 %v5968_v15, %v5968_v15 }
 0x5bf   :  { %2069 = vmatprep.subr.bf16.mxu0 %v5960_v49  ;;  %4099 = vmatprep.subr.bf16.mxu1 %v6918_v1 }
 0x5c2   :  { %2070 = vmatpush1.bf16.msra.mxu0 %v5970_v52  ;;  %4100 = vmatpush3.bf16.msra.mxu1 %v5973_v58 }
 0x5c3   :  { %2159 = vmatprep.subr.bf16.mxu0 %v5550_v28  ;;  %4105 = vmatprep.subr.bf16.mxu1 %v6918_v1  ;;  %v7028_v28 = vld [vmem:[#allocation9_spill] sm:$0xff] }
 0x5c5   :  { %2088 = vmatmul.mubr.bf16.vlgmr.msra.gmra.mrb[44].mxu0 %v2054_v13  ;;  %4102 = vmatmul.mubr.bf16.vlgmr.msra.gmra.mrb[52].mxu1 %v2054_v13  ;;  %v7032_v13 = vld [vmem:[#allocation13_spill] sm:$0xff] }
 0x5c6   :  { %2160 = vmatpush1.bf16.msra.mxu0 %v5697_v4  ;;  %4106 = vmatpush3.bf16.msra.mxu1 %v5700_v38 }
 0x5c7   :  { %2161 = vmatprep.subr.bf16.mxu0 %v5703_v63  ;;  %4107 = vmatprep.subr.bf16.mxu1 %v6918_v1 }
 0x5c8   :  { %2191 = vmatprep.mubr.bf16.mxu0 %v6919_v42  ;;  %4121 = vmatprep.mubr.msk.bf16.mxu1 %vm4920_vm7, %v6918_v1 }
 0x5ca   :  { %2162 = vmatpush1.bf16.msra.mxu0 %v5710_v36  ;;  %4108 = vmatpush3.bf16.msra.mxu1 %v5713_v37 }
 0x5cb   :  { %2163 = vmatprep.subr.bf16.mxu0 %v5716_v39  ;;  %4109 = vmatprep.subr.bf16.mxu1 %v6918_v1 }
 0x5ce   :  { %2164 = vmatpush1.bf16.msra.mxu0 %v5720_v45  ;;  %4110 = vmatpush3.bf16.msra.mxu1 %v5723_v46 }
 0x5cf   :  { %2165 = vmatprep.subr.bf16.mxu0 %v5726_v35  ;;  %4111 = vmatprep.subr.bf16.mxu1 %v6918_v1 }
 0x5d2   :  { %2166 = vmatpush1.bf16.msra.mxu0 %v5730_v41  ;;  %4112 = vmatpush3.bf16.msra.mxu1 %v5733_v50 }
 0x5d3   :  { %2167 = vmatprep.subr.bf16.mxu0 %v5736_v51  ;;  %4113 = vmatprep.subr.bf16.mxu1 %v6918_v1 }
 0x5d6   :  { %2168 = vmatpush1.bf16.msra.mxu0 %v5740_v54  ;;  %4114 = vmatpush3.bf16.msra.mxu1 %v5743_v56 }
 0x5d7   :  { %2169 = vmatprep.subr.bf16.mxu0 %v5746_v6  ;;  %4115 = vmatprep.subr.bf16.mxu1 %v6918_v1 }
 0x5da   :  { %2170 = vmatpush1.bf16.msra.mxu0 %v5750_v62  ;;  %4116 = vmatpush3.bf16.msra.mxu1 %v5753_v11 }
 0x5db   :  { %2171 = vmatprep.subr.bf16.mxu0 %v5756_v18  ;;  %4117 = vmatprep.subr.bf16.mxu1 %v6918_v1 }
 0x5de   :  { %2172 = vmatpush1.bf16.msra.mxu0 %v5760_v7  ;;  %4118 = vmatpush3.bf16.msra.mxu1 %v5763_v29  ;;  %v7044_v29 = vld [vmem:[#allocation55_spill] sm:$0xff] }
 0x5df   :  { %2173 = vmatprep.subr.bf16.mxu0 %v5766_v27  ;;  %4119 = vmatprep.subr.bf16.mxu1 %v6918_v1 }
 0x5e2   :  { %2174 = vmatpush1.bf16.msra.mxu0 %v5770_v32  ;;  %4120 = vmatpush3.bf16.msra.mxu1 %v5773_v20 }
 0x5e3   :  { %2263 = vmatprep.subr.bf16.mxu0 %v5776_v43  ;;  %4125 = vmatprep.subr.bf16.mxu1 %v6918_v1 }
 0x5e5   :  { %2192 = vmatmul.mubr.bf16.vlgmr.msra.gmra.mrb[48].mxu0 %v5887_v17  ;;  %4122 = vmatmul.mubr.bf16.vlgmr.msra.gmra.mrb[56].mxu1 %v5887_v17  ;;  %v7031_v17 = vld [vmem:[#allocation12_spill] sm:$0xff] }
 0x5e6   :  { %2264 = vmatpush1.bf16.msra.mxu0 %v5782_v60  ;;  %4126 = vmatpush3.bf16.msra.mxu1 %v5785_v61 }
 0x5e7   :  { %2265 = vmatprep.subr.bf16.mxu0 %v5788_v0  ;;  %4127 = vmatprep.subr.bf16.mxu1 %v6918_v1 }
 0x5e8   :  { %2295 = vmatprep.mubr.bf16.mxu0 %v6919_v42  ;;  %4141 = vmatprep.mubr.msk.bf16.mxu1 %vm4920_vm7, %v6918_v1 }
 0x5ea   :  { %2266 = vmatpush1.bf16.msra.mxu0 %v5795_v2  ;;  %4128 = vmatpush3.bf16.msra.mxu1 %v5798_v25 }
 0x5eb   :  { %2267 = vmatprep.subr.bf16.mxu0 %v5801_v3  ;;  %4129 = vmatprep.subr.bf16.mxu1 %v6918_v1  ;;  %v7033_v3 = vld [vmem:[#allocation14_spill] sm:$0xff] }
 0x5ee   :  { %2268 = vmatpush1.bf16.msra.mxu0 %v5805_v9  ;;  %4130 = vmatpush3.bf16.msra.mxu1 %v5808_v12  ;;  %v7034_v12 = vld [vmem:[#allocation15_spill] sm:$0xff]  ;;  %v7036_v9 = vld [vmem:[#allocation17_spill] sm:$0xff] }
 0x5ef   :  { %2269 = vmatprep.subr.bf16.mxu0 %v5811_v14  ;;  %4131 = vmatprep.subr.bf16.mxu1 %v6918_v1  ;;  %v7035_v14 = vld [vmem:[#allocation16_spill] sm:$0xff] }
 0x5f2   :  { %2270 = vmatpush1.bf16.msra.mxu0 %v7028_v28  ;;  %4132 = vmatpush3.bf16.msra.mxu1 %v7029_v23  ;;  %v7037_v23 = vld [vmem:[#allocation18_spill] sm:$0xff]  ;;  %v7039_v28 = vld [vmem:[#allocation20_spill] sm:$0xff] }
 0x5f3   :  { %2271 = vmatprep.subr.bf16.mxu0 %v7030_v48  ;;  %4133 = vmatprep.subr.bf16.mxu1 %v6918_v1  ;;  %v7038_v48 = vld [vmem:[#allocation19_spill] sm:$0xff] }
 0x5f6   :  { %2272 = vmatpush1.bf16.msra.mxu0 %v7031_v17  ;;  %4134 = vmatpush3.bf16.msra.mxu1 %v7032_v13  ;;  %v7040_v13 = vld [vmem:[#allocation21_spill] sm:$0xff]  ;;  %v7042_v17 = vld [vmem:[#allocation23_spill] sm:$0xff] }
 0x5f7   :  { %2273 = vmatprep.subr.bf16.mxu0 %v7033_v3  ;;  %4135 = vmatprep.subr.bf16.mxu1 %v6918_v1  ;;  %v7041_v3 = vld [vmem:[#allocation22_spill] sm:$0xff] }
 0x5fa   :  { %2274 = vmatpush1.bf16.msra.mxu0 %v7034_v12  ;;  %4136 = vmatpush3.bf16.msra.mxu1 %v7035_v14 }
 0x5fb   :  { %2275 = vmatprep.subr.bf16.mxu0 %v7036_v9  ;;  %4137 = vmatprep.subr.bf16.mxu1 %v6918_v1 }
 0x5fe   :  { %2276 = vmatpush1.bf16.msra.mxu0 %v7037_v23  ;;  %4138 = vmatpush3.bf16.msra.mxu1 %v7038_v48 }
 0x5ff   :  { %2277 = vmatprep.subr.bf16.mxu0 %v7039_v28  ;;  %4139 = vmatprep.subr.bf16.mxu1 %v6918_v1 }
 0x602   :  { %2278 = vmatpush1.bf16.msra.mxu0 %v7040_v13  ;;  %4140 = vmatpush3.bf16.msra.mxu1 %v7041_v3  ;;  %v7043_v3 = vld [vmem:[#allocation52_spill] sm:$0xff] }
 0x603   :  { %2345 = vmatprep.subr.bf16.mxu0 %v7042_v17  ;;  %4145 = vmatprep.subr.bf16.mxu1 %v6918_v1 }
 0x678   :  { %v2048_v14 = vpop.f32.mrb[48].mxu1 }
 0x679   :  { %v4083_v9 = vpop.f32.mrb[49].mxu1 }
 0x67a   :  { %v2051_v12 = vpop.f32.mrb[50].mxu1 }
 0x67b   :  { %v4084_v25 = vpop.f32.mrb[51].mxu1 }
 0x698   :  { %v2089_v2 = vpop.f32.mrb[44].mxu0  ;;  %v2130_v23 = vpop.f32.mrb[52].mxu1 }
 0x699   :  { %v4378_v48 = vadd.f32 %v5479_v21, %v2089_v2  ;;  %v2091_v0 = vpop.f32.mrb[45].mxu0  ;;  %v4103_v28 = vpop.f32.mrb[53].mxu1  ;;  %v2131_v7 = vadd.f32 %v2130_v23, %v7044_v29 }
 0x69a   :  { %v2093_v61 = vpop.f32.mrb[46].mxu0  ;;  %v2133_v60 = vpop.f32.mrb[54].mxu1  ;;  %v4380_v32 = vadd.f32 %v7043_v3, %v2091_v0  ;;  %v2049_v28 = vadd.f32 %v2048_v14, %v5489_v34  ;;  %v7046_v3 = vld [vmem:[#allocation45_spill] sm:$0xff] }
 0x69b   :  { %v3578_v43 = vmul.f32 -1.442695, %v4378_v48  ;;  %v2094_v13 = vpop.f32.mrb[47].mxu0  ;;  %v4104_v20 = vpop.f32.mrb[55].mxu1 }
 0x69c   :  { %v3579_v17 = vmul.f32 -1.442695, %v4380_v32 }
 0x69d   :  { %4655 = vpow2.f32 %v3578_v43 }
 0x69e   :  { %4657 = vpow2.f32 %v3579_v17 }
 0x6a7   :  { %v4656_v27 = vpop.eup %4655 }
 0x6a8   :  { %v2144_v9 = vadd.f32 1.0, %v4656_v27  ;;  %v4658_v25 = vpop.eup %4657 }
 0x6a9   :  { %v2145_v12 = vadd.f32 1.0, %v4658_v25 }
 0x6aa   :  { %4659 = vrcp.f32 %v2144_v9  ;;  %v7045_v9 = vld [vmem:[#allocation44_spill] sm:$0xff] }
 0x6ab   :  { %4661 = vrcp.f32 %v2145_v12 }
 0x6b4   :  { %v4660_v2 = vpop.eup %4659 }
 0x6b5   :  { %v2150_v61 = vmul.f32 %v4660_v2, %v2131_v7  ;;  %v4662_v12 = vpop.eup %4661 }
 0x6b6   :  { %v2153_v2 = vsub.f32 1.0, %v4662_v12 }
 0x6b7   :  { %v2151_v60 = vadd.f32 %v2150_v61, %v2049_v28 }
 0x6b8   :  { %v2193_v48 = vpop.f32.mrb[48].mxu0  ;;  %v2234_v20 = vpop.f32.mrb[56].mxu1 }
 0x6b9   :  { %4663 = vtanh.f32 %v2151_v60  ;;  %v2194_v43 = vadd.f32 %v2193_v48, %v5274_v47  ;;  %v2195_v32 = vpop.f32.mrb[49].mxu0  ;;  %v4123_v0 = vpop.f32.mrb[57].mxu1  ;;  %v2155_v60 = vmul.f32 %v4662_v12, %v5968_v15 }
 0x6ba   :  { %v2196_v27 = vadd.f32 %v2195_v32, %v6984_v55  ;;  %v2197_v17 = vpop.f32.mrb[50].mxu0  ;;  %v2237_v13 = vpop.f32.mrb[58].mxu1 }
 0x6bb   :  { %v2240_v25 = vadd.f32 %v2194_v43, %v7045_v9  ;;  %v2198_v23 = vpop.f32.mrb[51].mxu0  ;;  %v4124_v29 = vpop.f32.mrb[59].mxu1 }
 0x6bc   :  { %v2241_v14 = vadd.f32 %v2196_v27, %v7046_v3  ;;  %v2235_v29 = vadd.f32 %v2234_v20, %v5284_v10  ;;  %v7047_v27 = vld [vmem:[#allocation51_spill] sm:$0xff] }
 0x6bd   :  { %v3580_v7 = vmul.f32 -1.442695, %v2240_v25 }
 0x6be   :  { %v3581_v28 = vmul.f32 -1.442695, %v2241_v14 }
 0x6bf   :  { %4665 = vpow2.f32 %v3580_v7 }
 0x6c0   :  { %4667 = vpow2.f32 %v3581_v28 }
 0x6c3   :  { %v4664_v61 = vpop.eup %4663 }
 0x6c4   :  { %v2154_v48 = vmul.f32 %v4664_v61, %v2153_v2 }
 0x6c6   :  { %v2156_v0 = vadd.f32 %v2155_v60, %v2154_v48  ;;  %v7049_v60 = vld [vmem:[#allocation25_spill] sm:$0xff]  ;;  %v7050_v48 = vld [vmem:[#allocation26_spill] sm:$0xff] }
 0x6c9   :  { %v4666_v32 = vpop.eup %4665 }
 0x6ca   :  { %v2248_v17 = vadd.f32 1.0, %v4666_v32  ;;  %v4668_v13 = vpop.eup %4667  ;;  %v7051_v32 = vld [vmem:[#allocation27_spill] sm:$0xff] }
 0x6cb   :  { %v2249_v43 = vadd.f32 1.0, %v4668_v13  ;;  %v7053_v13 = vld [vmem:[#allocation29_spill] sm:$0xff] }
 0x6cc   :  { %4669 = vrcp.f32 %v2248_v17  ;;  %v7052_v17 = vld [vmem:[#allocation28_spill] sm:$0xff] }
 0x6cd   :  { %4671 = vrcp.f32 %v2249_v43  ;;  %v7054_v43 = vld [vmem:[#allocation30_spill] sm:$0xff] }
 0x6d6   :  { %v4670_v9 = vpop.eup %4669 }
 0x6d7   :  { %v2254_v3 = vmul.f32 %v4670_v9, %v2235_v29  ;;  %v4672_v23 = vpop.eup %4671  ;;  %v6110_v29 = vsel %vm1868_vm12, %v2156_v0, %v5968_v15  ;;  %v7073_v15 = vld [vmem:[#allocation12_spill] sm:$0xff]  ;;  %v7074_v0 = vld [vmem:[#allocation13_spill] sm:$0xff] }
 0x6d8   :  { %v2257_v14 = vsub.f32 1.0, %v4672_v23  ;;  %v2259_v2 = vmul.f32 %v4672_v23, %v5883_v22  ;;  %v2344_v9 = vpack.c.bf16 %v6110_v29, %v6110_v29  ;;  %v7077_v23 = vld [vmem:[#allocation16_spill] sm:$0xff] }
 0x6d9   :  { %v2255_v25 = vadd.f32 %v2254_v3, %v7047_v27  ;;  %v6116_v3 = vld [vmem:[#allocation2 + $0xc4] ss:$12 sps:$4 sm:$0xff]   ;;  %v7075_v27 = vld [vmem:[#allocation14_spill] sm:$0xff] }
 0x6db   :  { %4673 = vtanh.f32 %v2255_v25  ;;  %v7076_v25 = vld [vmem:[#allocation15_spill] sm:$0xff] }
 0x6e5   :  { %v4674_v7 = vpop.eup %4673 }
 0x6e6   :  { %v2258_v12 = vmul.f32 %v4674_v7, %v2257_v14  ;;  %v7078_v14 = vld [vmem:[#allocation17_spill] sm:$0xff]  ;;  %v7079_v7 = vld [vmem:[#allocation18_spill] sm:$0xff] }
 0x6e8   :  { %v2260_v28 = vadd.f32 %v2259_v2, %v2258_v12  ;;  %v7080_v12 = vld [vmem:[#allocation19_spill] sm:$0xff]  ;;  %v7081_v2 = vld [vmem:[#allocation20_spill] sm:$0xff] }
 0x6ea   :  { %v6068_v61 = vsel %vm2158_vm13, %v2260_v28, %v5883_v22  ;;  %v7048_v22 = vld [vmem:[#allocation24_spill] sm:$0xff]  ;;  %v7082_v28 = vld [vmem:[#allocation21_spill] sm:$0xff] }
 0x6eb   :  { %v6072_v20 = vpack.c.bf16 %v6068_v61, %v6068_v61 }
 0x6ed   :  { %2296 = vmatmul.mubr.bf16.vlgmr.msra.gmra.mrb[52].mxu0 %v6072_v20  ;;  %4142 = vmatmul.mubr.bf16.vlgmr.msra.gmra.mrb[60].mxu1 %v6072_v20 }
 0x6ee   :  { %2346 = vmatpush1.bf16.msra.mxu0 %v5891_v19  ;;  %4146 = vmatpush3.bf16.msra.mxu1 %v5894_v26 }
 0x6ef   :  { %2347 = vmatprep.subr.bf16.mxu0 %v5897_v30  ;;  %4147 = vmatprep.subr.bf16.mxu1 %v6918_v1 }
 0x6f0   :  { %2377 = vmatprep.mubr.bf16.mxu0 %v6919_v42  ;;  %4161 = vmatprep.mubr.msk.bf16.mxu1 %vm4920_vm7, %v6918_v1 }
 0x6f2   :  { %2348 = vmatpush1.bf16.msra.mxu0 %v5904_v59  ;;  %4148 = vmatpush3.bf16.msra.mxu1 %v5907_v57 }
 0x6f3   :  { %2349 = vmatprep.subr.bf16.mxu0 %v5910_v16  ;;  %4149 = vmatprep.subr.bf16.mxu1 %v6918_v1 }
 0x6f6   :  { %2350 = vmatpush1.bf16.msra.mxu0 %v5914_v8  ;;  %4150 = vmatpush3.bf16.msra.mxu1 %v5917_v31 }
 0x6f7   :  { %2351 = vmatprep.subr.bf16.mxu0 %v5920_v24  ;;  %4151 = vmatprep.subr.bf16.mxu1 %v6918_v1 }
 0x6fa   :  { %2352 = vmatpush1.bf16.msra.mxu0 %v5924_v5  ;;  %4152 = vmatpush3.bf16.msra.mxu1 %v5927_v44 }
 0x6fb   :  { %2353 = vmatprep.subr.bf16.mxu0 %v5930_v53  ;;  %4153 = vmatprep.subr.bf16.mxu1 %v6918_v1 }
 0x6fe   :  { %2354 = vmatpush1.bf16.msra.mxu0 %v7048_v22  ;;  %4154 = vmatpush3.bf16.msra.mxu1 %v7049_v60 }
 0x6ff   :  { %2355 = vmatprep.subr.bf16.mxu0 %v7050_v48  ;;  %4155 = vmatprep.subr.bf16.mxu1 %v6918_v1 }
 0x702   :  { %2356 = vmatpush1.bf16.msra.mxu0 %v5944_v40  ;;  %4156 = vmatpush3.bf16.msra.mxu1 %v7051_v32 }
 0x703   :  { %2357 = vmatprep.subr.bf16.mxu0 %v7052_v17  ;;  %4157 = vmatprep.subr.bf16.mxu1 %v6918_v1 }
 0x706   :  { %2358 = vmatpush1.bf16.msra.mxu0 %v7053_v13  ;;  %4158 = vmatpush3.bf16.msra.mxu1 %v7054_v43 }
 0x707   :  { %2359 = vmatprep.subr.bf16.mxu0 %v5960_v49  ;;  %4159 = vmatprep.subr.bf16.mxu1 %v6918_v1 }
 0x70a   :  { %2360 = vmatpush1.bf16.msra.mxu0 %v5970_v52  ;;  %4160 = vmatpush3.bf16.msra.mxu1 %v5973_v58 }
 0x70b   :  { %2449 = vmatprep.subr.bf16.mxu0 %v6116_v3  ;;  %4165 = vmatprep.subr.bf16.mxu1 %v6918_v1 }
 0x70d   :  { %2378 = vmatmul.mubr.bf16.vlgmr.msra.gmra.mrb[52].mxu0 %v2344_v9  ;;  %4162 = vmatmul.mubr.bf16.vlgmr.msra.gmra.mrb[64].mxu1 %v2344_v9  ;;  %v7084_v9 = vld [vmem:[#allocation23_spill] sm:$0xff] }
 0x70e   :  { %2450 = vmatpush1.bf16.msra.mxu0 %v5697_v4  ;;  %4166 = vmatpush3.bf16.msra.mxu1 %v5700_v38  ;;  %v7055_v4 = vld [vmem:[#allocation35_spill] sm:$0xff]  ;;  %v7056_v38 = vld [vmem:[#allocation36_spill] sm:$0xff] }
 0x70f   :  { %2451 = vmatprep.subr.bf16.mxu0 %v5703_v63  ;;  %4167 = vmatprep.subr.bf16.mxu1 %v6918_v1  ;;  %v7057_v63 = vld [vmem:[#allocation43_spill] sm:$0xff] }
 0x710   :  { %2481 = vmatprep.mubr.bf16.mxu0 %v6919_v42  ;;  %4181 = vmatprep.mubr.msk.bf16.mxu1 %vm4920_vm7, %v6918_v1 }
 0x712   :  { %2452 = vmatpush1.bf16.msra.mxu0 %v5710_v36  ;;  %4168 = vmatpush3.bf16.msra.mxu1 %v5713_v37  ;;  %v7058_v36 = vld [vmem:[#allocation59_spill] sm:$0xff]  ;;  %v7059_v37 = vld [vmem:[#allocation60_spill] sm:$0xff] }
 0x713   :  { %2453 = vmatprep.subr.bf16.mxu0 %v5716_v39  ;;  %4169 = vmatprep.subr.bf16.mxu1 %v6918_v1  ;;  %v7060_v39 = vld [vmem:[#allocation61_spill] sm:$0xff] }
 0x716   :  { %2454 = vmatpush1.bf16.msra.mxu0 %v5720_v45  ;;  %4170 = vmatpush3.bf16.msra.mxu1 %v5723_v46  ;;  %v7061_v45 = vld [vmem:[#allocation62_spill] sm:$0xff]  ;;  %v7062_v46 = vld [vmem:[#allocation63_spill] sm:$0xff] }
 0x717   :  { %2455 = vmatprep.subr.bf16.mxu0 %v5726_v35  ;;  %4171 = vmatprep.subr.bf16.mxu1 %v6918_v1  ;;  %v7063_v35 = vld [vmem:[#allocation64_spill] sm:$0xff] }
 0x71a   :  { %2456 = vmatpush1.bf16.msra.mxu0 %v5730_v41  ;;  %4172 = vmatpush3.bf16.msra.mxu1 %v5733_v50  ;;  %v7064_v41 = vld [vmem:[#allocation65_spill] sm:$0xff]  ;;  %v7065_v50 = vld [vmem:[#allocation66_spill] sm:$0xff] }
 0x71b   :  { %2457 = vmatprep.subr.bf16.mxu0 %v5736_v51  ;;  %4173 = vmatprep.subr.bf16.mxu1 %v6918_v1  ;;  %v7066_v51 = vld [vmem:[#allocation5_spill] sm:$0xff] }
 0x71e   :  { %2458 = vmatpush1.bf16.msra.mxu0 %v5740_v54  ;;  %4174 = vmatpush3.bf16.msra.mxu1 %v5743_v56  ;;  %v7067_v54 = vld [vmem:[#allocation8_spill] sm:$0xff]  ;;  %v7068_v56 = vld [vmem:[#allocation6_spill] sm:$0xff] }
 0x71f   :  { %2459 = vmatprep.subr.bf16.mxu0 %v5746_v6  ;;  %4175 = vmatprep.subr.bf16.mxu1 %v6918_v1  ;;  %v7069_v6 = vld [vmem:[#allocation7_spill] sm:$0xff] }
 0x722   :  { %2460 = vmatpush1.bf16.msra.mxu0 %v5750_v62  ;;  %4176 = vmatpush3.bf16.msra.mxu1 %v5753_v11  ;;  %v7070_v62 = vld [vmem:[#allocation9_spill] sm:$0xff]  ;;  %v7071_v11 = vld [vmem:[#allocation10_spill] sm:$0xff] }
 0x723   :  { %2461 = vmatprep.subr.bf16.mxu0 %v5756_v18  ;;  %4177 = vmatprep.subr.bf16.mxu1 %v6918_v1  ;;  %v7072_v18 = vld [vmem:[#allocation11_spill] sm:$0xff] }
 0x726   :  { %2462 = vmatpush1.bf16.msra.mxu0 %v7055_v4  ;;  %4178 = vmatpush3.bf16.msra.mxu1 %v7056_v38 }
 0x727   :  { %2463 = vmatprep.subr.bf16.mxu0 %v7057_v63  ;;  %4179 = vmatprep.subr.bf16.mxu1 %v6918_v1 }
 0x72a   :  { %2464 = vmatpush1.bf16.msra.mxu0 %v7058_v36  ;;  %4180 = vmatpush3.bf16.msra.mxu1 %v7059_v37 }
 0x72b   :  { %2553 = vmatprep.subr.bf16.mxu0 %v7060_v39  ;;  %4185 = vmatprep.subr.bf16.mxu1 %v6918_v1 }
 0x72d   :  { %2482 = vmatmul.mubr.bf16.vlgmr.msra.gmra.mrb[56].mxu0 %v6072_v20  ;;  %4182 = vmatmul.mubr.bf16.vlgmr.msra.gmra.mrb[68].mxu1 %v6072_v20  ;;  %v7083_v20 = vld [vmem:[#allocation22_spill] sm:$0xff] }
 0x72e   :  { %2554 = vmatpush1.bf16.msra.mxu0 %v7061_v45  ;;  %4186 = vmatpush3.bf16.msra.mxu1 %v7062_v46 }
 0x72f   :  { %2555 = vmatprep.subr.bf16.mxu0 %v7063_v35  ;;  %4187 = vmatprep.subr.bf16.mxu1 %v6918_v1 }
 0x730   :  { %2585 = vmatprep.mubr.bf16.mxu0 %v6919_v42  ;;  %4201 = vmatprep.mubr.msk.bf16.mxu1 %vm4920_vm7, %v6918_v1 }
 0x732   :  { %2556 = vmatpush1.bf16.msra.mxu0 %v7064_v41  ;;  %4188 = vmatpush3.bf16.msra.mxu1 %v7065_v50 }
 0x733   :  { %2557 = vmatprep.subr.bf16.mxu0 %v7066_v51  ;;  %4189 = vmatprep.subr.bf16.mxu1 %v6918_v1 }
 0x736   :  { %2558 = vmatpush1.bf16.msra.mxu0 %v7067_v54  ;;  %4190 = vmatpush3.bf16.msra.mxu1 %v7068_v56 }
 0x737   :  { %2559 = vmatprep.subr.bf16.mxu0 %v7069_v6  ;;  %4191 = vmatprep.subr.bf16.mxu1 %v6918_v1  ;;  %v7085_v6 = vld [vmem:[#allocation52_spill] sm:$0xff] }
 0x73a   :  { %2560 = vmatpush1.bf16.msra.mxu0 %v7070_v62  ;;  %4192 = vmatpush3.bf16.msra.mxu1 %v7071_v11 }
 0x73b   :  { %2561 = vmatprep.subr.bf16.mxu0 %v7072_v18  ;;  %4193 = vmatprep.subr.bf16.mxu1 %v6918_v1 }
 0x73e   :  { %2562 = vmatpush1.bf16.msra.mxu0 %v7073_v15  ;;  %4194 = vmatpush3.bf16.msra.mxu1 %v7074_v0 }
 0x73f   :  { %2563 = vmatprep.subr.bf16.mxu0 %v7075_v27  ;;  %4195 = vmatprep.subr.bf16.mxu1 %v6918_v1 }
 0x742   :  { %2564 = vmatpush1.bf16.msra.mxu0 %v7076_v25  ;;  %4196 = vmatpush3.bf16.msra.mxu1 %v7077_v23  ;;  %v7086_v25 = vld [vmem:[#allocation55_spill] sm:$0xff] }
 0x743   :  { %2565 = vmatprep.subr.bf16.mxu0 %v7078_v14  ;;  %4197 = vmatprep.subr.bf16.mxu1 %v6918_v1 }
 0x746   :  { %2566 = vmatpush1.bf16.msra.mxu0 %v7079_v7  ;;  %4198 = vmatpush3.bf16.msra.mxu1 %v7080_v12 }
 0x747   :  { %2567 = vmatprep.subr.bf16.mxu0 %v7081_v2  ;;  %4199 = vmatprep.subr.bf16.mxu1 %v6918_v1 }
 0x74a   :  { %2568 = vmatpush1.bf16.msra.mxu0 %v7082_v28  ;;  %4200 = vmatpush3.bf16.msra.mxu1 %v7083_v20 }
 0x74b   :  { %2635 = vmatprep.subr.bf16.mxu0 %v7084_v9  ;;  %4205 = vmatprep.subr.bf16.mxu1 %v6918_v1 }
 0x7c0   :  { %v2338_v4 = vpop.f32.mrb[60].mxu1 }
 0x7c1   :  { %v4143_v38 = vpop.f32.mrb[61].mxu1  ;;  %v2339_v7 = vadd.f32 %v2338_v4, %v5489_v34 }
 0x7c2   :  { %v2341_v63 = vpop.f32.mrb[62].mxu1 }
 0x7c3   :  { %v4144_v36 = vpop.f32.mrb[63].mxu1 }
 0x7e0   :  { %v2379_v37 = vpop.f32.mrb[52].mxu0  ;;  %v2420_v39 = vpop.f32.mrb[64].mxu1 }
 0x7e1   :  { %v4382_v45 = vadd.f32 %v5479_v21, %v2379_v37  ;;  %v2381_v46 = vpop.f32.mrb[53].mxu0  ;;  %v4163_v35 = vpop.f32.mrb[65].mxu1  ;;  %v2421_v23 = vadd.f32 %v2420_v39, %v7086_v25 }
 0x7e2   :  { %v2383_v41 = vpop.f32.mrb[54].mxu0  ;;  %v2423_v50 = vpop.f32.mrb[66].mxu1  ;;  %v4384_v62 = vadd.f32 %v7085_v6, %v2381_v46  ;;  %v7087_v46 = vld [vmem:[#allocation46_spill] sm:$0xff] }
 0x7e3   :  { %v3582_v51 = vmul.f32 -1.442695, %v4382_v45  ;;  %v2384_v54 = vpop.f32.mrb[55].mxu0  ;;  %v4164_v56 = vpop.f32.mrb[67].mxu1  ;;  %v7088_v50 = vld [vmem:[#allocation47_spill] sm:$0xff] }
 0x7e4   :  { %v3583_v11 = vmul.f32 -1.442695, %v4384_v62 }
 0x7e5   :  { %4675 = vpow2.f32 %v3582_v51 }
 0x7e6   :  { %4677 = vpow2.f32 %v3583_v11 }
 0x7ef   :  { %v4676_v18 = vpop.eup %4675 }
 0x7f0   :  { %v2434_v15 = vadd.f32 1.0, %v4676_v18  ;;  %v4678_v0 = vpop.eup %4677 }
 0x7f1   :  { %v2435_v27 = vadd.f32 1.0, %v4678_v0 }
 0x7f2   :  { %4679 = vrcp.f32 %v2434_v15 }
 0x7f3   :  { %4681 = vrcp.f32 %v2435_v27 }
 0x7fc   :  { %v4680_v14 = vpop.eup %4679 }
 0x7fd   :  { %v2440_v12 = vmul.f32 %v4680_v14, %v2421_v23  ;;  %v4682_v54 = vpop.eup %4681 }
 0x7fe   :  { %v2443_v56 = vsub.f32 1.0, %v4682_v54  ;;  %v2445_v18 = vmul.f32 %v4682_v54, %v6110_v29  ;;  %v6356_v54 = vld [vmem:[#allocation2 + $0x198] ss:$12 sps:$4 sm:$0xff]  }
 0x7ff   :  { %v2441_v2 = vadd.f32 %v2440_v12, %v2339_v7 }
 0x800   :  { %v2483_v28 = vpop.f32.mrb[56].mxu0  ;;  %v2524_v20 = vpop.f32.mrb[68].mxu1 }
 0x801   :  { %4683 = vtanh.f32 %v2441_v2  ;;  %v2484_v9 = vadd.f32 %v2483_v28, %v5274_v47  ;;  %v2485_v38 = vpop.f32.mrb[57].mxu0  ;;  %v4183_v63 = vpop.f32.mrb[69].mxu1  ;;  %v2525_v12 = vadd.f32 %v2524_v20, %v5284_v10 }
 0x802   :  { %v2486_v36 = vadd.f32 %v2485_v38, %v6984_v55  ;;  %v2487_v37 = vpop.f32.mrb[58].mxu0  ;;  %v2527_v45 = vpop.f32.mrb[70].mxu1 }
 0x803   :  { %v2530_v35 = vadd.f32 %v2484_v9, %v7087_v46  ;;  %v2488_v39 = vpop.f32.mrb[59].mxu0  ;;  %v4184_v41 = vpop.f32.mrb[71].mxu1  ;;  %v7089_v9 = vld [vmem:[#allocation57_spill] sm:$0xff] }
 0x804   :  { %v2531_v4 = vadd.f32 %v2486_v36, %v7088_v50  ;;  %v6337_v41 = vld [vmem:[#allocation2 + $0x184] ss:$12 sps:$4 sm:$0xff]   ;;  %v6343_v50 = vld [vmem:[#allocation2 + $0x180] ss:$12 sps:$4 sm:$0xff]  }
 0x805   :  { %v3584_v51 = vmul.f32 -1.442695, %v2530_v35 }
 0x806   :  { %v3585_v62 = vmul.f32 -1.442695, %v2531_v4  ;;  %v6346_v4 = vld [vmem:[#allocation2 + $0x188] ss:$12 sps:$4 sm:$0xff]  }
 0x807   :  { %4685 = vpow2.f32 %v3584_v51  ;;  %v6349_v51 = vld [vmem:[#allocation2 + $0x19c] ss:$12 sps:$4 sm:$0xff]  }
 0x808   :  { %4687 = vpow2.f32 %v3585_v62  ;;  %v6362_v62 = vld [vmem:[#allocation2 + $0x1b4] ss:$12 sps:$4 sm:$0xff]  }
 0x80b   :  { %v4684_v11 = vpop.eup %4683 }
 0x80c   :  { %v2444_v15 = vmul.f32 %v4684_v11, %v2443_v56  ;;  %v6359_v56 = vld [vmem:[#allocation2 + $0x1a0] ss:$12 sps:$4 sm:$0xff]   ;;  %v6366_v11 = vld [vmem:[#allocation2 + $0x1b0] ss:$12 sps:$4 sm:$0xff]  }
 0x80e   :  { %v2446_v0 = vadd.f32 %v2445_v18, %v2444_v15  ;;  %v6369_v18 = vld [vmem:[#allocation2 + $0x1b8] ss:$12 sps:$4 sm:$0xff]  }
 0x80f   :  { %v6372_v15 = vld [vmem:[#allocation2 + $0x1cc] ss:$12 sps:$4 sm:$0xff]  }
 0x811   :  { %v4686_v27 = vpop.eup %4685 }
 0x812   :  { %v2538_v23 = vadd.f32 1.0, %v4686_v27  ;;  %v4688_v14 = vpop.eup %4687  ;;  %v6379_v27 = vld [vmem:[#allocation2 + $0x1d0] ss:$12 sps:$4 sm:$0xff]  }
 0x813   :  { %v2539_v7 = vadd.f32 1.0, %v4688_v14  ;;  %7091 = vst [vmem:[#allocation32_spill] sm:$0xff] %v6379_v27  ;;  %v6386_v14 = vld [vmem:[#allocation2 + $0x1e0] ss:$12 sps:$4 sm:$0xff]  }
 0x814   :  { %4689 = vrcp.f32 %v2538_v23  ;;  %v6382_v23 = vld [vmem:[#allocation2 + $0x1e4] ss:$12 sps:$4 sm:$0xff]   ;;  %7093 = vst [vmem:[#allocation34_spill] sm:$0xff] %v6386_v14 }
 0x815   :  { %4691 = vrcp.f32 %v2539_v7  ;;  %7092 = vst [vmem:[#allocation33_spill] sm:$0xff] %v6382_v23  ;;  %v6389_v7 = vld [vmem:[#allocation2 + $0x1e8] ss:$12 sps:$4 sm:$0xff]  }
 0x816   :  { %7094 = vst [vmem:[#allocation58_spill] sm:$0xff] %v6389_v7 }
 0x81e   :  { %v4690_v2 = vpop.eup %4689 }
 0x81f   :  { %v2544_v28 = vmul.f32 %v4690_v2, %v2525_v12  ;;  %v4692_v63 = vpop.eup %4691  ;;  %v6392_v12 = vld [vmem:[#allocation2 + $0x1fc] ss:$12 sps:$4 sm:$0xff]   ;;  %v6396_v2 = vld [vmem:[#allocation2 + $0x1f8] ss:$12 sps:$4 sm:$0xff]  }
 0x820   :  { %v2547_v36 = vsub.f32 1.0, %v4692_v63  ;;  %v2549_v46 = vmul.f32 %v4692_v63, %v6068_v61  ;;  %7095 = vst [vmem:[#allocation37_spill] sm:$0xff] %v6392_v12  ;;  %7096 = vst [vmem:[#allocation39_spill] sm:$0xff] %v6396_v2  ;;  %v6409_v63 = vld [vmem:[#allocation2 + $0x218] ss:$12 sps:$4 sm:$0xff]  }
 0x821   :  { %v2545_v38 = vadd.f32 %v2544_v28, %v7089_v9  ;;  %v6399_v28 = vld [vmem:[#allocation2 + $0x200] ss:$12 sps:$4 sm:$0xff]   ;;  %7100 = vst [vmem:[#allocation41_spill] sm:$0xff] %v6409_v63 }
 0x822   :  { %7097 = vst [vmem:[#allocation38_spill] sm:$0xff] %v6399_v28  ;;  %v6402_v9 = vld [vmem:[#allocation2 + $0x214] ss:$12 sps:$4 sm:$0xff]  }
 0x823   :  { %4693 = vtanh.f32 %v2545_v38  ;;  %7098 = vst [vmem:[#allocation40_spill] sm:$0xff] %v6402_v9  ;;  %v6406_v38 = vld [vmem:[#allocation2 + $0x210] ss:$12 sps:$4 sm:$0xff]  }
 0x824   :  { %7099 = vst [vmem:[#allocation42_spill] sm:$0xff] %v6406_v38 }
 0x82d   :  { %v4694_v37 = vpop.eup %4693 }
 0x82e   :  { %v2548_v45 = vmul.f32 %v4694_v37, %v2547_v36  ;;  %v6412_v36 = vld [vmem:[#allocation2 + $0x22c] ss:$12 sps:$4 sm:$0xff]   ;;  %v6416_v37 = vld [vmem:[#allocation2 + $0x228] ss:$12 sps:$4 sm:$0xff]  }
 0x82f   :  { %7101 = vst [vmem:[#allocation44_spill] sm:$0xff] %v6412_v36  ;;  %7102 = vst [vmem:[#allocation45_spill] sm:$0xff] %v6416_v37 }
 0x830   :  { %v2550_v35 = vadd.f32 %v2549_v46, %v2548_v45  ;;  %v6419_v45 = vld [vmem:[#allocation2 + $0x230] ss:$12 sps:$4 sm:$0xff]  }
 0x831   :  { %7103 = vst [vmem:[#allocation51_spill] sm:$0xff] %v6419_v45  ;;  %v6422_v46 = vld [vmem:[#allocation2 + $0x244] ss:$12 sps:$4 sm:$0xff]  }
 0x832   :  { %v6208_v39 = vsel %vm2448_vm14, %v2550_v35, %v6068_v61  ;;  %v6307_v61 = vld [vmem:[#allocation2 + $0x13c] ss:$12 sps:$4 sm:$0xff]   ;;  %7104 = vst [vmem:[#allocation24_spill] sm:$0xff] %v6422_v46 }
 0x833   :  { %v6212_v20 = vpack.c.bf16 %v6208_v39, %v6208_v39 }
 0x835   :  { %2586 = vmatmul.mubr.bf16.vlgmr.msra.gmra.mrb[60].mxu0 %v6212_v20  ;;  %4202 = vmatmul.mubr.bf16.vlgmr.msra.gmra.mrb[72].mxu1 %v6212_v20 }
 0x836   :  { %2636 = vmatpush1.bf16.msra.mxu0 %v5891_v19  ;;  %4206 = vmatpush3.bf16.msra.mxu1 %v5894_v26  ;;  %v6250_v19 = vsel %vm2158_vm13, %v2446_v0, %v6110_v29  ;;  %v6334_v29 = vld [vmem:[#allocation2 + $0x170] ss:$12 sps:$4 sm:$0xff]   ;;  %v6376_v0 = vld [vmem:[#allocation2 + $0x1c8] ss:$12 sps:$4 sm:$0xff]  }
 0x837   :  { %2637 = vmatprep.subr.bf16.mxu0 %v5897_v30  ;;  %4207 = vmatprep.subr.bf16.mxu1 %v6918_v1  ;;  %v2634_v26 = vpack.c.bf16 %v6250_v19, %v6250_v19  ;;  %v6258_v30 = vld [vmem:[#allocation2 + $0xc0] ss:$12 sps:$4 sm:$0xff]   ;;  %7090 = vst [vmem:[#allocation31_spill] sm:$0xff] %v6376_v0 }
 0x838   :  { %2667 = vmatprep.mubr.bf16.mxu0 %v6919_v42  ;;  %4221 = vmatprep.mubr.msk.bf16.mxu1 %vm4920_vm7, %v6918_v1 }
 0x83a   :  { %2638 = vmatpush1.bf16.msra.mxu0 %v5904_v59  ;;  %4208 = vmatpush3.bf16.msra.mxu1 %v5907_v57  ;;  %v6261_v59 = vld [vmem:[#allocation2 + $0xc8] ss:$12 sps:$4 sm:$0xff]  }
 0x83b   :  { %2639 = vmatprep.subr.bf16.mxu0 %v5910_v16  ;;  %4209 = vmatprep.subr.bf16.mxu1 %v6918_v1  ;;  %v6264_v57 = vld [vmem:[#allocation2 + $0xdc] ss:$12 sps:$4 sm:$0xff]   ;;  %v6271_v16 = vld [vmem:[#allocation2 + $0xd8] ss:$12 sps:$4 sm:$0xff]  }
 0x83e   :  { %2640 = vmatpush1.bf16.msra.mxu0 %v5914_v8  ;;  %4210 = vmatpush3.bf16.msra.mxu1 %v5917_v31  ;;  %v6274_v8 = vld [vmem:[#allocation2 + $0xe0] ss:$12 sps:$4 sm:$0xff]  }
 0x83f   :  { %2641 = vmatprep.subr.bf16.mxu0 %v5920_v24  ;;  %4211 = vmatprep.subr.bf16.mxu1 %v6918_v1  ;;  %v6277_v31 = vld [vmem:[#allocation2 + $0xf4] ss:$12 sps:$4 sm:$0xff]   ;;  %v6281_v24 = vld [vmem:[#allocation2 + $0xf0] ss:$12 sps:$4 sm:$0xff]  }
 0x842   :  { %2642 = vmatpush1.bf16.msra.mxu0 %v5924_v5  ;;  %4212 = vmatpush3.bf16.msra.mxu1 %v5927_v44  ;;  %v6284_v5 = vld [vmem:[#allocation2 + $0xf8] ss:$12 sps:$4 sm:$0xff]  }
 0x843   :  { %2643 = vmatprep.subr.bf16.mxu0 %v5930_v53  ;;  %4213 = vmatprep.subr.bf16.mxu1 %v6918_v1  ;;  %v6287_v44 = vld [vmem:[#allocation2 + $0x10c] ss:$12 sps:$4 sm:$0xff]   ;;  %v6291_v53 = vld [vmem:[#allocation2 + $0x108] ss:$12 sps:$4 sm:$0xff]  }
 0x846   :  { %2644 = vmatpush1.bf16.msra.mxu0 %v7048_v22  ;;  %4214 = vmatpush3.bf16.msra.mxu1 %v7049_v60  ;;  %v6311_v22 = vld [vmem:[#allocation2 + $0x138] ss:$12 sps:$4 sm:$0xff]   ;;  %v6314_v60 = vld [vmem:[#allocation2 + $0x140] ss:$12 sps:$4 sm:$0xff]  }
 0x847   :  { %2645 = vmatprep.subr.bf16.mxu0 %v7050_v48  ;;  %4215 = vmatprep.subr.bf16.mxu1 %v6918_v1  ;;  %v6317_v48 = vld [vmem:[#allocation2 + $0x154] ss:$12 sps:$4 sm:$0xff]  }
 0x84a   :  { %2646 = vmatpush1.bf16.msra.mxu0 %v5944_v40  ;;  %4216 = vmatpush3.bf16.msra.mxu1 %v7051_v32  ;;  %v6301_v40 = vld [vmem:[#allocation2 + $0x120] ss:$12 sps:$4 sm:$0xff]   ;;  %v6321_v32 = vld [vmem:[#allocation2 + $0x150] ss:$12 sps:$4 sm:$0xff]  }
 0x84b   :  { %2647 = vmatprep.subr.bf16.mxu0 %v7052_v17  ;;  %4217 = vmatprep.subr.bf16.mxu1 %v6918_v1  ;;  %v6324_v17 = vld [vmem:[#allocation2 + $0x158] ss:$12 sps:$4 sm:$0xff]  }
 0x84e   :  { %2648 = vmatpush1.bf16.msra.mxu0 %v7053_v13  ;;  %4218 = vmatpush3.bf16.msra.mxu1 %v7054_v43  ;;  %v6327_v13 = vld [vmem:[#allocation2 + $0x16c] ss:$12 sps:$4 sm:$0xff]   ;;  %v6331_v43 = vld [vmem:[#allocation2 + $0x168] ss:$12 sps:$4 sm:$0xff]  }
 0x84f   :  { %2649 = vmatprep.subr.bf16.mxu0 %v5960_v49  ;;  %4219 = vmatprep.subr.bf16.mxu1 %v6918_v1  ;;  %v6294_v49 = vld [vmem:[#allocation2 + $0x110] ss:$12 sps:$4 sm:$0xff]  }
 0x852   :  { %2650 = vmatpush1.bf16.msra.mxu0 %v5970_v52  ;;  %4220 = vmatpush3.bf16.msra.mxu1 %v5973_v58  ;;  %v6297_v58 = vld [vmem:[#allocation2 + $0x124] ss:$12 sps:$4 sm:$0xff]   ;;  %v6304_v52 = vld [vmem:[#allocation2 + $0x128] ss:$12 sps:$4 sm:$0xff]  }
 0x853   :  { %2739 = vmatprep.subr.bf16.mxu0 %v6116_v3  ;;  %4225 = vmatprep.subr.bf16.mxu1 %v6918_v1 }
 0x855   :  { %2668 = vmatmul.mubr.bf16.vlgmr.msra.gmra.mrb[60].mxu0 %v2634_v26  ;;  %4222 = vmatmul.mubr.bf16.vlgmr.msra.gmra.mrb[76].mxu1 %v2634_v26 }
 0x856   :  { %2740 = vmatpush1.bf16.msra.mxu0 %v6258_v30  ;;  %4226 = vmatpush3.bf16.msra.mxu1 %v6261_v59 }
 0x857   :  { %2741 = vmatprep.subr.bf16.mxu0 %v6264_v57  ;;  %4227 = vmatprep.subr.bf16.mxu1 %v6918_v1 }
 0x858   :  { %2771 = vmatprep.mubr.bf16.mxu0 %v6919_v42  ;;  %4241 = vmatprep.mubr.msk.bf16.mxu1 %vm4920_vm7, %v6918_v1 }
 0x85a   :  { %2742 = vmatpush1.bf16.msra.mxu0 %v6271_v16  ;;  %4228 = vmatpush3.bf16.msra.mxu1 %v6274_v8 }
 0x85b   :  { %2743 = vmatprep.subr.bf16.mxu0 %v6277_v31  ;;  %4229 = vmatprep.subr.bf16.mxu1 %v6918_v1 }
 0x85e   :  { %2744 = vmatpush1.bf16.msra.mxu0 %v6281_v24  ;;  %4230 = vmatpush3.bf16.msra.mxu1 %v6284_v5 }
 0x85f   :  { %2745 = vmatprep.subr.bf16.mxu0 %v6287_v44  ;;  %4231 = vmatprep.subr.bf16.mxu1 %v6918_v1 }
 0x862   :  { %2746 = vmatpush1.bf16.msra.mxu0 %v6291_v53  ;;  %4232 = vmatpush3.bf16.msra.mxu1 %v6294_v49 }
 0x863   :  { %2747 = vmatprep.subr.bf16.mxu0 %v6297_v58  ;;  %4233 = vmatprep.subr.bf16.mxu1 %v6918_v1 }
 0x866   :  { %2748 = vmatpush1.bf16.msra.mxu0 %v6301_v40  ;;  %4234 = vmatpush3.bf16.msra.mxu1 %v6304_v52 }
 0x867   :  { %2749 = vmatprep.subr.bf16.mxu0 %v6307_v61  ;;  %4235 = vmatprep.subr.bf16.mxu1 %v6918_v1 }
 0x86a   :  { %2750 = vmatpush1.bf16.msra.mxu0 %v6311_v22  ;;  %4236 = vmatpush3.bf16.msra.mxu1 %v6314_v60 }
 0x86b   :  { %2751 = vmatprep.subr.bf16.mxu0 %v6317_v48  ;;  %4237 = vmatprep.subr.bf16.mxu1 %v6918_v1 }
 0x86e   :  { %2752 = vmatpush1.bf16.msra.mxu0 %v6321_v32  ;;  %4238 = vmatpush3.bf16.msra.mxu1 %v6324_v17 }
 0x86f   :  { %2753 = vmatprep.subr.bf16.mxu0 %v6327_v13  ;;  %4239 = vmatprep.subr.bf16.mxu1 %v6918_v1 }
 0x872   :  { %2754 = vmatpush1.bf16.msra.mxu0 %v6331_v43  ;;  %4240 = vmatpush3.bf16.msra.mxu1 %v6334_v29 }
 0x873   :  { %2843 = vmatprep.subr.bf16.mxu0 %v6337_v41  ;;  %4245 = vmatprep.subr.bf16.mxu1 %v6918_v1 }
 0x875   :  { %2772 = vmatmul.mubr.bf16.vlgmr.msra.gmra.mrb[64].mxu0 %v6212_v20  ;;  %4242 = vmatmul.mubr.bf16.vlgmr.msra.gmra.mrb[80].mxu1 %v6212_v20 }
 0x876   :  { %2844 = vmatpush1.bf16.msra.mxu0 %v6343_v50  ;;  %4246 = vmatpush3.bf16.msra.mxu1 %v6346_v4 }
 0x877   :  { %2845 = vmatprep.subr.bf16.mxu0 %v6349_v51  ;;  %4247 = vmatprep.subr.bf16.mxu1 %v6918_v1 }
 0x878   :  { %2875 = vmatprep.mubr.bf16.mxu0 %v6919_v42  ;;  %4261 = vmatprep.mubr.msk.bf16.mxu1 %vm4920_vm7, %v6918_v1 }
 0x87a   :  { %2846 = vmatpush1.bf16.msra.mxu0 %v6356_v54  ;;  %4248 = vmatpush3.bf16.msra.mxu1 %v6359_v56 }
 0x87b   :  { %2847 = vmatprep.subr.bf16.mxu0 %v6362_v62  ;;  %4249 = vmatprep.subr.bf16.mxu1 %v6918_v1 }
 0x87e   :  { %2848 = vmatpush1.bf16.msra.mxu0 %v6366_v11  ;;  %4250 = vmatpush3.bf16.msra.mxu1 %v6369_v18 }
 0x87f   :  { %2849 = vmatprep.subr.bf16.mxu0 %v6372_v15  ;;  %4251 = vmatprep.subr.bf16.mxu1 %v6918_v1 }
 0x882   :  { %2850 = vmatpush1.bf16.msra.mxu0 %v6376_v0  ;;  %4252 = vmatpush3.bf16.msra.mxu1 %v6379_v27 }
 0x883   :  { %2851 = vmatprep.subr.bf16.mxu0 %v6382_v23  ;;  %4253 = vmatprep.subr.bf16.mxu1 %v6918_v1 }
 0x886   :  { %2852 = vmatpush1.bf16.msra.mxu0 %v6386_v14  ;;  %4254 = vmatpush3.bf16.msra.mxu1 %v6389_v7 }
 0x887   :  { %2853 = vmatprep.subr.bf16.mxu0 %v6392_v12  ;;  %4255 = vmatprep.subr.bf16.mxu1 %v6918_v1 }
 0x88a   :  { %2854 = vmatpush1.bf16.msra.mxu0 %v6396_v2  ;;  %4256 = vmatpush3.bf16.msra.mxu1 %v6399_v28 }
 0x88b   :  { %2855 = vmatprep.subr.bf16.mxu0 %v6402_v9  ;;  %4257 = vmatprep.subr.bf16.mxu1 %v6918_v1 }
 0x88e   :  { %2856 = vmatpush1.bf16.msra.mxu0 %v6406_v38  ;;  %4258 = vmatpush3.bf16.msra.mxu1 %v6409_v63 }
 0x88f   :  { %2857 = vmatprep.subr.bf16.mxu0 %v6412_v36  ;;  %4259 = vmatprep.subr.bf16.mxu1 %v6918_v1 }
 0x892   :  { %2858 = vmatpush1.bf16.msra.mxu0 %v6416_v37  ;;  %4260 = vmatpush3.bf16.msra.mxu1 %v6419_v45 }
 0x893   :  { %2925 = vmatprep.subr.bf16.mxu0 %v6422_v46  ;;  %4265 = vmatprep.subr.bf16.mxu1 %v6918_v1 }
 0x908   :  { %v2628_v35 = vpop.f32.mrb[72].mxu1 }
 0x909   :  { %v4203_v20 = vpop.f32.mrb[73].mxu1 }
 0x90a   :  { %v2631_v26 = vpop.f32.mrb[74].mxu1 }
 0x90b   :  { %v4204_v36 = vpop.f32.mrb[75].mxu1 }
 0x928   :  { %v2669_v63 = vpop.f32.mrb[60].mxu0  ;;  %v2710_v38 = vpop.f32.mrb[76].mxu1 }
 0x929   :  { %v4386_v9 = vadd.f32 %v5479_v21, %v2669_v63  ;;  %v2671_v28 = vpop.f32.mrb[61].mxu0  ;;  %v4223_v37 = vpop.f32.mrb[77].mxu1  ;;  %v2711_v0 = vadd.f32 %v2710_v38, %v7086_v25 }
 0x92a   :  { %v2673_v2 = vpop.f32.mrb[62].mxu0  ;;  %v2713_v12 = vpop.f32.mrb[78].mxu1  ;;  %v4388_v23 = vadd.f32 %v7085_v6, %v2671_v28  ;;  %v2629_v37 = vadd.f32 %v2628_v35, %v5489_v34  ;;  %v7106_v6 = vld [vmem:[#allocation50_spill] sm:$0xff] }
 0x92b   :  { %v3586_v7 = vmul.f32 -1.442695, %v4386_v9  ;;  %v2674_v45 = vpop.f32.mrb[63].mxu0  ;;  %v4224_v14 = vpop.f32.mrb[79].mxu1 }
 0x92c   :  { %v3587_v46 = vmul.f32 -1.442695, %v4388_v23 }
 0x92d   :  { %4695 = vpow2.f32 %v3586_v7 }
 0x92e   :  { %4697 = vpow2.f32 %v3587_v46 }
 0x937   :  { %v4696_v27 = vpop.eup %4695 }
 0x938   :  { %v2724_v20 = vadd.f32 1.0, %v4696_v27  ;;  %v4698_v36 = vpop.eup %4697 }
 0x939   :  { %v2725_v26 = vadd.f32 1.0, %v4698_v36 }
 0x93a   :  { %4699 = vrcp.f32 %v2724_v20  ;;  %v7105_v20 = vld [vmem:[#allocation48_spill] sm:$0xff] }
 0x93b   :  { %4701 = vrcp.f32 %v2725_v26 }
 0x944   :  { %v4700_v63 = vpop.eup %4699 }
 0x945   :  { %v2730_v2 = vmul.f32 %v4700_v63, %v2711_v0  ;;  %v4702_v26 = vpop.eup %4701 }
 0x946   :  { %v2733_v63 = vsub.f32 1.0, %v4702_v26 }
 0x947   :  { %v2731_v12 = vadd.f32 %v2730_v2, %v2629_v37 }
 0x948   :  { %v2773_v9 = vpop.f32.mrb[64].mxu0  ;;  %v2814_v14 = vpop.f32.mrb[80].mxu1 }
 0x949   :  { %4703 = vtanh.f32 %v2731_v12  ;;  %v2774_v7 = vadd.f32 %v2773_v9, %v5274_v47  ;;  %v2775_v23 = vpop.f32.mrb[65].mxu0  ;;  %v4243_v28 = vpop.f32.mrb[81].mxu1  ;;  %v2735_v12 = vmul.f32 %v4702_v26, %v6250_v19 }
 0x94a   :  { %v2776_v27 = vadd.f32 %v2775_v23, %v6984_v55  ;;  %v2777_v45 = vpop.f32.mrb[66].mxu0  ;;  %v2817_v46 = vpop.f32.mrb[82].mxu1 }
 0x94b   :  { %v2820_v36 = vadd.f32 %v2774_v7, %v7105_v20  ;;  %v2778_v38 = vpop.f32.mrb[67].mxu0  ;;  %v4244_v25 = vpop.f32.mrb[83].mxu1  ;;  %v7107_v20 = vld [vmem:[#allocation49_spill] sm:$0xff] }
 0x94c   :  { %v2821_v35 = vadd.f32 %v2776_v27, %v7106_v6  ;;  %v2815_v25 = vadd.f32 %v2814_v14, %v5284_v10 }
 0x94d   :  { %v3588_v0 = vmul.f32 -1.442695, %v2820_v36 }
 0x94e   :  { %v3589_v37 = vmul.f32 -1.442695, %v2821_v35 }
 0x94f   :  { %4705 = vpow2.f32 %v3588_v0 }
 0x950   :  { %4707 = vpow2.f32 %v3589_v37 }
 0x953   :  { %v4704_v2 = vpop.eup %4703 }
 0x954   :  { %v2734_v9 = vmul.f32 %v4704_v2, %v2733_v63 }
 0x956   :  { %v6435_v28 = vadd.f32 %v2735_v12, %v2734_v9  ;;  %v6452_v12 = vld [vmem:[#allocation2 + $0x240] ss:$12 sps:$4 sm:$0xff]   ;;  %v6455_v9 = vld [vmem:[#allocation2 + $0x248] ss:$12 sps:$4 sm:$0xff]  }
 0x959   :  { %v4706_v23 = vpop.eup %4705 }
 0x95a   :  { %v2828_v45 = vadd.f32 1.0, %v4706_v23  ;;  %v4708_v7 = vpop.eup %4707  ;;  %v6458_v23 = vld [vmem:[#allocation2 + $0x25c] ss:$12 sps:$4 sm:$0xff]  }
 0x95b   :  { %v2829_v46 = vadd.f32 1.0, %v4708_v7  ;;  %v6471_v7 = vld [vmem:[#allocation2 + $0x274] ss:$12 sps:$4 sm:$0xff]  }
 0x95c   :  { %4709 = vrcp.f32 %v2828_v45  ;;  %v6468_v45 = vld [vmem:[#allocation2 + $0x260] ss:$12 sps:$4 sm:$0xff]  }
 0x95d   :  { %4711 = vrcp.f32 %v2829_v46  ;;  %v6475_v46 = vld [vmem:[#allocation2 + $0x270] ss:$12 sps:$4 sm:$0xff]  }
 0x966   :  { %v4710_v6 = vpop.eup %4709 }
 0x967   :  { %v2834_v27 = vmul.f32 %v4710_v6, %v2815_v25  ;;  %v4712_v38 = vpop.eup %4711  ;;  %v6478_v25 = vld [vmem:[#allocation2 + $0x278] ss:$12 sps:$4 sm:$0xff]  }
 0x968   :  { %v2837_v35 = vsub.f32 1.0, %v4712_v38  ;;  %v2839_v63 = vmul.f32 %v4712_v38, %v6208_v39  ;;  %v6481_v6 = vld [vmem:[#allocation2 + $0x28c] ss:$12 sps:$4 sm:$0xff]  }
 0x969   :  { %v2835_v36 = vadd.f32 %v7107_v20, %v2834_v27  ;;  %v6485_v27 = vld [vmem:[#allocation2 + $0x288] ss:$12 sps:$4 sm:$0xff]   ;;  %v6488_v20 = vld [vmem:[#allocation2 + $0x290] ss:$12 sps:$4 sm:$0xff]   ;;  %v6495_v38 = vld [vmem:[#allocation2 + $0x2a0] ss:$12 sps:$4 sm:$0xff]  }
 0x96a   :  { %7108 = vst [vmem:[#allocation25_spill] sm:$0xff] %v6495_v38 }
 0x96b   :  { %4713 = vtanh.f32 %v2835_v36  ;;  %v6491_v36 = vld [vmem:[#allocation2 + $0x2a4] ss:$12 sps:$4 sm:$0xff]  }
 0x975   :  { %v4714_v0 = vpop.eup %4713 }
 0x976   :  { %v2838_v26 = vmul.f32 %v4714_v0, %v2837_v35  ;;  %v6498_v35 = vld [vmem:[#allocation2 + $0x2a8] ss:$12 sps:$4 sm:$0xff]  }
 0x977   :  { %7109 = vst [vmem:[#allocation26_spill] sm:$0xff] %v6498_v35  ;;  %v6501_v0 = vld [vmem:[#allocation2 + $0x2bc] ss:$12 sps:$4 sm:$0xff]  }
 0x978   :  { %v2840_v37 = vadd.f32 %v2839_v63, %v2838_v26  ;;  %7110 = vst [vmem:[#allocation27_spill] sm:$0xff] %v6501_v0  ;;  %v6505_v26 = vld [vmem:[#allocation2 + $0x2b8] ss:$12 sps:$4 sm:$0xff]   ;;  %v6508_v63 = vld [vmem:[#allocation2 + $0x2c0] ss:$12 sps:$4 sm:$0xff]  }
 0x979   :  { %7111 = vst [vmem:[#allocation28_spill] sm:$0xff] %v6508_v63 }
 0x97a   :  { %v6444_v2 = vsel %vm2738_vm15, %v2840_v37, %v6208_v39  ;;  %v6465_v39 = vld [vmem:[#allocation2 + $0x258] ss:$12 sps:$4 sm:$0xff]   ;;  %v6511_v37 = vld [vmem:[#allocation2 + $0x2d4] ss:$12 sps:$4 sm:$0xff]  }
 0x97b   :  { %v6448_v14 = vpack.c.bf16 %v6444_v2, %v6444_v2  ;;  %7112 = vst [vmem:[#allocation29_spill] sm:$0xff] %v6511_v37 }
 0x97d   :  { %2876 = vmatmul.mubr.bf16.vlgmr.msra.gmra.mrb[68].mxu0 %v6448_v14  ;;  %4262 = vmatmul.mubr.bf16.vlgmr.msra.gmra.mrb[84].mxu1 %v6448_v14 }
 0x97e   :  { %2926 = vmatpush1.bf16.msra.mxu0 %v6452_v12  ;;  %4266 = vmatpush3.bf16.msra.mxu1 %v6455_v9 }
 0x97f   :  { %2927 = vmatprep.subr.bf16.mxu0 %v6458_v23  ;;  %4267 = vmatprep.subr.bf16.mxu1 %v6918_v1 }
 0x980   :  { %2957 = vmatprep.mubr.bf16.mxu0 %v6919_v42  ;;  %4281 = vmatprep.mubr.msk.bf16.mxu1 %vm4920_vm7, %v6918_v1 }
 0x982   :  { %2928 = vmatpush1.bf16.msra.mxu0 %v6465_v39  ;;  %4268 = vmatpush3.bf16.msra.mxu1 %v6468_v45 }
 0x983   :  { %2929 = vmatprep.subr.bf16.mxu0 %v6471_v7  ;;  %4269 = vmatprep.subr.bf16.mxu1 %v6918_v1 }
 0x986   :  { %2930 = vmatpush1.bf16.msra.mxu0 %v6475_v46  ;;  %4270 = vmatpush3.bf16.msra.mxu1 %v6478_v25 }
 0x987   :  { %2931 = vmatprep.subr.bf16.mxu0 %v6481_v6  ;;  %4271 = vmatprep.subr.bf16.mxu1 %v6918_v1 }
 0x98a   :  { %2932 = vmatpush1.bf16.msra.mxu0 %v6485_v27  ;;  %4272 = vmatpush3.bf16.msra.mxu1 %v6488_v20 }
 0x98b   :  { %2933 = vmatprep.subr.bf16.mxu0 %v6491_v36  ;;  %4273 = vmatprep.subr.bf16.mxu1 %v6918_v1 }
 0x98e   :  { %2934 = vmatpush1.bf16.msra.mxu0 %v6495_v38  ;;  %4274 = vmatpush3.bf16.msra.mxu1 %v6498_v35  ;;  %v6515_v35 = vld [vmem:[#allocation2 + $0x2d0] ss:$12 sps:$4 sm:$0xff]   ;;  %v6521_v38 = vld [vmem:[#allocation2 + $0x2ec] ss:$12 sps:$4 sm:$0xff]  }
 0x98f   :  { %2935 = vmatprep.subr.bf16.mxu0 %v6501_v0  ;;  %4275 = vmatprep.subr.bf16.mxu1 %v6918_v1  ;;  %7113 = vst [vmem:[#allocation30_spill] sm:$0xff] %v6515_v35  ;;  %v6518_v0 = vld [vmem:[#allocation2 + $0x2d8] ss:$12 sps:$4 sm:$0xff]  }
 0x990   :  { %7114 = vst [vmem:[#allocation35_spill] sm:$0xff] %v6518_v0 }
 0x992   :  { %2936 = vmatpush1.bf16.msra.mxu0 %v6505_v26  ;;  %4276 = vmatpush3.bf16.msra.mxu1 %v6508_v63  ;;  %v6531_v63 = vld [vmem:[#allocation2 + $0x2e8] ss:$12 sps:$4 sm:$0xff]  }
 0x993   :  { %2937 = vmatprep.subr.bf16.mxu0 %v6511_v37  ;;  %4277 = vmatprep.subr.bf16.mxu1 %v6918_v1  ;;  %v6529_v37 = vsel %vm2448_vm14, %v6435_v28, %v6250_v19  ;;  %v7116_v19 = vld [vmem:[#allocation32_spill] sm:$0xff] }
 0x996   :  { %2938 = vmatpush1.bf16.msra.mxu0 %v6515_v35  ;;  %4278 = vmatpush3.bf16.msra.mxu1 %v6518_v0  ;;  %v6534_v35 = vld [vmem:[#allocation2 + $0x2f0] ss:$12 sps:$4 sm:$0xff]   ;;  %v2924_v0 = vpack.c.bf16 %v6529_v37, %v6529_v37 }
 0x997   :  { %2939 = vmatprep.subr.bf16.mxu0 %v6521_v38  ;;  %4279 = vmatprep.subr.bf16.mxu1 %v6918_v1 }
 0x99a   :  { %2940 = vmatpush1.bf16.msra.mxu0 %v6531_v63  ;;  %4280 = vmatpush3.bf16.msra.mxu1 %v6534_v35 }
 0x99b   :  { %3029 = vmatprep.subr.bf16.mxu0 %v6116_v3  ;;  %4285 = vmatprep.subr.bf16.mxu1 %v6918_v1  ;;  %v7115_v3 = vld [vmem:[#allocation31_spill] sm:$0xff] }
 0x99d   :  { %2958 = vmatmul.mubr.bf16.vlgmr.msra.gmra.mrb[68].mxu0 %v2924_v0  ;;  %4282 = vmatmul.mubr.bf16.vlgmr.msra.gmra.mrb[88].mxu1 %v2924_v0 }
 0x99e   :  { %3030 = vmatpush1.bf16.msra.mxu0 %v6258_v30  ;;  %4286 = vmatpush3.bf16.msra.mxu1 %v6261_v59  ;;  %v7117_v30 = vld [vmem:[#allocation33_spill] sm:$0xff]  ;;  %v7118_v59 = vld [vmem:[#allocation34_spill] sm:$0xff] }
 0x99f   :  { %3031 = vmatprep.subr.bf16.mxu0 %v6264_v57  ;;  %4287 = vmatprep.subr.bf16.mxu1 %v6918_v1  ;;  %v7119_v57 = vld [vmem:[#allocation58_spill] sm:$0xff] }
 0x9a0   :  { %3061 = vmatprep.mubr.bf16.mxu0 %v6919_v42  ;;  %4301 = vmatprep.mubr.msk.bf16.mxu1 %vm4920_vm7, %v6918_v1 }
 0x9a2   :  { %3032 = vmatpush1.bf16.msra.mxu0 %v6271_v16  ;;  %4288 = vmatpush3.bf16.msra.mxu1 %v6274_v8  ;;  %v7120_v16 = vld [vmem:[#allocation37_spill] sm:$0xff]  ;;  %v7121_v8 = vld [vmem:[#allocation39_spill] sm:$0xff] }
 0x9a3   :  { %3033 = vmatprep.subr.bf16.mxu0 %v6277_v31  ;;  %4289 = vmatprep.subr.bf16.mxu1 %v6918_v1  ;;  %v7122_v31 = vld [vmem:[#allocation38_spill] sm:$0xff] }
 0x9a6   :  { %3034 = vmatpush1.bf16.msra.mxu0 %v6281_v24  ;;  %4290 = vmatpush3.bf16.msra.mxu1 %v6284_v5  ;;  %v7123_v24 = vld [vmem:[#allocation40_spill] sm:$0xff]  ;;  %v7124_v5 = vld [vmem:[#allocation42_spill] sm:$0xff] }
 0x9a7   :  { %3035 = vmatprep.subr.bf16.mxu0 %v6287_v44  ;;  %4291 = vmatprep.subr.bf16.mxu1 %v6918_v1  ;;  %v7125_v44 = vld [vmem:[#allocation41_spill] sm:$0xff] }
 0x9aa   :  { %3036 = vmatpush1.bf16.msra.mxu0 %v6291_v53  ;;  %4292 = vmatpush3.bf16.msra.mxu1 %v6294_v49  ;;  %v7126_v53 = vld [vmem:[#allocation44_spill] sm:$0xff]  ;;  %v7127_v49 = vld [vmem:[#allocation45_spill] sm:$0xff] }
 0x9ab   :  { %3037 = vmatprep.subr.bf16.mxu0 %v6297_v58  ;;  %4293 = vmatprep.subr.bf16.mxu1 %v6918_v1  ;;  %v7128_v58 = vld [vmem:[#allocation51_spill] sm:$0xff] }
 0x9ae   :  { %3038 = vmatpush1.bf16.msra.mxu0 %v6301_v40  ;;  %4294 = vmatpush3.bf16.msra.mxu1 %v6304_v52  ;;  %v7129_v40 = vld [vmem:[#allocation24_spill] sm:$0xff] }
 0x9af   :  { %3039 = vmatprep.subr.bf16.mxu0 %v6307_v61  ;;  %4295 = vmatprep.subr.bf16.mxu1 %v6918_v1 }
 0x9b2   :  { %3040 = vmatpush1.bf16.msra.mxu0 %v6311_v22  ;;  %4296 = vmatpush3.bf16.msra.mxu1 %v6314_v60 }
 0x9b3   :  { %3041 = vmatprep.subr.bf16.mxu0 %v6317_v48  ;;  %4297 = vmatprep.subr.bf16.mxu1 %v6918_v1 }
 0x9b6   :  { %3042 = vmatpush1.bf16.msra.mxu0 %v6321_v32  ;;  %4298 = vmatpush3.bf16.msra.mxu1 %v6324_v17 }
 0x9b7   :  { %3043 = vmatprep.subr.bf16.mxu0 %v6327_v13  ;;  %4299 = vmatprep.subr.bf16.mxu1 %v6918_v1 }
 0x9ba   :  { %3044 = vmatpush1.bf16.msra.mxu0 %v6331_v43  ;;  %4300 = vmatpush3.bf16.msra.mxu1 %v6334_v29 }
 0x9bb   :  { %3133 = vmatprep.subr.bf16.mxu0 %v6337_v41  ;;  %4305 = vmatprep.subr.bf16.mxu1 %v6918_v1 }
 0x9bd   :  { %3062 = vmatmul.mubr.bf16.vlgmr.msra.gmra.mrb[72].mxu0 %v6448_v14  ;;  %4302 = vmatmul.mubr.bf16.vlgmr.msra.gmra.mrb[92].mxu1 %v6448_v14  ;;  %v7131_v14 = vld [vmem:[#allocation55_spill] sm:$0xff] }
 0x9be   :  { %3134 = vmatpush1.bf16.msra.mxu0 %v6343_v50  ;;  %4306 = vmatpush3.bf16.msra.mxu1 %v6346_v4 }
 0x9bf   :  { %3135 = vmatprep.subr.bf16.mxu0 %v6349_v51  ;;  %4307 = vmatprep.subr.bf16.mxu1 %v6918_v1 }
 0x9c0   :  { %3165 = vmatprep.mubr.bf16.mxu0 %v6919_v42  ;;  %4321 = vmatprep.mubr.msk.bf16.mxu1 %vm4920_vm7, %v6918_v1 }
 0x9c2   :  { %3136 = vmatpush1.bf16.msra.mxu0 %v6356_v54  ;;  %4308 = vmatpush3.bf16.msra.mxu1 %v6359_v56  ;;  %v7130_v54 = vld [vmem:[#allocation52_spill] sm:$0xff] }
 0x9c3   :  { %3137 = vmatprep.subr.bf16.mxu0 %v6362_v62  ;;  %4309 = vmatprep.subr.bf16.mxu1 %v6918_v1 }
 0x9c6   :  { %3138 = vmatpush1.bf16.msra.mxu0 %v6366_v11  ;;  %4310 = vmatpush3.bf16.msra.mxu1 %v6369_v18 }
 0x9c7   :  { %3139 = vmatprep.subr.bf16.mxu0 %v6372_v15  ;;  %4311 = vmatprep.subr.bf16.mxu1 %v6918_v1 }
 0x9ca   :  { %3140 = vmatpush1.bf16.msra.mxu0 %v7115_v3  ;;  %4312 = vmatpush3.bf16.msra.mxu1 %v7116_v19 }
 0x9cb   :  { %3141 = vmatprep.subr.bf16.mxu0 %v7117_v30  ;;  %4313 = vmatprep.subr.bf16.mxu1 %v6918_v1 }
 0x9ce   :  { %3142 = vmatpush1.bf16.msra.mxu0 %v7118_v59  ;;  %4314 = vmatpush3.bf16.msra.mxu1 %v7119_v57 }
 0x9cf   :  { %3143 = vmatprep.subr.bf16.mxu0 %v7120_v16  ;;  %4315 = vmatprep.subr.bf16.mxu1 %v6918_v1 }
 0x9d2   :  { %3144 = vmatpush1.bf16.msra.mxu0 %v7121_v8  ;;  %4316 = vmatpush3.bf16.msra.mxu1 %v7122_v31 }
 0x9d3   :  { %3145 = vmatprep.subr.bf16.mxu0 %v7123_v24  ;;  %4317 = vmatprep.subr.bf16.mxu1 %v6918_v1 }
 0x9d6   :  { %3146 = vmatpush1.bf16.msra.mxu0 %v7124_v5  ;;  %4318 = vmatpush3.bf16.msra.mxu1 %v7125_v44 }
 0x9d7   :  { %3147 = vmatprep.subr.bf16.mxu0 %v7126_v53  ;;  %4319 = vmatprep.subr.bf16.mxu1 %v6918_v1 }
 0x9da   :  { %3148 = vmatpush1.bf16.msra.mxu0 %v7127_v49  ;;  %4320 = vmatpush3.bf16.msra.mxu1 %v7128_v58  ;;  %v7132_v49 = vld [vmem:[#allocation53_spill] sm:$0xff] }
 0x9db   :  { %3215 = vmatprep.subr.bf16.mxu0 %v7129_v40  ;;  %4325 = vmatprep.subr.bf16.mxu1 %v6918_v1 }
 0xa50   :  { %v2918_v52 = vpop.f32.mrb[84].mxu1 }
 0xa51   :  { %v4263_v61 = vpop.f32.mrb[85].mxu1  ;;  %v2919_v19 = vadd.f32 %v2918_v52, %v5489_v34 }
 0xa52   :  { %v2921_v22 = vpop.f32.mrb[86].mxu1 }
 0xa53   :  { %v4264_v60 = vpop.f32.mrb[87].mxu1  ;;  %v7133_v22 = vld [vmem:[#allocation56_spill] sm:$0xff] }
 0xa70   :  { %v2959_v48 = vpop.f32.mrb[68].mxu0  ;;  %v3000_v32 = vpop.f32.mrb[88].mxu1 }
 0xa71   :  { %v4390_v17 = vadd.f32 %v5479_v21, %v2959_v48  ;;  %v2961_v13 = vpop.f32.mrb[69].mxu0  ;;  %v4283_v43 = vpop.f32.mrb[89].mxu1  ;;  %v3001_v0 = vadd.f32 %v3000_v32, %v7131_v14 }
 0xa72   :  { %v2963_v29 = vpop.f32.mrb[70].mxu0  ;;  %v3003_v41 = vpop.f32.mrb[90].mxu1  ;;  %v4392_v56 = vadd.f32 %v7130_v54, %v2961_v13 }
 0xa73   :  { %v3590_v50 = vmul.f32 -1.442695, %v4390_v17  ;;  %v2964_v4 = vpop.f32.mrb[71].mxu0  ;;  %v4284_v51 = vpop.f32.mrb[91].mxu1 }
 0xa74   :  { %v3591_v62 = vmul.f32 -1.442695, %v4392_v56 }
 0xa75   :  { %4715 = vpow2.f32 %v3590_v50 }
 0xa76   :  { %4717 = vpow2.f32 %v3591_v62 }
 0xa7f   :  { %v4716_v11 = vpop.eup %4715 }
 0xa80   :  { %v3014_v18 = vadd.f32 1.0, %v4716_v11  ;;  %v4718_v15 = vpop.eup %4717  ;;  %v7134_v11 = vld [vmem:[#allocation54_spill] sm:$0xff] }
 0xa81   :  { %v3015_v28 = vadd.f32 1.0, %v4718_v15 }
 0xa82   :  { %4719 = vrcp.f32 %v3014_v18 }
 0xa83   :  { %4721 = vrcp.f32 %v3015_v28 }
 0xa8c   :  { %v4720_v3 = vpop.eup %4719 }
 0xa8d   :  { %v3020_v30 = vmul.f32 %v4720_v3, %v3001_v0  ;;  %v4722_v48 = vpop.eup %4721 }
 0xa8e   :  { %v3023_v32 = vsub.f32 1.0, %v4722_v48 }
 0xa8f   :  { %v3021_v59 = vadd.f32 %v3020_v30, %v2919_v19 }
 0xa90   :  { %v3063_v57 = vpop.f32.mrb[72].mxu0  ;;  %v3104_v16 = vpop.f32.mrb[92].mxu1 }
 0xa91   :  { %4723 = vtanh.f32 %v3021_v59  ;;  %v3064_v8 = vadd.f32 %v3063_v57, %v5274_v47  ;;  %v3065_v31 = vpop.f32.mrb[73].mxu0  ;;  %v4303_v24 = vpop.f32.mrb[93].mxu1  ;;  %v3025_v47 = vmul.f32 %v4722_v48, %v6529_v37  ;;  %v3105_v51 = vadd.f32 %v3104_v16, %v5284_v10 }
 0xa92   :  { %v3066_v5 = vadd.f32 %v3065_v31, %v6984_v55  ;;  %v3067_v44 = vpop.f32.mrb[74].mxu0  ;;  %v3107_v53 = vpop.f32.mrb[94].mxu1 }
 0xa93   :  { %v3110_v58 = vadd.f32 %v3064_v8, %v7132_v49  ;;  %v3068_v40 = vpop.f32.mrb[75].mxu0  ;;  %v4304_v61 = vpop.f32.mrb[95].mxu1 }
 0xa94   :  { %v3111_v52 = vadd.f32 %v3066_v5, %v7133_v22 }
 0xa95   :  { %v3592_v60 = vmul.f32 -1.442695, %v3110_v58 }
 0xa96   :  { %v3593_v17 = vmul.f32 -1.442695, %v3111_v52 }
 0xa97   :  { %4725 = vpow2.f32 %v3592_v60 }
 0xa98   :  { %4727 = vpow2.f32 %v3593_v17 }
 0xa9b   :  { %v4724_v13 = vpop.eup %4723 }
 0xa9c   :  { %v3024_v43 = vmul.f32 %v4724_v13, %v3023_v32 }
 0xa9e   :  { %v3026_v29 = vadd.f32 %v3025_v47, %v3024_v43 }
 0xaa1   :  { %v4726_v55 = vpop.eup %4725 }
 0xaa2   :  { %v3118_v41 = vadd.f32 1.0, %v4726_v55  ;;  %v4728_v50 = vpop.eup %4727 }
 0xaa3   :  { %v3119_v4 = vadd.f32 1.0, %v4728_v50 }
 0xaa4   :  { %4729 = vrcp.f32 %v3118_v41 }
 0xaa5   :  { %4731 = vrcp.f32 %v3119_v4 }
 0xaae   :  { %v4730_v56 = vpop.eup %4729 }
 0xaaf   :  { %v3124_v62 = vmul.f32 %v4730_v56, %v3105_v51  ;;  %v4732_v15 = vpop.eup %4731 }
 0xab0   :  { %v3127_v28 = vsub.f32 1.0, %v4732_v15  ;;  %v3129_v19 = vmul.f32 %v4732_v15, %v6444_v2 }
 0xab1   :  { %v3125_v18 = vadd.f32 %v7134_v11, %v3124_v62 }
 0xab3   :  { %4733 = vtanh.f32 %v3125_v18 }
 0xabd   :  { %v4734_v0 = vpop.eup %4733 }
 0xabe   :  { %v3128_v3 = vmul.f32 %v4734_v0, %v3127_v28  ;;  %v3411_v0 = vld [vmem:[%s6702_s3 + $0x4] ss:$0 sm:$0xff] }
 0xac0   :  { %v3130_v30 = vadd.f32 %v3129_v19, %v3128_v3  ;;  %v3412_v19 = vld [vmem:[%s6702_s3 + $0xb] ss:$0 sm:$0xff] }
 0xac2   :  { %v3131_v59 = vsel %vm3028_vm0, %v3130_v30, %v6444_v2  ;;  %v7136_v2 = vld [vmem:[#allocation26_spill] sm:$0xff] }
 0xac3   :  { %v3132_v10 = vpack.c.bf16 %v3131_v59, %v3131_v59 }
 0xac5   :  { %3166 = vmatmul.mubr.bf16.vlgmr.msra.gmra.mrb[76].mxu0 %v3132_v10  ;;  %4322 = vmatmul.mubr.bf16.vlgmr.msra.gmra.mrb[96].mxu1 %v3132_v10 }
 0xac6   :  { %3216 = vmatpush1.bf16.msra.mxu0 %v6452_v12  ;;  %4326 = vmatpush3.bf16.msra.mxu1 %v6455_v9  ;;  %v7137_v12 = vld [vmem:[#allocation27_spill] sm:$0xff]  ;;  %v7138_v9 = vld [vmem:[#allocation28_spill] sm:$0xff] }
 0xac7   :  { %3217 = vmatprep.subr.bf16.mxu0 %v6458_v23  ;;  %4327 = vmatprep.subr.bf16.mxu1 %v6918_v1  ;;  %v7139_v23 = vld [vmem:[#allocation29_spill] sm:$0xff] }
 0xac8   :  { %3247 = vmatprep.mubr.bf16.mxu0 %v6919_v42  ;;  %4341 = vmatprep.mubr.msk.bf16.mxu1 %vm4920_vm7, %v6918_v1  ;;  %v7135_v42 = vld [vmem:[#allocation25_spill] sm:$0xff] }
 0xaca   :  { %3218 = vmatpush1.bf16.msra.mxu0 %v6465_v39  ;;  %4328 = vmatpush3.bf16.msra.mxu1 %v6468_v45  ;;  %v7140_v39 = vld [vmem:[#allocation30_spill] sm:$0xff]  ;;  %v7141_v45 = vld [vmem:[#allocation35_spill] sm:$0xff] }
 0xacb   :  { %3219 = vmatprep.subr.bf16.mxu0 %v6471_v7  ;;  %4329 = vmatprep.subr.bf16.mxu1 %v6918_v1  ;;  %v6663_v7 = vsel %vm2738_vm15, %v3026_v29, %v6529_v37 }
 0xace   :  { %3220 = vmatpush1.bf16.msra.mxu0 %v6475_v46  ;;  %4330 = vmatpush3.bf16.msra.mxu1 %v6478_v25  ;;  %v3214_v46 = vpack.c.bf16 %v6663_v7, %v6663_v7  ;;  %v4577_v25 = vld [vmem:[#allocation2 + $0x300] ss:$12 sps:$4 sm:$0xff]  }
 0xacf   :  { %3221 = vmatprep.subr.bf16.mxu0 %v6481_v6  ;;  %4331 = vmatprep.subr.bf16.mxu1 %v6918_v1  ;;  %v4578_v6 = vld [vmem:[#allocation2 + $0x318] ss:$12 sps:$4 sm:$0xff]  }
 0xad2   :  { %3222 = vmatpush1.bf16.msra.mxu0 %v6485_v27  ;;  %4332 = vmatpush3.bf16.msra.mxu1 %v6488_v20  ;;  %v4579_v27 = vld [vmem:[#allocation2 + $0x330] ss:$12 sps:$4 sm:$0xff]   ;;  %v4580_v20 = vld [vmem:[#allocation2 + $0x348] ss:$12 sps:$4 sm:$0xff]  }
 0xad3   :  { %3223 = vmatprep.subr.bf16.mxu0 %v6491_v36  ;;  %4333 = vmatprep.subr.bf16.mxu1 %v6918_v1  ;;  %v4581_v36 = vld [vmem:[#allocation2 + $0x360] ss:$12 sps:$4 sm:$0xff]  }
 0xad6   :  { %3224 = vmatpush1.bf16.msra.mxu0 %v7135_v42  ;;  %4334 = vmatpush3.bf16.msra.mxu1 %v7136_v2 }
 0xad7   :  { %3225 = vmatprep.subr.bf16.mxu0 %v7137_v12  ;;  %4335 = vmatprep.subr.bf16.mxu1 %v6918_v1 }
 0xada   :  { %3226 = vmatpush1.bf16.msra.mxu0 %v6505_v26  ;;  %4336 = vmatpush3.bf16.msra.mxu1 %v7138_v9  ;;  %v4584_v26 = vld [vmem:[#allocation2 + $0x3a8] ss:$12 sps:$4 sm:$0xff]  }
 0xadb   :  { %3227 = vmatprep.subr.bf16.mxu0 %v7139_v23  ;;  %4337 = vmatprep.subr.bf16.mxu1 %v6918_v1 }
 0xade   :  { %3228 = vmatpush1.bf16.msra.mxu0 %v7140_v39  ;;  %4338 = vmatpush3.bf16.msra.mxu1 %v7141_v45 }
 0xadf   :  { %3229 = vmatprep.subr.bf16.mxu0 %v6521_v38  ;;  %4339 = vmatprep.subr.bf16.mxu1 %v6918_v1  ;;  %v4582_v38 = vld [vmem:[#allocation2 + $0x378] ss:$12 sps:$4 sm:$0xff]  }
 0xae2   :  { %3230 = vmatpush1.bf16.msra.mxu0 %v6531_v63  ;;  %4340 = vmatpush3.bf16.msra.mxu1 %v6534_v35  ;;  %v4583_v35 = vld [vmem:[#allocation2 + $0x390] ss:$12 sps:$4 sm:$0xff]  }
 0xae3   :  { %4345 = vmatprep.subr.bf16.mxu0 %v6918_v1 }
 0xae5   :  { %3248 = vmatmul.mubr.bf16.vlgmr.msra.gmra.mrb[76].mxu0 %v3214_v46  ;;  %4342 = vmatmul.mubr.bf16.vlgmr.msra.gmra.mrb[100].mxu1 %v3214_v46 }
 0xae6   :  { %4361 = vmatprep.mubr.msk.bf16.mxu0 %vm4920_vm7, %v6918_v1  ;;  %4346 = vmatpush3.bf16.msra.mxu0 %v4577_v25 }
 0xae7   :  { %4347 = vmatprep.subr.bf16.mxu0 %v6918_v1 }
 0xaea   :  { %4348 = vmatpush3.bf16.msra.mxu0 %v4578_v6 }
 0xaeb   :  { %4349 = vmatprep.subr.bf16.mxu0 %v6918_v1 }
 0xaee   :  { %4350 = vmatpush3.bf16.msra.mxu0 %v4579_v27 }
 0xaef   :  { %4351 = vmatprep.subr.bf16.mxu0 %v6918_v1 }
 0xaf2   :  { %4352 = vmatpush3.bf16.msra.mxu0 %v4580_v20 }
 0xaf3   :  { %4353 = vmatprep.subr.bf16.mxu0 %v6918_v1 }
 0xaf6   :  { %4354 = vmatpush3.bf16.msra.mxu0 %v4581_v36 }
 0xaf7   :  { %4355 = vmatprep.subr.bf16.mxu0 %v6918_v1 }
 0xafa   :  { %4356 = vmatpush3.bf16.msra.mxu0 %v4582_v38 }
 0xafb   :  { %4357 = vmatprep.subr.bf16.mxu0 %v6918_v1 }
 0xafe   :  { %4358 = vmatpush3.bf16.msra.mxu0 %v4583_v35 }
 0xaff   :  { %4359 = vmatprep.subr.bf16.mxu0 %v6918_v1 }
 0xb02   :  { %4360 = vmatpush3.bf16.msra.mxu0 %v4584_v26 }
 0xb98   :  { %v3208_v63 = vpop.f32.mrb[96].mxu1 }
 0xb99   :  { %v4323_v37 = vpop.f32.mrb[97].mxu1  ;;  %v3209_v13 = vadd.f32 %v3208_v63, %v5489_v34  ;;  %v3319_v34 = vld [vmem:[%s6702_s3 + $0x3] ss:$0 sm:$0xff] }
 0xb9a   :  { %v3211_v57 = vpop.f32.mrb[98].mxu1 }
 0xb9b   :  { %v4324_v16 = vpop.f32.mrb[99].mxu1 }
 0xbb8   :  { %v3249_v8 = vpop.f32.mrb[76].mxu0  ;;  %v3290_v31 = vpop.f32.mrb[100].mxu1 }
 0xbb9   :  { %v4394_v24 = vadd.f32 %v5479_v21, %v3249_v8  ;;  %v3251_v5 = vpop.f32.mrb[77].mxu0  ;;  %v4343_v44 = vpop.f32.mrb[101].mxu1  ;;  %v3291_v17 = vadd.f32 %v3290_v31, %v7131_v14 }
 0xbba   :  { %v3253_v53 = vpop.f32.mrb[78].mxu0  ;;  %v3293_v49 = vpop.f32.mrb[102].mxu1  ;;  %v4396_v22 = vadd.f32 %v7130_v54, %v3251_v5 }
 0xbbb   :  { %v3594_v58 = vmul.f32 -1.442695, %v4394_v24  ;;  %v3254_v40 = vpop.f32.mrb[79].mxu0  ;;  %v4344_v61 = vpop.f32.mrb[103].mxu1 }
 0xbbc   :  { %v3595_v1 = vmul.f32 -1.442695, %v4396_v22 }
 0xbbd   :  { %4735 = vpow2.f32 %v3594_v58 }
 0xbbe   :  { %4737 = vpow2.f32 %v3595_v1 }
 0xbc7   :  { %v4736_v52 = vpop.eup %4735 }
 0xbc8   :  { %v3304_v60 = vadd.f32 1.0, %v4736_v52  ;;  %v4738_v48 = vpop.eup %4737 }
 0xbc9   :  { %v3305_v32 = vadd.f32 1.0, %v4738_v48 }
 0xbca   :  { %4739 = vrcp.f32 %v3304_v60 }
 0xbcb   :  { %4741 = vrcp.f32 %v3305_v32 }
 0xbd4   :  { %v4740_v21 = vpop.eup %4739 }
 0xbd5   :  { %v3310_v47 = vmul.f32 %v4740_v21, %v3291_v17  ;;  %v4742_v29 = vpop.eup %4741 }
 0xbd6   :  { %v3313_v55 = vsub.f32 1.0, %v4742_v29  ;;  %v3315_v50 = vmul.f32 %v4742_v29, %v6663_v7 }
 0xbd7   :  { %v3311_v43 = vadd.f32 %v3310_v47, %v3209_v13 }
 0xbd9   :  { %4743 = vtanh.f32 %v3311_v43 }
 0xbe3   :  { %v4744_v54 = vpop.eup %4743 }
 0xbe4   :  { %v3314_v41 = vmul.f32 %v4744_v54, %v3313_v55 }
 0xbe6   :  { %v3316_v4 = vadd.f32 %v3315_v50, %v3314_v41 }
 0xbe8   :  { %v3317_v51 = vsel %vm3028_vm0, %v3316_v4, %v6663_v7 }
 0xbe9   :  { %v3318_v56 = vpack.c.bf16 %v3317_v51, %v3317_v51 }
 0xbeb   :  { %4362 = vmatmul.mubr.bf16.vlgmr.msra.gmra.mrb[80].mxu0 %v3318_v56 }
 0xcbe   :  { %v3402_v14 = vpop.f32.mrb[80].mxu0 }
 0xcbf   :  { %v3403_v62 = vadd.f32 %v3402_v14, %v3319_v34  ;;  %v4363_v11 = vpop.f32.mrb[81].mxu0 }
 0xcc0   :  { %v3405_v18 = vpop.f32.mrb[82].mxu0 }
 0xcc1   :  { %v3409_v15 = vmul.f32 0.01, %v3403_v62  ;;  %v4364_v28 = vpop.f32.mrb[83].mxu0  ;;  %vm3408_vm1 = vcmp.gt.f32.partialorder %v3403_v62, 0.0 }
 0xcc3   :  { %v3410_v3 = vsel %vm3408_vm1, %v3403_v62, %v3409_v15 }
 0xcc4   :  { %v3413_v33 = vmul.f32 %v3411_v0, %v3410_v3 }
 0xcc6   :  { %3414 = vadd.xlane.f32.xlu1 %v3413_v33 }
 0xd53   :  { %v3415_v30 = vpop.xlane.xlu1 %3414 }
 0xd54   :  { %v3416_v59 = vadd.f32 %v3415_v30, %v3412_v19 }
 0xd56   :  { %3418 = vst.msk [vmem:[%s6703_s4] sm:$0xff] %vm3417_vm3, %v3416_v59 }
 0xd57   :  { %3423 = vsyncpa [#allocation3], 1 }

</bundles_post_ra>
